<compile_context>
chip_gen: v6e
topology: v6e:2x2x1
jax: 0.10.0
libtpu: 0.0.40
codegen_flags: <defaults>
</compile_context>

<pallas_src>
import math

import jax
import jax.numpy as jnp
from jax.experimental import pallas as pl
from jax.experimental.pallas import tpu as pltpu

# ---------------- small-BERT config (scaled-down stand-in for bert-base) ----
B = 2            # batch
S = 8            # sequence length
H = 32           # hidden size (stands in for 768)
NH = 2           # attention heads
DH = H // NH     # head dim
FF = 4 * H       # intermediate size
LAYERS = 2       # encoder layers
VOCAB = 64
TYPE_VOCAB = 2
MAX_POS = 16
N_CLASSES = 3
LANE = 128       # padded classifier output width (unmasked lane-dense store)
LN_EPS = 1e-12   # BERT layernorm eps


# ------------------------------- fused Pallas kernel -------------------------
def _fused_forward_kernel(
    # scalar-prefetch (SMEM)
    ids_ref, tt_ref,
    # VMEM inputs
    amask_ref, wemb_ref, pemb_ref, temb_ref,
    emb_ln_g_ref, emb_ln_b_ref,
    wqkv_ref, bqkv_ref, wo_ref, bo_ref, ln1_g_ref, ln1_b_ref,
    wi_ref, bi_ref, wf_ref, bf_ref, ln2_g_ref, ln2_b_ref,
    pool_w_ref, pool_b_ref, out_w_ref, out_b_ref,
    # output
    logits_ref,
):
    """Entire BERT-style forward: in-kernel embedding gather -> LN ->
    LAYERS x (attn + FFN) -> pooler -> dropout(identity) -> classifier.
    All activations stay in VMEM / vregs."""
    scale = 1.0 / math.sqrt(DH)

    def layernorm(x, g, b):
        mu = jnp.mean(x, axis=-1, keepdims=True)
        var = jnp.mean((x - mu) * (x - mu), axis=-1, keepdims=True)
        return (x - mu) * jax.lax.rsqrt(var + LN_EPS) * g + b

    def matmul(x, w_bf16):
        # bf16 MXU inputs, f32 accumulation; elementwise math stays f32.
        return jnp.dot(x.astype(jnp.bfloat16), w_bf16,
                       preferred_element_type=jnp.float32)

    # --- embedding gather (word + token-type via dynamic row loads, + pos) ---
    rows = []
    for b in range(B):
        for s in range(S):
            w_row = wemb_ref[pl.ds(ids_ref[b, s], 1), :]     # (1, H)
            t_row = temb_ref[pl.ds(tt_ref[b, s], 1), :]      # (1, H)
            rows.append(w_row + t_row + pemb_ref[s:s + 1, :])
    emb = jnp.concatenate(rows, axis=0)                      # (B*S, H)

    # --- additive attention mask built in-kernel: 0 keep, -1e4 pad ---
    mask_add = (1.0 - amask_ref[...].astype(jnp.float32)) * -10000.0   # (B, S)

    # --- embeddings LayerNorm ---
    h = layernorm(emb, emb_ln_g_ref[...], emb_ln_b_ref[...])           # (B*S, H)

    # --- encoder layers (trace-time Python loop; weights indexed statically) ---
    for l in range(LAYERS):
        # fused QKV matmul; columns are head-major: head n -> [q|k|v] in 3*DH lanes
        qkv = matmul(h, wqkv_ref[l]) + bqkv_ref[l]           # (B*S, 3H)

        batch_ctx = []
        for b in range(B):
            r0 = b * S
            m_b = mask_add[b:b + 1, :]                       # (1, S) key mask
            head_outs = []
            for n in range(NH):
                c0 = n * 3 * DH
                blk = qkv[r0:r0 + S, c0:c0 + 3 * DH]         # ONE contiguous slice
                q = blk[:, 0:DH].astype(jnp.bfloat16)
                k = blk[:, DH:2 * DH].astype(jnp.bfloat16)
                v = blk[:, 2 * DH:3 * DH].astype(jnp.bfloat16)
                s_ = jax.lax.dot_general(
                    q, k, (((1,), (1,)), ((), ())),
                    preferred_element_type=jnp.float32) * scale
                s_ = s_ + m_b
                s_ = s_ - jnp.max(s_, axis=-1, keepdims=True)
                p = jnp.exp(s_)
                p = p * pl.reciprocal(jnp.sum(p, axis=-1, keepdims=True),
                                      approx=True)
                head_outs.append(jnp.dot(p.astype(jnp.bfloat16), v,
                                         preferred_element_type=jnp.float32))
            batch_ctx.append(jnp.concatenate(head_outs, axis=-1))      # (S, H)
        ctx = jnp.concatenate(batch_ctx, axis=0)                       # (B*S, H)

        attn_out = matmul(ctx, wo_ref[l]) + bo_ref[l]
        h1 = layernorm(attn_out + h, ln1_g_ref[l], ln1_b_ref[l])

        ff = matmul(h1, wi_ref[l]) + bi_ref[l]
        # tanh-approx GELU (HF BERT uses exact erf-GELU; negligible numeric diff)
        ff = 0.5 * ff * (1.0 + jnp.tanh(
            0.7978845608028654 * (ff + 0.044715 * ff * ff * ff)))
        ff = matmul(ff, wf_ref[l]) + bf_ref[l]
        h = layernorm(ff + h1, ln2_g_ref[l], ln2_b_ref[l])

    # --- pooler: Linear + tanh on the [CLS] token (BERT pooler_output) ---
    cls = h.reshape(B, S, H)[:, 0, :]                         # (B, H) tile-aligned
    pooled = jnp.tanh(matmul(cls, pool_w_ref[...]) + pool_b_ref[...])

    # --- dropout(p=0.9): eval-mode identity ---
    # TODO(synk): training-mode stochastic dropout (pltpu.prng_*) not applied.

    # --- classifier head (lane-padded to 128; sliced to N_CLASSES outside) ---
    logits_ref[...] = matmul(pooled, out_w_ref[...]) + out_b_ref[...]   # (B, 128)


def _full_spec(shape):
    nd = len(shape)

    def index_map(i, *prefetch_refs):   # scalar-prefetch refs arrive positionally
        return (0,) * nd

    return pl.BlockSpec(shape, index_map)


# ------------------------------ parameter setup ------------------------------
def _pack_qkv_head_major(wq, wk, wv):
    """(L,H,H) x3 -> (L,H,3H) with per-head contiguous [q|k|v] columns."""
    parts = [w.reshape(LAYERS, H, NH, DH) for w in (wq, wk, wv)]
    packed = jnp.stack(parts, axis=3)                # (L, H, NH, 3, DH)
    return packed.reshape(LAYERS, H, 3 * H)


def init_params(key):
    def nrm(k, shape, scale=0.02):
        return scale * jax.random.normal(k, shape, dtype=jnp.float32)

    ks = jax.random.split(key, 12)
    wq = nrm(ks[3], (LAYERS, H, H))
    wk = nrm(ks[4], (LAYERS, H, H))
    wv = nrm(ks[5], (LAYERS, H, H))

    out_w_real = nrm(ks[9], (H, N_CLASSES))
    out_w = jnp.zeros((H, LANE), jnp.float32).at[:, :N_CLASSES].set(out_w_real)

    return {
        "word_emb": nrm(ks[0], (VOCAB, H)),
        "pos_emb": nrm(ks[1], (MAX_POS, H)),
        "type_emb": nrm(ks[2], (TYPE_VOCAB, H)),
        "emb_ln_g": jnp.ones((1, H), jnp.float32),
        "emb_ln_b": jnp.zeros((1, H), jnp.float32),
        # fused head-major QKV projection per layer, bf16 weights (f32 bias/LN)
        "wqkv": _pack_qkv_head_major(wq, wk, wv).astype(jnp.bfloat16),
        "bqkv": jnp.zeros((LAYERS, 1, 3 * H), jnp.float32),   # head-major layout
        "wo": nrm(ks[6], (LAYERS, H, H)).astype(jnp.bfloat16),
        "bo": jnp.zeros((LAYERS, 1, H), jnp.float32),
        "ln1_g": jnp.ones((LAYERS, 1, H), jnp.float32),
        "ln1_b": jnp.zeros((LAYERS, 1, H), jnp.float32),
        "wi": nrm(ks[7], (LAYERS, H, FF)).astype(jnp.bfloat16),
        "bi": jnp.zeros((LAYERS, 1, FF), jnp.float32),
        "wf": nrm(ks[8], (LAYERS, FF, H)).astype(jnp.bfloat16),
        "bf": jnp.zeros((LAYERS, 1, H), jnp.float32),
        "ln2_g": jnp.ones((LAYERS, 1, H), jnp.float32),
        "ln2_b": jnp.zeros((LAYERS, 1, H), jnp.float32),
        "pool_w": nrm(ks[10], (H, H)).astype(jnp.bfloat16),
        "pool_b": jnp.zeros((1, H), jnp.float32),
        "out_w": out_w.astype(jnp.bfloat16),                   # lane-padded to 128
        "out_b": jnp.zeros((1, LANE), jnp.float32),
    }


# ------------------------------- forward pass --------------------------------
@jax.jit
def gbv_classifier_forward(params, input_ids, attention_mask, token_type_ids):
    vmem_inputs = (
        attention_mask.astype(jnp.int32),
        params["word_emb"], params["pos_emb"], params["type_emb"],
        params["emb_ln_g"], params["emb_ln_b"],
        params["wqkv"], params["bqkv"], params["wo"], params["bo"],
        params["ln1_g"], params["ln1_b"],
        params["wi"], params["bi"], params["wf"], params["bf"],
        params["ln2_g"], params["ln2_b"],
        params["pool_w"], params["pool_b"], params["out_w"], params["out_b"],
    )

    grid_spec = pltpu.PrefetchScalarGridSpec(
        num_scalar_prefetch=2,                 # input_ids, token_type_ids -> SMEM
        grid=(1,),
        in_specs=[_full_spec(x.shape) for x in vmem_inputs],
        out_specs=_full_spec((B, LANE)),
    )

    logits_pad = pl.pallas_call(
        _fused_forward_kernel,
        out_shape=jax.ShapeDtypeStruct((B, LANE), jnp.float32),
        grid_spec=grid_spec,
        compiler_params=pltpu.CompilerParams(
            dimension_semantics=("arbitrary",)),
        cost_estimate=pl.CostEstimate(
            flops=900_000, transcendentals=5_000, bytes_accessed=80_000),
    )(input_ids.astype(jnp.int32), token_type_ids.astype(jnp.int32), *vmem_inputs)

    return logits_pad[:, :N_CLASSES]


# ------------------------------------ main -----------------------------------
if __name__ == "__main__":
    key = jax.random.PRNGKey(0)
    k_param, k_ids, k_type = jax.random.split(key, 3)

    params = init_params(k_param)

    input_ids = jax.random.randint(k_ids, (B, S), 0, VOCAB, dtype=jnp.int32)
    attention_mask = jnp.array(
        [[1, 1, 1, 1, 1, 1, 0, 0],
         [1, 1, 1, 1, 0, 0, 0, 0]], dtype=jnp.int32)
    token_type_ids = jax.random.randint(k_type, (B, S), 0, TYPE_VOCAB, dtype=jnp.int32)

    logits = gbv_classifier_forward(params, input_ids, attention_mask, token_type_ids)
    logits = jax.block_until_ready(logits)

    assert logits.shape == (B, N_CLASSES)
    assert jnp.all(jnp.isfinite(logits))
    print("KERNEL_OK")
</pallas_src>

<mosaic_0001>
module attributes {stable_mosaic.version = 11 : i64} {
  func.func @_fused_forward_kernel(%arg0: i32, %arg1: memref<2x8xi32, #tpu.memory_space<smem>>, %arg2: memref<2x8xi32, #tpu.memory_space<smem>>, %arg3: memref<2x8xi32, #tpu.memory_space<vmem>>, %arg4: memref<64x32xf32, #tpu.memory_space<vmem>>, %arg5: memref<16x32xf32, #tpu.memory_space<vmem>>, %arg6: memref<2x32xf32, #tpu.memory_space<vmem>>, %arg7: memref<1x32xf32, #tpu.memory_space<vmem>>, %arg8: memref<1x32xf32, #tpu.memory_space<vmem>>, %arg9: memref<2x32x96xbf16, #tpu.memory_space<vmem>>, %arg10: memref<2x1x96xf32, #tpu.memory_space<vmem>>, %arg11: memref<2x32x32xbf16, #tpu.memory_space<vmem>>, %arg12: memref<2x1x32xf32, #tpu.memory_space<vmem>>, %arg13: memref<2x1x32xf32, #tpu.memory_space<vmem>>, %arg14: memref<2x1x32xf32, #tpu.memory_space<vmem>>, %arg15: memref<2x32x128xbf16, #tpu.memory_space<vmem>>, %arg16: memref<2x1x128xf32, #tpu.memory_space<vmem>>, %arg17: memref<2x128x32xbf16, #tpu.memory_space<vmem>>, %arg18: memref<2x1x32xf32, #tpu.memory_space<vmem>>, %arg19: memref<2x1x32xf32, #tpu.memory_space<vmem>>, %arg20: memref<2x1x32xf32, #tpu.memory_space<vmem>>, %arg21: memref<32x32xbf16, #tpu.memory_space<vmem>>, %arg22: memref<1x32xf32, #tpu.memory_space<vmem>>, %arg23: memref<32x128xbf16, #tpu.memory_space<vmem>>, %arg24: memref<1x128xf32, #tpu.memory_space<vmem>>, %arg25: memref<2x128xf32, #tpu.memory_space<vmem>>) attributes {dimension_semantics = [#tpu.dimension_semantics<arbitrary>], iteration_bounds = array<i64: 1>, scalar_prefetch = 2 : i64, scratch_operands = 0 : i64, tpu.core_type = #tpu.core_type<tc>, window_params = [{pipeline_mode = #tpu.pipeline_mode<synchronous>, transform_indices = @transform_0, window_bounds = array<i64: 2, 8>}, {pipeline_mode = #tpu.pipeline_mode<synchronous>, transform_indices = @transform_1, window_bounds = array<i64: 64, 32>}, {pipeline_mode = #tpu.pipeline_mode<synchronous>, transform_indices = @transform_2, window_bounds = array<i64: 16, 32>}, {pipeline_mode = #tpu.pipeline_mode<synchronous>, transform_indices = @transform_3, window_bounds = array<i64: 2, 32>}, {pipeline_mode = #tpu.pipeline_mode<synchronous>, transform_indices = @transform_4, window_bounds = array<i64: 1, 32>}, {pipeline_mode = #tpu.pipeline_mode<synchronous>, transform_indices = @transform_5, window_bounds = array<i64: 1, 32>}, {pipeline_mode = #tpu.pipeline_mode<synchronous>, transform_indices = @transform_6, window_bounds = array<i64: 2, 32, 96>}, {pipeline_mode = #tpu.pipeline_mode<synchronous>, transform_indices = @transform_7, window_bounds = array<i64: 2, 1, 96>}, {pipeline_mode = #tpu.pipeline_mode<synchronous>, transform_indices = @transform_8, window_bounds = array<i64: 2, 32, 32>}, {pipeline_mode = #tpu.pipeline_mode<synchronous>, transform_indices = @transform_9, window_bounds = array<i64: 2, 1, 32>}, {pipeline_mode = #tpu.pipeline_mode<synchronous>, transform_indices = @transform_10, window_bounds = array<i64: 2, 1, 32>}, {pipeline_mode = #tpu.pipeline_mode<synchronous>, transform_indices = @transform_11, window_bounds = array<i64: 2, 1, 32>}, {pipeline_mode = #tpu.pipeline_mode<synchronous>, transform_indices = @transform_12, window_bounds = array<i64: 2, 32, 128>}, {pipeline_mode = #tpu.pipeline_mode<synchronous>, transform_indices = @transform_13, window_bounds = array<i64: 2, 1, 128>}, {pipeline_mode = #tpu.pipeline_mode<synchronous>, transform_indices = @transform_14, window_bounds = array<i64: 2, 128, 32>}, {pipeline_mode = #tpu.pipeline_mode<synchronous>, transform_indices = @transform_15, window_bounds = array<i64: 2, 1, 32>}, {pipeline_mode = #tpu.pipeline_mode<synchronous>, transform_indices = @transform_16, window_bounds = array<i64: 2, 1, 32>}, {pipeline_mode = #tpu.pipeline_mode<synchronous>, transform_indices = @transform_17, window_bounds = array<i64: 2, 1, 32>}, {pipeline_mode = #tpu.pipeline_mode<synchronous>, transform_indices = @transform_18, window_bounds = array<i64: 32, 32>}, {pipeline_mode = #tpu.pipeline_mode<synchronous>, transform_indices = @transform_19, window_bounds = array<i64: 1, 32>}, {pipeline_mode = #tpu.pipeline_mode<synchronous>, transform_indices = @transform_20, window_bounds = array<i64: 32, 128>}, {pipeline_mode = #tpu.pipeline_mode<synchronous>, transform_indices = @transform_21, window_bounds = array<i64: 1, 128>}, {pipeline_mode = #tpu.pipeline_mode<synchronous>, transform_indices = @transform_22, window_bounds = array<i64: 2, 128>}]} {
    %c0 = arith.constant 0 : index
    %c0_0 = arith.constant 0 : index
    %0 = memref.load %arg1[%c0, %c0_0] : memref<2x8xi32, #tpu.memory_space<smem>>
    %1 = arith.index_cast %0 : i32 to index
    %c0_1 = arith.constant 0 : index
    %2 = vector.load %arg4[%1, %c0_1] : memref<64x32xf32, #tpu.memory_space<vmem>>, vector<1x32xf32>
    %c0_2 = arith.constant 0 : index
    %c0_3 = arith.constant 0 : index
    %3 = memref.load %arg2[%c0_2, %c0_3] : memref<2x8xi32, #tpu.memory_space<smem>>
    %4 = arith.index_cast %3 : i32 to index
    %c0_4 = arith.constant 0 : index
    %5 = vector.load %arg6[%4, %c0_4] : memref<2x32xf32, #tpu.memory_space<vmem>>, vector<1x32xf32>
    %6 = arith.addf %2, %5 : vector<1x32xf32>
    %c0_5 = arith.constant 0 : index
    %c0_6 = arith.constant 0 : index
    %7 = vector.load %arg5[%c0_5, %c0_6] : memref<16x32xf32, #tpu.memory_space<vmem>>, vector<1x32xf32>
    %8 = arith.addf %6, %7 : vector<1x32xf32>
    %c0_7 = arith.constant 0 : index
    %c1 = arith.constant 1 : index
    %9 = memref.load %arg1[%c0_7, %c1] : memref<2x8xi32, #tpu.memory_space<smem>>
    %10 = arith.index_cast %9 : i32 to index
    %c0_8 = arith.constant 0 : index
    %11 = vector.load %arg4[%10, %c0_8] : memref<64x32xf32, #tpu.memory_space<vmem>>, vector<1x32xf32>
    %c0_9 = arith.constant 0 : index
    %c1_10 = arith.constant 1 : index
    %12 = memref.load %arg2[%c0_9, %c1_10] : memref<2x8xi32, #tpu.memory_space<smem>>
    %13 = arith.index_cast %12 : i32 to index
    %c0_11 = arith.constant 0 : index
    %14 = vector.load %arg6[%13, %c0_11] : memref<2x32xf32, #tpu.memory_space<vmem>>, vector<1x32xf32>
    %15 = arith.addf %11, %14 : vector<1x32xf32>
    %c1_12 = arith.constant 1 : index
    %c0_13 = arith.constant 0 : index
    %16 = vector.load %arg5[%c1_12, %c0_13] : memref<16x32xf32, #tpu.memory_space<vmem>>, vector<1x32xf32>
    %17 = arith.addf %15, %16 : vector<1x32xf32>
    %c0_14 = arith.constant 0 : index
    %c2 = arith.constant 2 : index
    %18 = memref.load %arg1[%c0_14, %c2] : memref<2x8xi32, #tpu.memory_space<smem>>
    %19 = arith.index_cast %18 : i32 to index
    %c0_15 = arith.constant 0 : index
    %20 = vector.load %arg4[%19, %c0_15] : memref<64x32xf32, #tpu.memory_space<vmem>>, vector<1x32xf32>
    %c0_16 = arith.constant 0 : index
    %c2_17 = arith.constant 2 : index
    %21 = memref.load %arg2[%c0_16, %c2_17] : memref<2x8xi32, #tpu.memory_space<smem>>
    %22 = arith.index_cast %21 : i32 to index
    %c0_18 = arith.constant 0 : index
    %23 = vector.load %arg6[%22, %c0_18] : memref<2x32xf32, #tpu.memory_space<vmem>>, vector<1x32xf32>
    %24 = arith.addf %20, %23 : vector<1x32xf32>
    %c2_19 = arith.constant 2 : index
    %c0_20 = arith.constant 0 : index
    %25 = vector.load %arg5[%c2_19, %c0_20] : memref<16x32xf32, #tpu.memory_space<vmem>>, vector<1x32xf32>
    %26 = arith.addf %24, %25 : vector<1x32xf32>
    %c0_21 = arith.constant 0 : index
    %c3 = arith.constant 3 : index
    %27 = memref.load %arg1[%c0_21, %c3] : memref<2x8xi32, #tpu.memory_space<smem>>
    %28 = arith.index_cast %27 : i32 to index
    %c0_22 = arith.constant 0 : index
    %29 = vector.load %arg4[%28, %c0_22] : memref<64x32xf32, #tpu.memory_space<vmem>>, vector<1x32xf32>
    %c0_23 = arith.constant 0 : index
    %c3_24 = arith.constant 3 : index
    %30 = memref.load %arg2[%c0_23, %c3_24] : memref<2x8xi32, #tpu.memory_space<smem>>
    %31 = arith.index_cast %30 : i32 to index
    %c0_25 = arith.constant 0 : index
    %32 = vector.load %arg6[%31, %c0_25] : memref<2x32xf32, #tpu.memory_space<vmem>>, vector<1x32xf32>
    %33 = arith.addf %29, %32 : vector<1x32xf32>
    %c3_26 = arith.constant 3 : index
    %c0_27 = arith.constant 0 : index
    %34 = vector.load %arg5[%c3_26, %c0_27] : memref<16x32xf32, #tpu.memory_space<vmem>>, vector<1x32xf32>
    %35 = arith.addf %33, %34 : vector<1x32xf32>
    %c0_28 = arith.constant 0 : index
    %c4 = arith.constant 4 : index
    %36 = memref.load %arg1[%c0_28, %c4] : memref<2x8xi32, #tpu.memory_space<smem>>
    %37 = arith.index_cast %36 : i32 to index
    %c0_29 = arith.constant 0 : index
    %38 = vector.load %arg4[%37, %c0_29] : memref<64x32xf32, #tpu.memory_space<vmem>>, vector<1x32xf32>
    %c0_30 = arith.constant 0 : index
    %c4_31 = arith.constant 4 : index
    %39 = memref.load %arg2[%c0_30, %c4_31] : memref<2x8xi32, #tpu.memory_space<smem>>
    %40 = arith.index_cast %39 : i32 to index
    %c0_32 = arith.constant 0 : index
    %41 = vector.load %arg6[%40, %c0_32] : memref<2x32xf32, #tpu.memory_space<vmem>>, vector<1x32xf32>
    %42 = arith.addf %38, %41 : vector<1x32xf32>
    %c4_33 = arith.constant 4 : index
    %c0_34 = arith.constant 0 : index
    %43 = vector.load %arg5[%c4_33, %c0_34] : memref<16x32xf32, #tpu.memory_space<vmem>>, vector<1x32xf32>
    %44 = arith.addf %42, %43 : vector<1x32xf32>
    %c0_35 = arith.constant 0 : index
    %c5 = arith.constant 5 : index
    %45 = memref.load %arg1[%c0_35, %c5] : memref<2x8xi32, #tpu.memory_space<smem>>
    %46 = arith.index_cast %45 : i32 to index
    %c0_36 = arith.constant 0 : index
    %47 = vector.load %arg4[%46, %c0_36] : memref<64x32xf32, #tpu.memory_space<vmem>>, vector<1x32xf32>
    %c0_37 = arith.constant 0 : index
    %c5_38 = arith.constant 5 : index
    %48 = memref.load %arg2[%c0_37, %c5_38] : memref<2x8xi32, #tpu.memory_space<smem>>
    %49 = arith.index_cast %48 : i32 to index
    %c0_39 = arith.constant 0 : index
    %50 = vector.load %arg6[%49, %c0_39] : memref<2x32xf32, #tpu.memory_space<vmem>>, vector<1x32xf32>
    %51 = arith.addf %47, %50 : vector<1x32xf32>
    %c5_40 = arith.constant 5 : index
    %c0_41 = arith.constant 0 : index
    %52 = vector.load %arg5[%c5_40, %c0_41] : memref<16x32xf32, #tpu.memory_space<vmem>>, vector<1x32xf32>
    %53 = arith.addf %51, %52 : vector<1x32xf32>
    %c0_42 = arith.constant 0 : index
    %c6 = arith.constant 6 : index
    %54 = memref.load %arg1[%c0_42, %c6] : memref<2x8xi32, #tpu.memory_space<smem>>
    %55 = arith.index_cast %54 : i32 to index
    %c0_43 = arith.constant 0 : index
    %56 = vector.load %arg4[%55, %c0_43] : memref<64x32xf32, #tpu.memory_space<vmem>>, vector<1x32xf32>
    %c0_44 = arith.constant 0 : index
    %c6_45 = arith.constant 6 : index
    %57 = memref.load %arg2[%c0_44, %c6_45] : memref<2x8xi32, #tpu.memory_space<smem>>
    %58 = arith.index_cast %57 : i32 to index
    %c0_46 = arith.constant 0 : index
    %59 = vector.load %arg6[%58, %c0_46] : memref<2x32xf32, #tpu.memory_space<vmem>>, vector<1x32xf32>
    %60 = arith.addf %56, %59 : vector<1x32xf32>
    %c6_47 = arith.constant 6 : index
    %c0_48 = arith.constant 0 : index
    %61 = vector.load %arg5[%c6_47, %c0_48] : memref<16x32xf32, #tpu.memory_space<vmem>>, vector<1x32xf32>
    %62 = arith.addf %60, %61 : vector<1x32xf32>
    %c0_49 = arith.constant 0 : index
    %c7 = arith.constant 7 : index
    %63 = memref.load %arg1[%c0_49, %c7] : memref<2x8xi32, #tpu.memory_space<smem>>
    %64 = arith.index_cast %63 : i32 to index
    %c0_50 = arith.constant 0 : index
    %65 = vector.load %arg4[%64, %c0_50] : memref<64x32xf32, #tpu.memory_space<vmem>>, vector<1x32xf32>
    %c0_51 = arith.constant 0 : index
    %c7_52 = arith.constant 7 : index
    %66 = memref.load %arg2[%c0_51, %c7_52] : memref<2x8xi32, #tpu.memory_space<smem>>
    %67 = arith.index_cast %66 : i32 to index
    %c0_53 = arith.constant 0 : index
    %68 = vector.load %arg6[%67, %c0_53] : memref<2x32xf32, #tpu.memory_space<vmem>>, vector<1x32xf32>
    %69 = arith.addf %65, %68 : vector<1x32xf32>
    %c7_54 = arith.constant 7 : index
    %c0_55 = arith.constant 0 : index
    %70 = vector.load %arg5[%c7_54, %c0_55] : memref<16x32xf32, #tpu.memory_space<vmem>>, vector<1x32xf32>
    %71 = arith.addf %69, %70 : vector<1x32xf32>
    %c1_56 = arith.constant 1 : index
    %c0_57 = arith.constant 0 : index
    %72 = memref.load %arg1[%c1_56, %c0_57] : memref<2x8xi32, #tpu.memory_space<smem>>
    %73 = arith.index_cast %72 : i32 to index
    %c0_58 = arith.constant 0 : index
    %74 = vector.load %arg4[%73, %c0_58] : memref<64x32xf32, #tpu.memory_space<vmem>>, vector<1x32xf32>
    %c1_59 = arith.constant 1 : index
    %c0_60 = arith.constant 0 : index
    %75 = memref.load %arg2[%c1_59, %c0_60] : memref<2x8xi32, #tpu.memory_space<smem>>
    %76 = arith.index_cast %75 : i32 to index
    %c0_61 = arith.constant 0 : index
    %77 = vector.load %arg6[%76, %c0_61] : memref<2x32xf32, #tpu.memory_space<vmem>>, vector<1x32xf32>
    %78 = arith.addf %74, %77 : vector<1x32xf32>
    %c0_62 = arith.constant 0 : index
    %c0_63 = arith.constant 0 : index
    %79 = vector.load %arg5[%c0_62, %c0_63] : memref<16x32xf32, #tpu.memory_space<vmem>>, vector<1x32xf32>
    %80 = arith.addf %78, %79 : vector<1x32xf32>
    %c1_64 = arith.constant 1 : index
    %c1_65 = arith.constant 1 : index
    %81 = memref.load %arg1[%c1_64, %c1_65] : memref<2x8xi32, #tpu.memory_space<smem>>
    %82 = arith.index_cast %81 : i32 to index
    %c0_66 = arith.constant 0 : index
    %83 = vector.load %arg4[%82, %c0_66] : memref<64x32xf32, #tpu.memory_space<vmem>>, vector<1x32xf32>
    %c1_67 = arith.constant 1 : index
    %c1_68 = arith.constant 1 : index
    %84 = memref.load %arg2[%c1_67, %c1_68] : memref<2x8xi32, #tpu.memory_space<smem>>
    %85 = arith.index_cast %84 : i32 to index
    %c0_69 = arith.constant 0 : index
    %86 = vector.load %arg6[%85, %c0_69] : memref<2x32xf32, #tpu.memory_space<vmem>>, vector<1x32xf32>
    %87 = arith.addf %83, %86 : vector<1x32xf32>
    %c1_70 = arith.constant 1 : index
    %c0_71 = arith.constant 0 : index
    %88 = vector.load %arg5[%c1_70, %c0_71] : memref<16x32xf32, #tpu.memory_space<vmem>>, vector<1x32xf32>
    %89 = arith.addf %87, %88 : vector<1x32xf32>
    %c1_72 = arith.constant 1 : index
    %c2_73 = arith.constant 2 : index
    %90 = memref.load %arg1[%c1_72, %c2_73] : memref<2x8xi32, #tpu.memory_space<smem>>
    %91 = arith.index_cast %90 : i32 to index
    %c0_74 = arith.constant 0 : index
    %92 = vector.load %arg4[%91, %c0_74] : memref<64x32xf32, #tpu.memory_space<vmem>>, vector<1x32xf32>
    %c1_75 = arith.constant 1 : index
    %c2_76 = arith.constant 2 : index
    %93 = memref.load %arg2[%c1_75, %c2_76] : memref<2x8xi32, #tpu.memory_space<smem>>
    %94 = arith.index_cast %93 : i32 to index
    %c0_77 = arith.constant 0 : index
    %95 = vector.load %arg6[%94, %c0_77] : memref<2x32xf32, #tpu.memory_space<vmem>>, vector<1x32xf32>
    %96 = arith.addf %92, %95 : vector<1x32xf32>
    %c2_78 = arith.constant 2 : index
    %c0_79 = arith.constant 0 : index
    %97 = vector.load %arg5[%c2_78, %c0_79] : memref<16x32xf32, #tpu.memory_space<vmem>>, vector<1x32xf32>
    %98 = arith.addf %96, %97 : vector<1x32xf32>
    %c1_80 = arith.constant 1 : index
    %c3_81 = arith.constant 3 : index
    %99 = memref.load %arg1[%c1_80, %c3_81] : memref<2x8xi32, #tpu.memory_space<smem>>
    %100 = arith.index_cast %99 : i32 to index
    %c0_82 = arith.constant 0 : index
    %101 = vector.load %arg4[%100, %c0_82] : memref<64x32xf32, #tpu.memory_space<vmem>>, vector<1x32xf32>
    %c1_83 = arith.constant 1 : index
    %c3_84 = arith.constant 3 : index
    %102 = memref.load %arg2[%c1_83, %c3_84] : memref<2x8xi32, #tpu.memory_space<smem>>
    %103 = arith.index_cast %102 : i32 to index
    %c0_85 = arith.constant 0 : index
    %104 = vector.load %arg6[%103, %c0_85] : memref<2x32xf32, #tpu.memory_space<vmem>>, vector<1x32xf32>
    %105 = arith.addf %101, %104 : vector<1x32xf32>
    %c3_86 = arith.constant 3 : index
    %c0_87 = arith.constant 0 : index
    %106 = vector.load %arg5[%c3_86, %c0_87] : memref<16x32xf32, #tpu.memory_space<vmem>>, vector<1x32xf32>
    %107 = arith.addf %105, %106 : vector<1x32xf32>
    %c1_88 = arith.constant 1 : index
    %c4_89 = arith.constant 4 : index
    %108 = memref.load %arg1[%c1_88, %c4_89] : memref<2x8xi32, #tpu.memory_space<smem>>
    %109 = arith.index_cast %108 : i32 to index
    %c0_90 = arith.constant 0 : index
    %110 = vector.load %arg4[%109, %c0_90] : memref<64x32xf32, #tpu.memory_space<vmem>>, vector<1x32xf32>
    %c1_91 = arith.constant 1 : index
    %c4_92 = arith.constant 4 : index
    %111 = memref.load %arg2[%c1_91, %c4_92] : memref<2x8xi32, #tpu.memory_space<smem>>
    %112 = arith.index_cast %111 : i32 to index
    %c0_93 = arith.constant 0 : index
    %113 = vector.load %arg6[%112, %c0_93] : memref<2x32xf32, #tpu.memory_space<vmem>>, vector<1x32xf32>
    %114 = arith.addf %110, %113 : vector<1x32xf32>
    %c4_94 = arith.constant 4 : index
    %c0_95 = arith.constant 0 : index
    %115 = vector.load %arg5[%c4_94, %c0_95] : memref<16x32xf32, #tpu.memory_space<vmem>>, vector<1x32xf32>
    %116 = arith.addf %114, %115 : vector<1x32xf32>
    %c1_96 = arith.constant 1 : index
    %c5_97 = arith.constant 5 : index
    %117 = memref.load %arg1[%c1_96, %c5_97] : memref<2x8xi32, #tpu.memory_space<smem>>
    %118 = arith.index_cast %117 : i32 to index
    %c0_98 = arith.constant 0 : index
    %119 = vector.load %arg4[%118, %c0_98] : memref<64x32xf32, #tpu.memory_space<vmem>>, vector<1x32xf32>
    %c1_99 = arith.constant 1 : index
    %c5_100 = arith.constant 5 : index
    %120 = memref.load %arg2[%c1_99, %c5_100] : memref<2x8xi32, #tpu.memory_space<smem>>
    %121 = arith.index_cast %120 : i32 to index
    %c0_101 = arith.constant 0 : index
    %122 = vector.load %arg6[%121, %c0_101] : memref<2x32xf32, #tpu.memory_space<vmem>>, vector<1x32xf32>
    %123 = arith.addf %119, %122 : vector<1x32xf32>
    %c5_102 = arith.constant 5 : index
    %c0_103 = arith.constant 0 : index
    %124 = vector.load %arg5[%c5_102, %c0_103] : memref<16x32xf32, #tpu.memory_space<vmem>>, vector<1x32xf32>
    %125 = arith.addf %123, %124 : vector<1x32xf32>
    %c1_104 = arith.constant 1 : index
    %c6_105 = arith.constant 6 : index
    %126 = memref.load %arg1[%c1_104, %c6_105] : memref<2x8xi32, #tpu.memory_space<smem>>
    %127 = arith.index_cast %126 : i32 to index
    %c0_106 = arith.constant 0 : index
    %128 = vector.load %arg4[%127, %c0_106] : memref<64x32xf32, #tpu.memory_space<vmem>>, vector<1x32xf32>
    %c1_107 = arith.constant 1 : index
    %c6_108 = arith.constant 6 : index
    %129 = memref.load %arg2[%c1_107, %c6_108] : memref<2x8xi32, #tpu.memory_space<smem>>
    %130 = arith.index_cast %129 : i32 to index
    %c0_109 = arith.constant 0 : index
    %131 = vector.load %arg6[%130, %c0_109] : memref<2x32xf32, #tpu.memory_space<vmem>>, vector<1x32xf32>
    %132 = arith.addf %128, %131 : vector<1x32xf32>
    %c6_110 = arith.constant 6 : index
    %c0_111 = arith.constant 0 : index
    %133 = vector.load %arg5[%c6_110, %c0_111] : memref<16x32xf32, #tpu.memory_space<vmem>>, vector<1x32xf32>
    %134 = arith.addf %132, %133 : vector<1x32xf32>
    %c1_112 = arith.constant 1 : index
    %c7_113 = arith.constant 7 : index
    %135 = memref.load %arg1[%c1_112, %c7_113] : memref<2x8xi32, #tpu.memory_space<smem>>
    %136 = arith.index_cast %135 : i32 to index
    %c0_114 = arith.constant 0 : index
    %137 = vector.load %arg4[%136, %c0_114] : memref<64x32xf32, #tpu.memory_space<vmem>>, vector<1x32xf32>
    %c1_115 = arith.constant 1 : index
    %c7_116 = arith.constant 7 : index
    %138 = memref.load %arg2[%c1_115, %c7_116] : memref<2x8xi32, #tpu.memory_space<smem>>
    %139 = arith.index_cast %138 : i32 to index
    %c0_117 = arith.constant 0 : index
    %140 = vector.load %arg6[%139, %c0_117] : memref<2x32xf32, #tpu.memory_space<vmem>>, vector<1x32xf32>
    %141 = arith.addf %137, %140 : vector<1x32xf32>
    %c7_118 = arith.constant 7 : index
    %c0_119 = arith.constant 0 : index
    %142 = vector.load %arg5[%c7_118, %c0_119] : memref<16x32xf32, #tpu.memory_space<vmem>>, vector<1x32xf32>
    %143 = arith.addf %141, %142 : vector<1x32xf32>
    %144 = tpu.concatenate %8, %17, %26, %35, %44, %53, %62, %71, %80, %89, %98, %107, %116, %125, %134, %143 in 0 : vector<1x32xf32>, vector<1x32xf32>, vector<1x32xf32>, vector<1x32xf32>, vector<1x32xf32>, vector<1x32xf32>, vector<1x32xf32>, vector<1x32xf32>, vector<1x32xf32>, vector<1x32xf32>, vector<1x32xf32>, vector<1x32xf32>, vector<1x32xf32>, vector<1x32xf32>, vector<1x32xf32>, vector<1x32xf32> -> vector<16x32xf32>
    %c0_120 = arith.constant 0 : index
    %c0_121 = arith.constant 0 : index
    %145 = vector.load %arg3[%c0_120, %c0_121] : memref<2x8xi32, #tpu.memory_space<vmem>>, vector<2x8xi32>
    %146 = arith.sitofp %145 : vector<2x8xi32> to vector<2x8xf32>
    %cst = arith.constant 1.000000e+00 : f32
    %147 = vector.broadcast %cst : f32 to vector<2x8xf32>
    %148 = arith.subf %147, %146 : vector<2x8xf32>
    %cst_122 = arith.constant -1.000000e+04 : f32
    %149 = vector.broadcast %cst_122 : f32 to vector<2x8xf32>
    %150 = arith.mulf %148, %149 : vector<2x8xf32>
    %c0_123 = arith.constant 0 : index
    %c0_124 = arith.constant 0 : index
    %151 = vector.load %arg7[%c0_123, %c0_124] : memref<1x32xf32, #tpu.memory_space<vmem>>, vector<1x32xf32>
    %c0_125 = arith.constant 0 : index
    %c0_126 = arith.constant 0 : index
    %152 = vector.load %arg8[%c0_125, %c0_126] : memref<1x32xf32, #tpu.memory_space<vmem>>, vector<1x32xf32>
    %cst_127 = arith.constant dense<0.000000e+00> : vector<16xf32>
    %153 = vector.multi_reduction <add>, %144, %cst_127 [1] : vector<16x32xf32> to vector<16xf32>
    %154 = vector.shape_cast %153 : vector<16xf32> to vector<16x1xf32>
    %cst_128 = arith.constant 3.200000e+01 : f32
    %155 = vector.broadcast %cst_128 : f32 to vector<16x1xf32>
    %156 = arith.divf %154, %155 : vector<16x1xf32>
    %157 = vector.broadcast %156 : vector<16x1xf32> to vector<16x32xf32>
    %158 = arith.subf %144, %157 : vector<16x32xf32>
    %159 = vector.broadcast %156 : vector<16x1xf32> to vector<16x32xf32>
    %160 = arith.subf %144, %159 : vector<16x32xf32>
    %161 = arith.mulf %158, %160 : vector<16x32xf32>
    %cst_129 = arith.constant dense<0.000000e+00> : vector<16xf32>
    %162 = vector.multi_reduction <add>, %161, %cst_129 [1] : vector<16x32xf32> to vector<16xf32>
    %163 = vector.shape_cast %162 : vector<16xf32> to vector<16x1xf32>
    %cst_130 = arith.constant 3.200000e+01 : f32
    %164 = vector.broadcast %cst_130 : f32 to vector<16x1xf32>
    %165 = arith.divf %163, %164 : vector<16x1xf32>
    %166 = vector.broadcast %156 : vector<16x1xf32> to vector<16x32xf32>
    %167 = arith.subf %144, %166 : vector<16x32xf32>
    %cst_131 = arith.constant 9.99999996E-13 : f32
    %168 = vector.broadcast %cst_131 : f32 to vector<16x1xf32>
    %169 = arith.addf %165, %168 : vector<16x1xf32>
    %170 = math.rsqrt %169 : vector<16x1xf32>
    %171 = vector.broadcast %170 : vector<16x1xf32> to vector<16x32xf32>
    %172 = arith.mulf %167, %171 : vector<16x32xf32>
    %173 = vector.broadcast %151 : vector<1x32xf32> to vector<16x32xf32>
    %174 = arith.mulf %172, %173 : vector<16x32xf32>
    %175 = vector.broadcast %152 : vector<1x32xf32> to vector<16x32xf32>
    %176 = arith.addf %174, %175 : vector<16x32xf32>
    %c0_132 = arith.constant 0 : index
    %c0_133 = arith.constant 0 : index
    %c0_134 = arith.constant 0 : index
    %177 = vector.load %arg9[%c0_132, %c0_133, %c0_134] : memref<2x32x96xbf16, #tpu.memory_space<vmem>>, vector<1x32x96xbf16>
    %178 = vector.shape_cast %177 : vector<1x32x96xbf16> to vector<32x96xbf16>
    %179 = arith.truncf %176 : vector<16x32xf32> to vector<16x32xbf16>
    %cst_135 = arith.constant dense<0.000000e+00> : vector<16x96xf32>
    %180 = tpu.matmul %179, %178, %cst_135 {dimension_numbers = #tpu.dot_dimension_numbers<[1], [0], [0], [1], [0, 0, 1, 1], [], []>} : vector<16x32xbf16>, vector<32x96xbf16>, vector<16x96xf32> -> vector<16x96xf32>
    %c0_136 = arith.constant 0 : index
    %c0_137 = arith.constant 0 : index
    %c0_138 = arith.constant 0 : index
    %181 = vector.load %arg10[%c0_136, %c0_137, %c0_138] : memref<2x1x96xf32, #tpu.memory_space<vmem>>, vector<1x1x96xf32>
    %182 = vector.shape_cast %181 : vector<1x1x96xf32> to vector<1x96xf32>
    %183 = vector.broadcast %182 : vector<1x96xf32> to vector<16x96xf32>
    %184 = arith.addf %180, %183 : vector<16x96xf32>
    %185 = vector.extract_strided_slice %150 {offsets = [0, 0], sizes = [1, 8], strides = [1, 1]} : vector<2x8xf32> to vector<1x8xf32>
    %186 = vector.extract_strided_slice %184 {offsets = [0, 0], sizes = [8, 48], strides = [1, 1]} : vector<16x96xf32> to vector<8x48xf32>
    %187 = vector.extract_strided_slice %186 {offsets = [0, 0], sizes = [8, 16], strides = [1, 1]} : vector<8x48xf32> to vector<8x16xf32>
    %188 = arith.truncf %187 : vector<8x16xf32> to vector<8x16xbf16>
    %189 = vector.extract_strided_slice %186 {offsets = [0, 16], sizes = [8, 16], strides = [1, 1]} : vector<8x48xf32> to vector<8x16xf32>
    %190 = arith.truncf %189 : vector<8x16xf32> to vector<8x16xbf16>
    %191 = vector.extract_strided_slice %186 {offsets = [0, 32], sizes = [8, 16], strides = [1, 1]} : vector<8x48xf32> to vector<8x16xf32>
    %192 = arith.truncf %191 : vector<8x16xf32> to vector<8x16xbf16>
    %cst_139 = arith.constant dense<0.000000e+00> : vector<8x8xf32>
    %193 = tpu.matmul %188, %190, %cst_139 {dimension_numbers = #tpu.dot_dimension_numbers<[1], [1], [0], [0], [0, 0, 1, 0], [], []>} : vector<8x16xbf16>, vector<8x16xbf16>, vector<8x8xf32> -> vector<8x8xf32>
    %cst_140 = arith.constant 2.500000e-01 : f32
    %194 = vector.broadcast %cst_140 : f32 to vector<8x8xf32>
    %195 = arith.mulf %193, %194 : vector<8x8xf32>
    %196 = vector.broadcast %185 : vector<1x8xf32> to vector<8x8xf32>
    %197 = arith.addf %195, %196 : vector<8x8xf32>
    %cst_141 = arith.constant dense<0xFF800000> : vector<8xf32>
    %198 = vector.multi_reduction <maximumf>, %197, %cst_141 [1] : vector<8x8xf32> to vector<8xf32>
    %199 = vector.shape_cast %198 : vector<8xf32> to vector<8x1xf32>
    %200 = vector.broadcast %199 : vector<8x1xf32> to vector<8x8xf32>
    %201 = arith.subf %197, %200 : vector<8x8xf32>
    %202 = math.exp %201 : vector<8x8xf32>
    %cst_142 = arith.constant dense<0.000000e+00> : vector<8xf32>
    %203 = vector.multi_reduction <add>, %202, %cst_142 [1] : vector<8x8xf32> to vector<8xf32>
    %204 = vector.shape_cast %203 : vector<8xf32> to vector<8x1xf32>
    %205 = tpu.reciprocal %204 {approx = true} : vector<8x1xf32> -> vector<8x1xf32>
    %206 = vector.broadcast %205 : vector<8x1xf32> to vector<8x8xf32>
    %207 = arith.mulf %202, %206 : vector<8x8xf32>
    %208 = arith.truncf %207 : vector<8x8xf32> to vector<8x8xbf16>
    %cst_143 = arith.constant dense<0.000000e+00> : vector<8x16xf32>
    %209 = tpu.matmul %208, %192, %cst_143 {dimension_numbers = #tpu.dot_dimension_numbers<[1], [0], [0], [1], [0, 0, 1, 1], [], []>} : vector<8x8xbf16>, vector<8x16xbf16>, vector<8x16xf32> -> vector<8x16xf32>
    %210 = vector.extract_strided_slice %184 {offsets = [0, 48], sizes = [8, 48], strides = [1, 1]} : vector<16x96xf32> to vector<8x48xf32>
    %211 = vector.extract_strided_slice %210 {offsets = [0, 0], sizes = [8, 16], strides = [1, 1]} : vector<8x48xf32> to vector<8x16xf32>
    %212 = arith.truncf %211 : vector<8x16xf32> to vector<8x16xbf16>
    %213 = vector.extract_strided_slice %210 {offsets = [0, 16], sizes = [8, 16], strides = [1, 1]} : vector<8x48xf32> to vector<8x16xf32>
    %214 = arith.truncf %213 : vector<8x16xf32> to vector<8x16xbf16>
    %215 = vector.extract_strided_slice %210 {offsets = [0, 32], sizes = [8, 16], strides = [1, 1]} : vector<8x48xf32> to vector<8x16xf32>
    %216 = arith.truncf %215 : vector<8x16xf32> to vector<8x16xbf16>
    %cst_144 = arith.constant dense<0.000000e+00> : vector<8x8xf32>
    %217 = tpu.matmul %212, %214, %cst_144 {dimension_numbers = #tpu.dot_dimension_numbers<[1], [1], [0], [0], [0, 0, 1, 0], [], []>} : vector<8x16xbf16>, vector<8x16xbf16>, vector<8x8xf32> -> vector<8x8xf32>
    %cst_145 = arith.constant 2.500000e-01 : f32
    %218 = vector.broadcast %cst_145 : f32 to vector<8x8xf32>
    %219 = arith.mulf %217, %218 : vector<8x8xf32>
    %220 = vector.broadcast %185 : vector<1x8xf32> to vector<8x8xf32>
    %221 = arith.addf %219, %220 : vector<8x8xf32>
    %cst_146 = arith.constant dense<0xFF800000> : vector<8xf32>
    %222 = vector.multi_reduction <maximumf>, %221, %cst_146 [1] : vector<8x8xf32> to vector<8xf32>
    %223 = vector.shape_cast %222 : vector<8xf32> to vector<8x1xf32>
    %224 = vector.broadcast %223 : vector<8x1xf32> to vector<8x8xf32>
    %225 = arith.subf %221, %224 : vector<8x8xf32>
    %226 = math.exp %225 : vector<8x8xf32>
    %cst_147 = arith.constant dense<0.000000e+00> : vector<8xf32>
    %227 = vector.multi_reduction <add>, %226, %cst_147 [1] : vector<8x8xf32> to vector<8xf32>
    %228 = vector.shape_cast %227 : vector<8xf32> to vector<8x1xf32>
    %229 = tpu.reciprocal %228 {approx = true} : vector<8x1xf32> -> vector<8x1xf32>
    %230 = vector.broadcast %229 : vector<8x1xf32> to vector<8x8xf32>
    %231 = arith.mulf %226, %230 : vector<8x8xf32>
    %232 = arith.truncf %231 : vector<8x8xf32> to vector<8x8xbf16>
    %cst_148 = arith.constant dense<0.000000e+00> : vector<8x16xf32>
    %233 = tpu.matmul %232, %216, %cst_148 {dimension_numbers = #tpu.dot_dimension_numbers<[1], [0], [0], [1], [0, 0, 1, 1], [], []>} : vector<8x8xbf16>, vector<8x16xbf16>, vector<8x16xf32> -> vector<8x16xf32>
    %234 = tpu.concatenate %209, %233 in 1 : vector<8x16xf32>, vector<8x16xf32> -> vector<8x32xf32>
    %235 = vector.extract_strided_slice %150 {offsets = [1, 0], sizes = [1, 8], strides = [1, 1]} : vector<2x8xf32> to vector<1x8xf32>
    %236 = vector.extract_strided_slice %184 {offsets = [8, 0], sizes = [8, 48], strides = [1, 1]} : vector<16x96xf32> to vector<8x48xf32>
    %237 = vector.extract_strided_slice %236 {offsets = [0, 0], sizes = [8, 16], strides = [1, 1]} : vector<8x48xf32> to vector<8x16xf32>
    %238 = arith.truncf %237 : vector<8x16xf32> to vector<8x16xbf16>
    %239 = vector.extract_strided_slice %236 {offsets = [0, 16], sizes = [8, 16], strides = [1, 1]} : vector<8x48xf32> to vector<8x16xf32>
    %240 = arith.truncf %239 : vector<8x16xf32> to vector<8x16xbf16>
    %241 = vector.extract_strided_slice %236 {offsets = [0, 32], sizes = [8, 16], strides = [1, 1]} : vector<8x48xf32> to vector<8x16xf32>
    %242 = arith.truncf %241 : vector<8x16xf32> to vector<8x16xbf16>
    %cst_149 = arith.constant dense<0.000000e+00> : vector<8x8xf32>
    %243 = tpu.matmul %238, %240, %cst_149 {dimension_numbers = #tpu.dot_dimension_numbers<[1], [1], [0], [0], [0, 0, 1, 0], [], []>} : vector<8x16xbf16>, vector<8x16xbf16>, vector<8x8xf32> -> vector<8x8xf32>
    %cst_150 = arith.constant 2.500000e-01 : f32
    %244 = vector.broadcast %cst_150 : f32 to vector<8x8xf32>
    %245 = arith.mulf %243, %244 : vector<8x8xf32>
    %246 = vector.broadcast %235 : vector<1x8xf32> to vector<8x8xf32>
    %247 = arith.addf %245, %246 : vector<8x8xf32>
    %cst_151 = arith.constant dense<0xFF800000> : vector<8xf32>
    %248 = vector.multi_reduction <maximumf>, %247, %cst_151 [1] : vector<8x8xf32> to vector<8xf32>
    %249 = vector.shape_cast %248 : vector<8xf32> to vector<8x1xf32>
    %250 = vector.broadcast %249 : vector<8x1xf32> to vector<8x8xf32>
    %251 = arith.subf %247, %250 : vector<8x8xf32>
    %252 = math.exp %251 : vector<8x8xf32>
    %cst_152 = arith.constant dense<0.000000e+00> : vector<8xf32>
    %253 = vector.multi_reduction <add>, %252, %cst_152 [1] : vector<8x8xf32> to vector<8xf32>
    %254 = vector.shape_cast %253 : vector<8xf32> to vector<8x1xf32>
    %255 = tpu.reciprocal %254 {approx = true} : vector<8x1xf32> -> vector<8x1xf32>
    %256 = vector.broadcast %255 : vector<8x1xf32> to vector<8x8xf32>
    %257 = arith.mulf %252, %256 : vector<8x8xf32>
    %258 = arith.truncf %257 : vector<8x8xf32> to vector<8x8xbf16>
    %cst_153 = arith.constant dense<0.000000e+00> : vector<8x16xf32>
    %259 = tpu.matmul %258, %242, %cst_153 {dimension_numbers = #tpu.dot_dimension_numbers<[1], [0], [0], [1], [0, 0, 1, 1], [], []>} : vector<8x8xbf16>, vector<8x16xbf16>, vector<8x16xf32> -> vector<8x16xf32>
    %260 = vector.extract_strided_slice %184 {offsets = [8, 48], sizes = [8, 48], strides = [1, 1]} : vector<16x96xf32> to vector<8x48xf32>
    %261 = vector.extract_strided_slice %260 {offsets = [0, 0], sizes = [8, 16], strides = [1, 1]} : vector<8x48xf32> to vector<8x16xf32>
    %262 = arith.truncf %261 : vector<8x16xf32> to vector<8x16xbf16>
    %263 = vector.extract_strided_slice %260 {offsets = [0, 16], sizes = [8, 16], strides = [1, 1]} : vector<8x48xf32> to vector<8x16xf32>
    %264 = arith.truncf %263 : vector<8x16xf32> to vector<8x16xbf16>
    %265 = vector.extract_strided_slice %260 {offsets = [0, 32], sizes = [8, 16], strides = [1, 1]} : vector<8x48xf32> to vector<8x16xf32>
    %266 = arith.truncf %265 : vector<8x16xf32> to vector<8x16xbf16>
    %cst_154 = arith.constant dense<0.000000e+00> : vector<8x8xf32>
    %267 = tpu.matmul %262, %264, %cst_154 {dimension_numbers = #tpu.dot_dimension_numbers<[1], [1], [0], [0], [0, 0, 1, 0], [], []>} : vector<8x16xbf16>, vector<8x16xbf16>, vector<8x8xf32> -> vector<8x8xf32>
    %cst_155 = arith.constant 2.500000e-01 : f32
    %268 = vector.broadcast %cst_155 : f32 to vector<8x8xf32>
    %269 = arith.mulf %267, %268 : vector<8x8xf32>
    %270 = vector.broadcast %235 : vector<1x8xf32> to vector<8x8xf32>
    %271 = arith.addf %269, %270 : vector<8x8xf32>
    %cst_156 = arith.constant dense<0xFF800000> : vector<8xf32>
    %272 = vector.multi_reduction <maximumf>, %271, %cst_156 [1] : vector<8x8xf32> to vector<8xf32>
    %273 = vector.shape_cast %272 : vector<8xf32> to vector<8x1xf32>
    %274 = vector.broadcast %273 : vector<8x1xf32> to vector<8x8xf32>
    %275 = arith.subf %271, %274 : vector<8x8xf32>
    %276 = math.exp %275 : vector<8x8xf32>
    %cst_157 = arith.constant dense<0.000000e+00> : vector<8xf32>
    %277 = vector.multi_reduction <add>, %276, %cst_157 [1] : vector<8x8xf32> to vector<8xf32>
    %278 = vector.shape_cast %277 : vector<8xf32> to vector<8x1xf32>
    %279 = tpu.reciprocal %278 {approx = true} : vector<8x1xf32> -> vector<8x1xf32>
    %280 = vector.broadcast %279 : vector<8x1xf32> to vector<8x8xf32>
    %281 = arith.mulf %276, %280 : vector<8x8xf32>
    %282 = arith.truncf %281 : vector<8x8xf32> to vector<8x8xbf16>
    %cst_158 = arith.constant dense<0.000000e+00> : vector<8x16xf32>
    %283 = tpu.matmul %282, %266, %cst_158 {dimension_numbers = #tpu.dot_dimension_numbers<[1], [0], [0], [1], [0, 0, 1, 1], [], []>} : vector<8x8xbf16>, vector<8x16xbf16>, vector<8x16xf32> -> vector<8x16xf32>
    %284 = tpu.concatenate %259, %283 in 1 : vector<8x16xf32>, vector<8x16xf32> -> vector<8x32xf32>
    %285 = tpu.concatenate %234, %284 in 0 : vector<8x32xf32>, vector<8x32xf32> -> vector<16x32xf32>
    %c0_159 = arith.constant 0 : index
    %c0_160 = arith.constant 0 : index
    %c0_161 = arith.constant 0 : index
    %286 = vector.load %arg11[%c0_159, %c0_160, %c0_161] : memref<2x32x32xbf16, #tpu.memory_space<vmem>>, vector<1x32x32xbf16>
    %287 = vector.shape_cast %286 : vector<1x32x32xbf16> to vector<32x32xbf16>
    %288 = arith.truncf %285 : vector<16x32xf32> to vector<16x32xbf16>
    %cst_162 = arith.constant dense<0.000000e+00> : vector<16x32xf32>
    %289 = tpu.matmul %288, %287, %cst_162 {dimension_numbers = #tpu.dot_dimension_numbers<[1], [0], [0], [1], [0, 0, 1, 1], [], []>} : vector<16x32xbf16>, vector<32x32xbf16>, vector<16x32xf32> -> vector<16x32xf32>
    %c0_163 = arith.constant 0 : index
    %c0_164 = arith.constant 0 : index
    %c0_165 = arith.constant 0 : index
    %290 = vector.load %arg12[%c0_163, %c0_164, %c0_165] : memref<2x1x32xf32, #tpu.memory_space<vmem>>, vector<1x1x32xf32>
    %291 = vector.shape_cast %290 : vector<1x1x32xf32> to vector<1x32xf32>
    %292 = vector.broadcast %291 : vector<1x32xf32> to vector<16x32xf32>
    %293 = arith.addf %289, %292 : vector<16x32xf32>
    %294 = arith.addf %293, %176 : vector<16x32xf32>
    %c0_166 = arith.constant 0 : index
    %c0_167 = arith.constant 0 : index
    %c0_168 = arith.constant 0 : index
    %295 = vector.load %arg13[%c0_166, %c0_167, %c0_168] : memref<2x1x32xf32, #tpu.memory_space<vmem>>, vector<1x1x32xf32>
    %296 = vector.shape_cast %295 : vector<1x1x32xf32> to vector<1x32xf32>
    %c0_169 = arith.constant 0 : index
    %c0_170 = arith.constant 0 : index
    %c0_171 = arith.constant 0 : index
    %297 = vector.load %arg14[%c0_169, %c0_170, %c0_171] : memref<2x1x32xf32, #tpu.memory_space<vmem>>, vector<1x1x32xf32>
    %298 = vector.shape_cast %297 : vector<1x1x32xf32> to vector<1x32xf32>
    %cst_172 = arith.constant dense<0.000000e+00> : vector<16xf32>
    %299 = vector.multi_reduction <add>, %294, %cst_172 [1] : vector<16x32xf32> to vector<16xf32>
    %300 = vector.shape_cast %299 : vector<16xf32> to vector<16x1xf32>
    %cst_173 = arith.constant 3.200000e+01 : f32
    %301 = vector.broadcast %cst_173 : f32 to vector<16x1xf32>
    %302 = arith.divf %300, %301 : vector<16x1xf32>
    %303 = vector.broadcast %302 : vector<16x1xf32> to vector<16x32xf32>
    %304 = arith.subf %294, %303 : vector<16x32xf32>
    %305 = vector.broadcast %302 : vector<16x1xf32> to vector<16x32xf32>
    %306 = arith.subf %294, %305 : vector<16x32xf32>
    %307 = arith.mulf %304, %306 : vector<16x32xf32>
    %cst_174 = arith.constant dense<0.000000e+00> : vector<16xf32>
    %308 = vector.multi_reduction <add>, %307, %cst_174 [1] : vector<16x32xf32> to vector<16xf32>
    %309 = vector.shape_cast %308 : vector<16xf32> to vector<16x1xf32>
    %cst_175 = arith.constant 3.200000e+01 : f32
    %310 = vector.broadcast %cst_175 : f32 to vector<16x1xf32>
    %311 = arith.divf %309, %310 : vector<16x1xf32>
    %312 = vector.broadcast %302 : vector<16x1xf32> to vector<16x32xf32>
    %313 = arith.subf %294, %312 : vector<16x32xf32>
    %cst_176 = arith.constant 9.99999996E-13 : f32
    %314 = vector.broadcast %cst_176 : f32 to vector<16x1xf32>
    %315 = arith.addf %311, %314 : vector<16x1xf32>
    %316 = math.rsqrt %315 : vector<16x1xf32>
    %317 = vector.broadcast %316 : vector<16x1xf32> to vector<16x32xf32>
    %318 = arith.mulf %313, %317 : vector<16x32xf32>
    %319 = vector.broadcast %296 : vector<1x32xf32> to vector<16x32xf32>
    %320 = arith.mulf %318, %319 : vector<16x32xf32>
    %321 = vector.broadcast %298 : vector<1x32xf32> to vector<16x32xf32>
    %322 = arith.addf %320, %321 : vector<16x32xf32>
    %c0_177 = arith.constant 0 : index
    %c0_178 = arith.constant 0 : index
    %c0_179 = arith.constant 0 : index
    %323 = vector.load %arg15[%c0_177, %c0_178, %c0_179] : memref<2x32x128xbf16, #tpu.memory_space<vmem>>, vector<1x32x128xbf16>
    %324 = vector.shape_cast %323 : vector<1x32x128xbf16> to vector<32x128xbf16>
    %325 = arith.truncf %322 : vector<16x32xf32> to vector<16x32xbf16>
    %cst_180 = arith.constant dense<0.000000e+00> : vector<16x128xf32>
    %326 = tpu.matmul %325, %324, %cst_180 {dimension_numbers = #tpu.dot_dimension_numbers<[1], [0], [0], [1], [0, 0, 1, 1], [], []>} : vector<16x32xbf16>, vector<32x128xbf16>, vector<16x128xf32> -> vector<16x128xf32>
    %c0_181 = arith.constant 0 : index
    %c0_182 = arith.constant 0 : index
    %c0_183 = arith.constant 0 : index
    %327 = vector.load %arg16[%c0_181, %c0_182, %c0_183] : memref<2x1x128xf32, #tpu.memory_space<vmem>>, vector<1x1x128xf32>
    %328 = vector.shape_cast %327 : vector<1x1x128xf32> to vector<1x128xf32>
    %329 = vector.broadcast %328 : vector<1x128xf32> to vector<16x128xf32>
    %330 = arith.addf %326, %329 : vector<16x128xf32>
    %cst_184 = arith.constant 5.000000e-01 : f32
    %331 = vector.broadcast %cst_184 : f32 to vector<16x128xf32>
    %332 = arith.mulf %331, %330 : vector<16x128xf32>
    %cst_185 = arith.constant 4.471500e-02 : f32
    %333 = vector.broadcast %cst_185 : f32 to vector<16x128xf32>
    %334 = arith.mulf %333, %330 : vector<16x128xf32>
    %335 = arith.mulf %334, %330 : vector<16x128xf32>
    %336 = arith.mulf %335, %330 : vector<16x128xf32>
    %337 = arith.addf %330, %336 : vector<16x128xf32>
    %cst_186 = arith.constant 0.797884583 : f32
    %338 = vector.broadcast %cst_186 : f32 to vector<16x128xf32>
    %339 = arith.mulf %338, %337 : vector<16x128xf32>
    %340 = math.tanh %339 : vector<16x128xf32>
    %cst_187 = arith.constant 1.000000e+00 : f32
    %341 = vector.broadcast %cst_187 : f32 to vector<16x128xf32>
    %342 = arith.addf %341, %340 : vector<16x128xf32>
    %343 = arith.mulf %332, %342 : vector<16x128xf32>
    %c0_188 = arith.constant 0 : index
    %c0_189 = arith.constant 0 : index
    %c0_190 = arith.constant 0 : index
    %344 = vector.load %arg17[%c0_188, %c0_189, %c0_190] : memref<2x128x32xbf16, #tpu.memory_space<vmem>>, vector<1x128x32xbf16>
    %345 = vector.shape_cast %344 : vector<1x128x32xbf16> to vector<128x32xbf16>
    %346 = arith.truncf %343 : vector<16x128xf32> to vector<16x128xbf16>
    %cst_191 = arith.constant dense<0.000000e+00> : vector<16x32xf32>
    %347 = tpu.matmul %346, %345, %cst_191 {dimension_numbers = #tpu.dot_dimension_numbers<[1], [0], [0], [1], [0, 0, 1, 1], [], []>} : vector<16x128xbf16>, vector<128x32xbf16>, vector<16x32xf32> -> vector<16x32xf32>
    %c0_192 = arith.constant 0 : index
    %c0_193 = arith.constant 0 : index
    %c0_194 = arith.constant 0 : index
    %348 = vector.load %arg18[%c0_192, %c0_193, %c0_194] : memref<2x1x32xf32, #tpu.memory_space<vmem>>, vector<1x1x32xf32>
    %349 = vector.shape_cast %348 : vector<1x1x32xf32> to vector<1x32xf32>
    %350 = vector.broadcast %349 : vector<1x32xf32> to vector<16x32xf32>
    %351 = arith.addf %347, %350 : vector<16x32xf32>
    %352 = arith.addf %351, %322 : vector<16x32xf32>
    %c0_195 = arith.constant 0 : index
    %c0_196 = arith.constant 0 : index
    %c0_197 = arith.constant 0 : index
    %353 = vector.load %arg19[%c0_195, %c0_196, %c0_197] : memref<2x1x32xf32, #tpu.memory_space<vmem>>, vector<1x1x32xf32>
    %354 = vector.shape_cast %353 : vector<1x1x32xf32> to vector<1x32xf32>
    %c0_198 = arith.constant 0 : index
    %c0_199 = arith.constant 0 : index
    %c0_200 = arith.constant 0 : index
    %355 = vector.load %arg20[%c0_198, %c0_199, %c0_200] : memref<2x1x32xf32, #tpu.memory_space<vmem>>, vector<1x1x32xf32>
    %356 = vector.shape_cast %355 : vector<1x1x32xf32> to vector<1x32xf32>
    %cst_201 = arith.constant dense<0.000000e+00> : vector<16xf32>
    %357 = vector.multi_reduction <add>, %352, %cst_201 [1] : vector<16x32xf32> to vector<16xf32>
    %358 = vector.shape_cast %357 : vector<16xf32> to vector<16x1xf32>
    %cst_202 = arith.constant 3.200000e+01 : f32
    %359 = vector.broadcast %cst_202 : f32 to vector<16x1xf32>
    %360 = arith.divf %358, %359 : vector<16x1xf32>
    %361 = vector.broadcast %360 : vector<16x1xf32> to vector<16x32xf32>
    %362 = arith.subf %352, %361 : vector<16x32xf32>
    %363 = vector.broadcast %360 : vector<16x1xf32> to vector<16x32xf32>
    %364 = arith.subf %352, %363 : vector<16x32xf32>
    %365 = arith.mulf %362, %364 : vector<16x32xf32>
    %cst_203 = arith.constant dense<0.000000e+00> : vector<16xf32>
    %366 = vector.multi_reduction <add>, %365, %cst_203 [1] : vector<16x32xf32> to vector<16xf32>
    %367 = vector.shape_cast %366 : vector<16xf32> to vector<16x1xf32>
    %cst_204 = arith.constant 3.200000e+01 : f32
    %368 = vector.broadcast %cst_204 : f32 to vector<16x1xf32>
    %369 = arith.divf %367, %368 : vector<16x1xf32>
    %370 = vector.broadcast %360 : vector<16x1xf32> to vector<16x32xf32>
    %371 = arith.subf %352, %370 : vector<16x32xf32>
    %cst_205 = arith.constant 9.99999996E-13 : f32
    %372 = vector.broadcast %cst_205 : f32 to vector<16x1xf32>
    %373 = arith.addf %369, %372 : vector<16x1xf32>
    %374 = math.rsqrt %373 : vector<16x1xf32>
    %375 = vector.broadcast %374 : vector<16x1xf32> to vector<16x32xf32>
    %376 = arith.mulf %371, %375 : vector<16x32xf32>
    %377 = vector.broadcast %354 : vector<1x32xf32> to vector<16x32xf32>
    %378 = arith.mulf %376, %377 : vector<16x32xf32>
    %379 = vector.broadcast %356 : vector<1x32xf32> to vector<16x32xf32>
    %380 = arith.addf %378, %379 : vector<16x32xf32>
    %c1_206 = arith.constant 1 : index
    %c0_207 = arith.constant 0 : index
    %c0_208 = arith.constant 0 : index
    %381 = vector.load %arg9[%c1_206, %c0_207, %c0_208] : memref<2x32x96xbf16, #tpu.memory_space<vmem>>, vector<1x32x96xbf16>
    %382 = vector.shape_cast %381 : vector<1x32x96xbf16> to vector<32x96xbf16>
    %383 = arith.truncf %380 : vector<16x32xf32> to vector<16x32xbf16>
    %cst_209 = arith.constant dense<0.000000e+00> : vector<16x96xf32>
    %384 = tpu.matmul %383, %382, %cst_209 {dimension_numbers = #tpu.dot_dimension_numbers<[1], [0], [0], [1], [0, 0, 1, 1], [], []>} : vector<16x32xbf16>, vector<32x96xbf16>, vector<16x96xf32> -> vector<16x96xf32>
    %c1_210 = arith.constant 1 : index
    %c0_211 = arith.constant 0 : index
    %c0_212 = arith.constant 0 : index
    %385 = vector.load %arg10[%c1_210, %c0_211, %c0_212] : memref<2x1x96xf32, #tpu.memory_space<vmem>>, vector<1x1x96xf32>
    %386 = vector.shape_cast %385 : vector<1x1x96xf32> to vector<1x96xf32>
    %387 = vector.broadcast %386 : vector<1x96xf32> to vector<16x96xf32>
    %388 = arith.addf %384, %387 : vector<16x96xf32>
    %389 = vector.extract_strided_slice %150 {offsets = [0, 0], sizes = [1, 8], strides = [1, 1]} : vector<2x8xf32> to vector<1x8xf32>
    %390 = vector.extract_strided_slice %388 {offsets = [0, 0], sizes = [8, 48], strides = [1, 1]} : vector<16x96xf32> to vector<8x48xf32>
    %391 = vector.extract_strided_slice %390 {offsets = [0, 0], sizes = [8, 16], strides = [1, 1]} : vector<8x48xf32> to vector<8x16xf32>
    %392 = arith.truncf %391 : vector<8x16xf32> to vector<8x16xbf16>
    %393 = vector.extract_strided_slice %390 {offsets = [0, 16], sizes = [8, 16], strides = [1, 1]} : vector<8x48xf32> to vector<8x16xf32>
    %394 = arith.truncf %393 : vector<8x16xf32> to vector<8x16xbf16>
    %395 = vector.extract_strided_slice %390 {offsets = [0, 32], sizes = [8, 16], strides = [1, 1]} : vector<8x48xf32> to vector<8x16xf32>
    %396 = arith.truncf %395 : vector<8x16xf32> to vector<8x16xbf16>
    %cst_213 = arith.constant dense<0.000000e+00> : vector<8x8xf32>
    %397 = tpu.matmul %392, %394, %cst_213 {dimension_numbers = #tpu.dot_dimension_numbers<[1], [1], [0], [0], [0, 0, 1, 0], [], []>} : vector<8x16xbf16>, vector<8x16xbf16>, vector<8x8xf32> -> vector<8x8xf32>
    %cst_214 = arith.constant 2.500000e-01 : f32
    %398 = vector.broadcast %cst_214 : f32 to vector<8x8xf32>
    %399 = arith.mulf %397, %398 : vector<8x8xf32>
    %400 = vector.broadcast %389 : vector<1x8xf32> to vector<8x8xf32>
    %401 = arith.addf %399, %400 : vector<8x8xf32>
    %cst_215 = arith.constant dense<0xFF800000> : vector<8xf32>
    %402 = vector.multi_reduction <maximumf>, %401, %cst_215 [1] : vector<8x8xf32> to vector<8xf32>
    %403 = vector.shape_cast %402 : vector<8xf32> to vector<8x1xf32>
    %404 = vector.broadcast %403 : vector<8x1xf32> to vector<8x8xf32>
    %405 = arith.subf %401, %404 : vector<8x8xf32>
    %406 = math.exp %405 : vector<8x8xf32>
    %cst_216 = arith.constant dense<0.000000e+00> : vector<8xf32>
    %407 = vector.multi_reduction <add>, %406, %cst_216 [1] : vector<8x8xf32> to vector<8xf32>
    %408 = vector.shape_cast %407 : vector<8xf32> to vector<8x1xf32>
    %409 = tpu.reciprocal %408 {approx = true} : vector<8x1xf32> -> vector<8x1xf32>
    %410 = vector.broadcast %409 : vector<8x1xf32> to vector<8x8xf32>
    %411 = arith.mulf %406, %410 : vector<8x8xf32>
    %412 = arith.truncf %411 : vector<8x8xf32> to vector<8x8xbf16>
    %cst_217 = arith.constant dense<0.000000e+00> : vector<8x16xf32>
    %413 = tpu.matmul %412, %396, %cst_217 {dimension_numbers = #tpu.dot_dimension_numbers<[1], [0], [0], [1], [0, 0, 1, 1], [], []>} : vector<8x8xbf16>, vector<8x16xbf16>, vector<8x16xf32> -> vector<8x16xf32>
    %414 = vector.extract_strided_slice %388 {offsets = [0, 48], sizes = [8, 48], strides = [1, 1]} : vector<16x96xf32> to vector<8x48xf32>
    %415 = vector.extract_strided_slice %414 {offsets = [0, 0], sizes = [8, 16], strides = [1, 1]} : vector<8x48xf32> to vector<8x16xf32>
    %416 = arith.truncf %415 : vector<8x16xf32> to vector<8x16xbf16>
    %417 = vector.extract_strided_slice %414 {offsets = [0, 16], sizes = [8, 16], strides = [1, 1]} : vector<8x48xf32> to vector<8x16xf32>
    %418 = arith.truncf %417 : vector<8x16xf32> to vector<8x16xbf16>
    %419 = vector.extract_strided_slice %414 {offsets = [0, 32], sizes = [8, 16], strides = [1, 1]} : vector<8x48xf32> to vector<8x16xf32>
    %420 = arith.truncf %419 : vector<8x16xf32> to vector<8x16xbf16>
    %cst_218 = arith.constant dense<0.000000e+00> : vector<8x8xf32>
    %421 = tpu.matmul %416, %418, %cst_218 {dimension_numbers = #tpu.dot_dimension_numbers<[1], [1], [0], [0], [0, 0, 1, 0], [], []>} : vector<8x16xbf16>, vector<8x16xbf16>, vector<8x8xf32> -> vector<8x8xf32>
    %cst_219 = arith.constant 2.500000e-01 : f32
    %422 = vector.broadcast %cst_219 : f32 to vector<8x8xf32>
    %423 = arith.mulf %421, %422 : vector<8x8xf32>
    %424 = vector.broadcast %389 : vector<1x8xf32> to vector<8x8xf32>
    %425 = arith.addf %423, %424 : vector<8x8xf32>
    %cst_220 = arith.constant dense<0xFF800000> : vector<8xf32>
    %426 = vector.multi_reduction <maximumf>, %425, %cst_220 [1] : vector<8x8xf32> to vector<8xf32>
    %427 = vector.shape_cast %426 : vector<8xf32> to vector<8x1xf32>
    %428 = vector.broadcast %427 : vector<8x1xf32> to vector<8x8xf32>
    %429 = arith.subf %425, %428 : vector<8x8xf32>
    %430 = math.exp %429 : vector<8x8xf32>
    %cst_221 = arith.constant dense<0.000000e+00> : vector<8xf32>
    %431 = vector.multi_reduction <add>, %430, %cst_221 [1] : vector<8x8xf32> to vector<8xf32>
    %432 = vector.shape_cast %431 : vector<8xf32> to vector<8x1xf32>
    %433 = tpu.reciprocal %432 {approx = true} : vector<8x1xf32> -> vector<8x1xf32>
    %434 = vector.broadcast %433 : vector<8x1xf32> to vector<8x8xf32>
    %435 = arith.mulf %430, %434 : vector<8x8xf32>
    %436 = arith.truncf %435 : vector<8x8xf32> to vector<8x8xbf16>
    %cst_222 = arith.constant dense<0.000000e+00> : vector<8x16xf32>
    %437 = tpu.matmul %436, %420, %cst_222 {dimension_numbers = #tpu.dot_dimension_numbers<[1], [0], [0], [1], [0, 0, 1, 1], [], []>} : vector<8x8xbf16>, vector<8x16xbf16>, vector<8x16xf32> -> vector<8x16xf32>
    %438 = tpu.concatenate %413, %437 in 1 : vector<8x16xf32>, vector<8x16xf32> -> vector<8x32xf32>
    %439 = vector.extract_strided_slice %150 {offsets = [1, 0], sizes = [1, 8], strides = [1, 1]} : vector<2x8xf32> to vector<1x8xf32>
    %440 = vector.extract_strided_slice %388 {offsets = [8, 0], sizes = [8, 48], strides = [1, 1]} : vector<16x96xf32> to vector<8x48xf32>
    %441 = vector.extract_strided_slice %440 {offsets = [0, 0], sizes = [8, 16], strides = [1, 1]} : vector<8x48xf32> to vector<8x16xf32>
    %442 = arith.truncf %441 : vector<8x16xf32> to vector<8x16xbf16>
    %443 = vector.extract_strided_slice %440 {offsets = [0, 16], sizes = [8, 16], strides = [1, 1]} : vector<8x48xf32> to vector<8x16xf32>
    %444 = arith.truncf %443 : vector<8x16xf32> to vector<8x16xbf16>
    %445 = vector.extract_strided_slice %440 {offsets = [0, 32], sizes = [8, 16], strides = [1, 1]} : vector<8x48xf32> to vector<8x16xf32>
    %446 = arith.truncf %445 : vector<8x16xf32> to vector<8x16xbf16>
    %cst_223 = arith.constant dense<0.000000e+00> : vector<8x8xf32>
    %447 = tpu.matmul %442, %444, %cst_223 {dimension_numbers = #tpu.dot_dimension_numbers<[1], [1], [0], [0], [0, 0, 1, 0], [], []>} : vector<8x16xbf16>, vector<8x16xbf16>, vector<8x8xf32> -> vector<8x8xf32>
    %cst_224 = arith.constant 2.500000e-01 : f32
    %448 = vector.broadcast %cst_224 : f32 to vector<8x8xf32>
    %449 = arith.mulf %447, %448 : vector<8x8xf32>
    %450 = vector.broadcast %439 : vector<1x8xf32> to vector<8x8xf32>
    %451 = arith.addf %449, %450 : vector<8x8xf32>
    %cst_225 = arith.constant dense<0xFF800000> : vector<8xf32>
    %452 = vector.multi_reduction <maximumf>, %451, %cst_225 [1] : vector<8x8xf32> to vector<8xf32>
    %453 = vector.shape_cast %452 : vector<8xf32> to vector<8x1xf32>
    %454 = vector.broadcast %453 : vector<8x1xf32> to vector<8x8xf32>
    %455 = arith.subf %451, %454 : vector<8x8xf32>
    %456 = math.exp %455 : vector<8x8xf32>
    %cst_226 = arith.constant dense<0.000000e+00> : vector<8xf32>
    %457 = vector.multi_reduction <add>, %456, %cst_226 [1] : vector<8x8xf32> to vector<8xf32>
    %458 = vector.shape_cast %457 : vector<8xf32> to vector<8x1xf32>
    %459 = tpu.reciprocal %458 {approx = true} : vector<8x1xf32> -> vector<8x1xf32>
    %460 = vector.broadcast %459 : vector<8x1xf32> to vector<8x8xf32>
    %461 = arith.mulf %456, %460 : vector<8x8xf32>
    %462 = arith.truncf %461 : vector<8x8xf32> to vector<8x8xbf16>
    %cst_227 = arith.constant dense<0.000000e+00> : vector<8x16xf32>
    %463 = tpu.matmul %462, %446, %cst_227 {dimension_numbers = #tpu.dot_dimension_numbers<[1], [0], [0], [1], [0, 0, 1, 1], [], []>} : vector<8x8xbf16>, vector<8x16xbf16>, vector<8x16xf32> -> vector<8x16xf32>
    %464 = vector.extract_strided_slice %388 {offsets = [8, 48], sizes = [8, 48], strides = [1, 1]} : vector<16x96xf32> to vector<8x48xf32>
    %465 = vector.extract_strided_slice %464 {offsets = [0, 0], sizes = [8, 16], strides = [1, 1]} : vector<8x48xf32> to vector<8x16xf32>
    %466 = arith.truncf %465 : vector<8x16xf32> to vector<8x16xbf16>
    %467 = vector.extract_strided_slice %464 {offsets = [0, 16], sizes = [8, 16], strides = [1, 1]} : vector<8x48xf32> to vector<8x16xf32>
    %468 = arith.truncf %467 : vector<8x16xf32> to vector<8x16xbf16>
    %469 = vector.extract_strided_slice %464 {offsets = [0, 32], sizes = [8, 16], strides = [1, 1]} : vector<8x48xf32> to vector<8x16xf32>
    %470 = arith.truncf %469 : vector<8x16xf32> to vector<8x16xbf16>
    %cst_228 = arith.constant dense<0.000000e+00> : vector<8x8xf32>
    %471 = tpu.matmul %466, %468, %cst_228 {dimension_numbers = #tpu.dot_dimension_numbers<[1], [1], [0], [0], [0, 0, 1, 0], [], []>} : vector<8x16xbf16>, vector<8x16xbf16>, vector<8x8xf32> -> vector<8x8xf32>
    %cst_229 = arith.constant 2.500000e-01 : f32
    %472 = vector.broadcast %cst_229 : f32 to vector<8x8xf32>
    %473 = arith.mulf %471, %472 : vector<8x8xf32>
    %474 = vector.broadcast %439 : vector<1x8xf32> to vector<8x8xf32>
    %475 = arith.addf %473, %474 : vector<8x8xf32>
    %cst_230 = arith.constant dense<0xFF800000> : vector<8xf32>
    %476 = vector.multi_reduction <maximumf>, %475, %cst_230 [1] : vector<8x8xf32> to vector<8xf32>
    %477 = vector.shape_cast %476 : vector<8xf32> to vector<8x1xf32>
    %478 = vector.broadcast %477 : vector<8x1xf32> to vector<8x8xf32>
    %479 = arith.subf %475, %478 : vector<8x8xf32>
    %480 = math.exp %479 : vector<8x8xf32>
    %cst_231 = arith.constant dense<0.000000e+00> : vector<8xf32>
    %481 = vector.multi_reduction <add>, %480, %cst_231 [1] : vector<8x8xf32> to vector<8xf32>
    %482 = vector.shape_cast %481 : vector<8xf32> to vector<8x1xf32>
    %483 = tpu.reciprocal %482 {approx = true} : vector<8x1xf32> -> vector<8x1xf32>
    %484 = vector.broadcast %483 : vector<8x1xf32> to vector<8x8xf32>
    %485 = arith.mulf %480, %484 : vector<8x8xf32>
    %486 = arith.truncf %485 : vector<8x8xf32> to vector<8x8xbf16>
    %cst_232 = arith.constant dense<0.000000e+00> : vector<8x16xf32>
    %487 = tpu.matmul %486, %470, %cst_232 {dimension_numbers = #tpu.dot_dimension_numbers<[1], [0], [0], [1], [0, 0, 1, 1], [], []>} : vector<8x8xbf16>, vector<8x16xbf16>, vector<8x16xf32> -> vector<8x16xf32>
    %488 = tpu.concatenate %463, %487 in 1 : vector<8x16xf32>, vector<8x16xf32> -> vector<8x32xf32>
    %489 = tpu.concatenate %438, %488 in 0 : vector<8x32xf32>, vector<8x32xf32> -> vector<16x32xf32>
    %c1_233 = arith.constant 1 : index
    %c0_234 = arith.constant 0 : index
    %c0_235 = arith.constant 0 : index
    %490 = vector.load %arg11[%c1_233, %c0_234, %c0_235] : memref<2x32x32xbf16, #tpu.memory_space<vmem>>, vector<1x32x32xbf16>
    %491 = vector.shape_cast %490 : vector<1x32x32xbf16> to vector<32x32xbf16>
    %492 = arith.truncf %489 : vector<16x32xf32> to vector<16x32xbf16>
    %cst_236 = arith.constant dense<0.000000e+00> : vector<16x32xf32>
    %493 = tpu.matmul %492, %491, %cst_236 {dimension_numbers = #tpu.dot_dimension_numbers<[1], [0], [0], [1], [0, 0, 1, 1], [], []>} : vector<16x32xbf16>, vector<32x32xbf16>, vector<16x32xf32> -> vector<16x32xf32>
    %c1_237 = arith.constant 1 : index
    %c0_238 = arith.constant 0 : index
    %c0_239 = arith.constant 0 : index
    %494 = vector.load %arg12[%c1_237, %c0_238, %c0_239] : memref<2x1x32xf32, #tpu.memory_space<vmem>>, vector<1x1x32xf32>
    %495 = vector.shape_cast %494 : vector<1x1x32xf32> to vector<1x32xf32>
    %496 = vector.broadcast %495 : vector<1x32xf32> to vector<16x32xf32>
    %497 = arith.addf %493, %496 : vector<16x32xf32>
    %498 = arith.addf %497, %380 : vector<16x32xf32>
    %c1_240 = arith.constant 1 : index
    %c0_241 = arith.constant 0 : index
    %c0_242 = arith.constant 0 : index
    %499 = vector.load %arg13[%c1_240, %c0_241, %c0_242] : memref<2x1x32xf32, #tpu.memory_space<vmem>>, vector<1x1x32xf32>
    %500 = vector.shape_cast %499 : vector<1x1x32xf32> to vector<1x32xf32>
    %c1_243 = arith.constant 1 : index
    %c0_244 = arith.constant 0 : index
    %c0_245 = arith.constant 0 : index
    %501 = vector.load %arg14[%c1_243, %c0_244, %c0_245] : memref<2x1x32xf32, #tpu.memory_space<vmem>>, vector<1x1x32xf32>
    %502 = vector.shape_cast %501 : vector<1x1x32xf32> to vector<1x32xf32>
    %cst_246 = arith.constant dense<0.000000e+00> : vector<16xf32>
    %503 = vector.multi_reduction <add>, %498, %cst_246 [1] : vector<16x32xf32> to vector<16xf32>
    %504 = vector.shape_cast %503 : vector<16xf32> to vector<16x1xf32>
    %cst_247 = arith.constant 3.200000e+01 : f32
    %505 = vector.broadcast %cst_247 : f32 to vector<16x1xf32>
    %506 = arith.divf %504, %505 : vector<16x1xf32>
    %507 = vector.broadcast %506 : vector<16x1xf32> to vector<16x32xf32>
    %508 = arith.subf %498, %507 : vector<16x32xf32>
    %509 = vector.broadcast %506 : vector<16x1xf32> to vector<16x32xf32>
    %510 = arith.subf %498, %509 : vector<16x32xf32>
    %511 = arith.mulf %508, %510 : vector<16x32xf32>
    %cst_248 = arith.constant dense<0.000000e+00> : vector<16xf32>
    %512 = vector.multi_reduction <add>, %511, %cst_248 [1] : vector<16x32xf32> to vector<16xf32>
    %513 = vector.shape_cast %512 : vector<16xf32> to vector<16x1xf32>
    %cst_249 = arith.constant 3.200000e+01 : f32
    %514 = vector.broadcast %cst_249 : f32 to vector<16x1xf32>
    %515 = arith.divf %513, %514 : vector<16x1xf32>
    %516 = vector.broadcast %506 : vector<16x1xf32> to vector<16x32xf32>
    %517 = arith.subf %498, %516 : vector<16x32xf32>
    %cst_250 = arith.constant 9.99999996E-13 : f32
    %518 = vector.broadcast %cst_250 : f32 to vector<16x1xf32>
    %519 = arith.addf %515, %518 : vector<16x1xf32>
    %520 = math.rsqrt %519 : vector<16x1xf32>
    %521 = vector.broadcast %520 : vector<16x1xf32> to vector<16x32xf32>
    %522 = arith.mulf %517, %521 : vector<16x32xf32>
    %523 = vector.broadcast %500 : vector<1x32xf32> to vector<16x32xf32>
    %524 = arith.mulf %522, %523 : vector<16x32xf32>
    %525 = vector.broadcast %502 : vector<1x32xf32> to vector<16x32xf32>
    %526 = arith.addf %524, %525 : vector<16x32xf32>
    %c1_251 = arith.constant 1 : index
    %c0_252 = arith.constant 0 : index
    %c0_253 = arith.constant 0 : index
    %527 = vector.load %arg15[%c1_251, %c0_252, %c0_253] : memref<2x32x128xbf16, #tpu.memory_space<vmem>>, vector<1x32x128xbf16>
    %528 = vector.shape_cast %527 : vector<1x32x128xbf16> to vector<32x128xbf16>
    %529 = arith.truncf %526 : vector<16x32xf32> to vector<16x32xbf16>
    %cst_254 = arith.constant dense<0.000000e+00> : vector<16x128xf32>
    %530 = tpu.matmul %529, %528, %cst_254 {dimension_numbers = #tpu.dot_dimension_numbers<[1], [0], [0], [1], [0, 0, 1, 1], [], []>} : vector<16x32xbf16>, vector<32x128xbf16>, vector<16x128xf32> -> vector<16x128xf32>
    %c1_255 = arith.constant 1 : index
    %c0_256 = arith.constant 0 : index
    %c0_257 = arith.constant 0 : index
    %531 = vector.load %arg16[%c1_255, %c0_256, %c0_257] : memref<2x1x128xf32, #tpu.memory_space<vmem>>, vector<1x1x128xf32>
    %532 = vector.shape_cast %531 : vector<1x1x128xf32> to vector<1x128xf32>
    %533 = vector.broadcast %532 : vector<1x128xf32> to vector<16x128xf32>
    %534 = arith.addf %530, %533 : vector<16x128xf32>
    %cst_258 = arith.constant 5.000000e-01 : f32
    %535 = vector.broadcast %cst_258 : f32 to vector<16x128xf32>
    %536 = arith.mulf %535, %534 : vector<16x128xf32>
    %cst_259 = arith.constant 4.471500e-02 : f32
    %537 = vector.broadcast %cst_259 : f32 to vector<16x128xf32>
    %538 = arith.mulf %537, %534 : vector<16x128xf32>
    %539 = arith.mulf %538, %534 : vector<16x128xf32>
    %540 = arith.mulf %539, %534 : vector<16x128xf32>
    %541 = arith.addf %534, %540 : vector<16x128xf32>
    %cst_260 = arith.constant 0.797884583 : f32
    %542 = vector.broadcast %cst_260 : f32 to vector<16x128xf32>
    %543 = arith.mulf %542, %541 : vector<16x128xf32>
    %544 = math.tanh %543 : vector<16x128xf32>
    %cst_261 = arith.constant 1.000000e+00 : f32
    %545 = vector.broadcast %cst_261 : f32 to vector<16x128xf32>
    %546 = arith.addf %545, %544 : vector<16x128xf32>
    %547 = arith.mulf %536, %546 : vector<16x128xf32>
    %c1_262 = arith.constant 1 : index
    %c0_263 = arith.constant 0 : index
    %c0_264 = arith.constant 0 : index
    %548 = vector.load %arg17[%c1_262, %c0_263, %c0_264] : memref<2x128x32xbf16, #tpu.memory_space<vmem>>, vector<1x128x32xbf16>
    %549 = vector.shape_cast %548 : vector<1x128x32xbf16> to vector<128x32xbf16>
    %550 = arith.truncf %547 : vector<16x128xf32> to vector<16x128xbf16>
    %cst_265 = arith.constant dense<0.000000e+00> : vector<16x32xf32>
    %551 = tpu.matmul %550, %549, %cst_265 {dimension_numbers = #tpu.dot_dimension_numbers<[1], [0], [0], [1], [0, 0, 1, 1], [], []>} : vector<16x128xbf16>, vector<128x32xbf16>, vector<16x32xf32> -> vector<16x32xf32>
    %c1_266 = arith.constant 1 : index
    %c0_267 = arith.constant 0 : index
    %c0_268 = arith.constant 0 : index
    %552 = vector.load %arg18[%c1_266, %c0_267, %c0_268] : memref<2x1x32xf32, #tpu.memory_space<vmem>>, vector<1x1x32xf32>
    %553 = vector.shape_cast %552 : vector<1x1x32xf32> to vector<1x32xf32>
    %554 = vector.broadcast %553 : vector<1x32xf32> to vector<16x32xf32>
    %555 = arith.addf %551, %554 : vector<16x32xf32>
    %556 = arith.addf %555, %526 : vector<16x32xf32>
    %c1_269 = arith.constant 1 : index
    %c0_270 = arith.constant 0 : index
    %c0_271 = arith.constant 0 : index
    %557 = vector.load %arg19[%c1_269, %c0_270, %c0_271] : memref<2x1x32xf32, #tpu.memory_space<vmem>>, vector<1x1x32xf32>
    %558 = vector.shape_cast %557 : vector<1x1x32xf32> to vector<1x32xf32>
    %c1_272 = arith.constant 1 : index
    %c0_273 = arith.constant 0 : index
    %c0_274 = arith.constant 0 : index
    %559 = vector.load %arg20[%c1_272, %c0_273, %c0_274] : memref<2x1x32xf32, #tpu.memory_space<vmem>>, vector<1x1x32xf32>
    %560 = vector.shape_cast %559 : vector<1x1x32xf32> to vector<1x32xf32>
    %cst_275 = arith.constant dense<0.000000e+00> : vector<16xf32>
    %561 = vector.multi_reduction <add>, %556, %cst_275 [1] : vector<16x32xf32> to vector<16xf32>
    %562 = vector.shape_cast %561 : vector<16xf32> to vector<16x1xf32>
    %cst_276 = arith.constant 3.200000e+01 : f32
    %563 = vector.broadcast %cst_276 : f32 to vector<16x1xf32>
    %564 = arith.divf %562, %563 : vector<16x1xf32>
    %565 = vector.broadcast %564 : vector<16x1xf32> to vector<16x32xf32>
    %566 = arith.subf %556, %565 : vector<16x32xf32>
    %567 = vector.broadcast %564 : vector<16x1xf32> to vector<16x32xf32>
    %568 = arith.subf %556, %567 : vector<16x32xf32>
    %569 = arith.mulf %566, %568 : vector<16x32xf32>
    %cst_277 = arith.constant dense<0.000000e+00> : vector<16xf32>
    %570 = vector.multi_reduction <add>, %569, %cst_277 [1] : vector<16x32xf32> to vector<16xf32>
    %571 = vector.shape_cast %570 : vector<16xf32> to vector<16x1xf32>
    %cst_278 = arith.constant 3.200000e+01 : f32
    %572 = vector.broadcast %cst_278 : f32 to vector<16x1xf32>
    %573 = arith.divf %571, %572 : vector<16x1xf32>
    %574 = vector.broadcast %564 : vector<16x1xf32> to vector<16x32xf32>
    %575 = arith.subf %556, %574 : vector<16x32xf32>
    %cst_279 = arith.constant 9.99999996E-13 : f32
    %576 = vector.broadcast %cst_279 : f32 to vector<16x1xf32>
    %577 = arith.addf %573, %576 : vector<16x1xf32>
    %578 = math.rsqrt %577 : vector<16x1xf32>
    %579 = vector.broadcast %578 : vector<16x1xf32> to vector<16x32xf32>
    %580 = arith.mulf %575, %579 : vector<16x32xf32>
    %581 = vector.broadcast %558 : vector<1x32xf32> to vector<16x32xf32>
    %582 = arith.mulf %580, %581 : vector<16x32xf32>
    %583 = vector.broadcast %560 : vector<1x32xf32> to vector<16x32xf32>
    %584 = arith.addf %582, %583 : vector<16x32xf32>
    %585 = vector.shape_cast %584 : vector<16x32xf32> to vector<2x8x32xf32>
    %586 = vector.extract_strided_slice %585 {offsets = [0, 0, 0], sizes = [2, 1, 32], strides = [1, 1, 1]} : vector<2x8x32xf32> to vector<2x1x32xf32>
    %587 = vector.shape_cast %586 : vector<2x1x32xf32> to vector<2x32xf32>
    %c0_280 = arith.constant 0 : index
    %c0_281 = arith.constant 0 : index
    %588 = vector.load %arg21[%c0_280, %c0_281] : memref<32x32xbf16, #tpu.memory_space<vmem>>, vector<32x32xbf16>
    %589 = arith.truncf %587 : vector<2x32xf32> to vector<2x32xbf16>
    %cst_282 = arith.constant dense<0.000000e+00> : vector<2x32xf32>
    %590 = tpu.matmul %589, %588, %cst_282 {dimension_numbers = #tpu.dot_dimension_numbers<[1], [0], [0], [1], [0, 0, 1, 1], [], []>} : vector<2x32xbf16>, vector<32x32xbf16>, vector<2x32xf32> -> vector<2x32xf32>
    %c0_283 = arith.constant 0 : index
    %c0_284 = arith.constant 0 : index
    %591 = vector.load %arg22[%c0_283, %c0_284] : memref<1x32xf32, #tpu.memory_space<vmem>>, vector<1x32xf32>
    %592 = vector.broadcast %591 : vector<1x32xf32> to vector<2x32xf32>
    %593 = arith.addf %590, %592 : vector<2x32xf32>
    %594 = math.tanh %593 : vector<2x32xf32>
    %c0_285 = arith.constant 0 : index
    %c0_286 = arith.constant 0 : index
    %595 = vector.load %arg23[%c0_285, %c0_286] : memref<32x128xbf16, #tpu.memory_space<vmem>>, vector<32x128xbf16>
    %596 = arith.truncf %594 : vector<2x32xf32> to vector<2x32xbf16>
    %cst_287 = arith.constant dense<0.000000e+00> : vector<2x128xf32>
    %597 = tpu.matmul %596, %595, %cst_287 {dimension_numbers = #tpu.dot_dimension_numbers<[1], [0], [0], [1], [0, 0, 1, 1], [], []>} : vector<2x32xbf16>, vector<32x128xbf16>, vector<2x128xf32> -> vector<2x128xf32>
    %c0_288 = arith.constant 0 : index
    %c0_289 = arith.constant 0 : index
    %598 = vector.load %arg24[%c0_288, %c0_289] : memref<1x128xf32, #tpu.memory_space<vmem>>, vector<1x128xf32>
    %599 = vector.broadcast %598 : vector<1x128xf32> to vector<2x128xf32>
    %600 = arith.addf %597, %599 : vector<2x128xf32>
    %c0_290 = arith.constant 0 : index
    %c0_291 = arith.constant 0 : index
    %601 = vector.load %arg25[%c0_290, %c0_291] : memref<2x128xf32, #tpu.memory_space<vmem>>, vector<2x128xf32>
    tpu.vector_store %arg25[%c0_290, %c0_291], %600 {strides = array<i32>} : memref<2x128xf32, #tpu.memory_space<vmem>>, vector<2x128xf32>,
    return
  }
  func.func @transform_0(%arg0: i32, %arg1: memref<2x8xi32, #tpu.memory_space<smem>>, %arg2: memref<2x8xi32, #tpu.memory_space<smem>>) -> (i32, i32) {
    %c0_i32 = arith.constant 0 : i32
    %c0_i32_0 = arith.constant 0 : i32
    %c0_i32_1 = arith.constant 0 : i32
    return %c0_i32, %c0_i32_0 : i32, i32
  }
  func.func @transform_1(%arg0: i32, %arg1: memref<2x8xi32, #tpu.memory_space<smem>>, %arg2: memref<2x8xi32, #tpu.memory_space<smem>>) -> (i32, i32) {
    %c0_i32 = arith.constant 0 : i32
    %c0_i32_0 = arith.constant 0 : i32
    %c0_i32_1 = arith.constant 0 : i32
    return %c0_i32, %c0_i32_0 : i32, i32
  }
  func.func @transform_2(%arg0: i32, %arg1: memref<2x8xi32, #tpu.memory_space<smem>>, %arg2: memref<2x8xi32, #tpu.memory_space<smem>>) -> (i32, i32) {
    %c0_i32 = arith.constant 0 : i32
    %c0_i32_0 = arith.constant 0 : i32
    %c0_i32_1 = arith.constant 0 : i32
    return %c0_i32, %c0_i32_0 : i32, i32
  }
  func.func @transform_3(%arg0: i32, %arg1: memref<2x8xi32, #tpu.memory_space<smem>>, %arg2: memref<2x8xi32, #tpu.memory_space<smem>>) -> (i32, i32) {
    %c0_i32 = arith.constant 0 : i32
    %c0_i32_0 = arith.constant 0 : i32
    %c0_i32_1 = arith.constant 0 : i32
    return %c0_i32, %c0_i32_0 : i32, i32
  }
  func.func @transform_4(%arg0: i32, %arg1: memref<2x8xi32, #tpu.memory_space<smem>>, %arg2: memref<2x8xi32, #tpu.memory_space<smem>>) -> (i32, i32) {
    %c0_i32 = arith.constant 0 : i32
    %c0_i32_0 = arith.constant 0 : i32
    %c0_i32_1 = arith.constant 0 : i32
    return %c0_i32, %c0_i32_0 : i32, i32
  }
  func.func @transform_5(%arg0: i32, %arg1: memref<2x8xi32, #tpu.memory_space<smem>>, %arg2: memref<2x8xi32, #tpu.memory_space<smem>>) -> (i32, i32) {
    %c0_i32 = arith.constant 0 : i32
    %c0_i32_0 = arith.constant 0 : i32
    %c0_i32_1 = arith.constant 0 : i32
    return %c0_i32, %c0_i32_0 : i32, i32
  }
  func.func @transform_6(%arg0: i32, %arg1: memref<2x8xi32, #tpu.memory_space<smem>>, %arg2: memref<2x8xi32, #tpu.memory_space<smem>>) -> (i32, i32, i32) {
    %c0_i32 = arith.constant 0 : i32
    %c0_i32_0 = arith.constant 0 : i32
    %c0_i32_1 = arith.constant 0 : i32
    %c0_i32_2 = arith.constant 0 : i32
    return %c0_i32, %c0_i32_0, %c0_i32_1 : i32, i32, i32
  }
  func.func @transform_7(%arg0: i32, %arg1: memref<2x8xi32, #tpu.memory_space<smem>>, %arg2: memref<2x8xi32, #tpu.memory_space<smem>>) -> (i32, i32, i32) {
    %c0_i32 = arith.constant 0 : i32
    %c0_i32_0 = arith.constant 0 : i32
    %c0_i32_1 = arith.constant 0 : i32
    %c0_i32_2 = arith.constant 0 : i32
    return %c0_i32, %c0_i32_0, %c0_i32_1 : i32, i32, i32
  }
  func.func @transform_8(%arg0: i32, %arg1: memref<2x8xi32, #tpu.memory_space<smem>>, %arg2: memref<2x8xi32, #tpu.memory_space<smem>>) -> (i32, i32, i32) {
    %c0_i32 = arith.constant 0 : i32
    %c0_i32_0 = arith.constant 0 : i32
    %c0_i32_1 = arith.constant 0 : i32
    %c0_i32_2 = arith.constant 0 : i32
    return %c0_i32, %c0_i32_0, %c0_i32_1 : i32, i32, i32
  }
  func.func @transform_9(%arg0: i32, %arg1: memref<2x8xi32, #tpu.memory_space<smem>>, %arg2: memref<2x8xi32, #tpu.memory_space<smem>>) -> (i32, i32, i32) {
    %c0_i32 = arith.constant 0 : i32
    %c0_i32_0 = arith.constant 0 : i32
    %c0_i32_1 = arith.constant 0 : i32
    %c0_i32_2 = arith.constant 0 : i32
    return %c0_i32, %c0_i32_0, %c0_i32_1 : i32, i32, i32
  }
  func.func @transform_10(%arg0: i32, %arg1: memref<2x8xi32, #tpu.memory_space<smem>>, %arg2: memref<2x8xi32, #tpu.memory_space<smem>>) -> (i32, i32, i32) {
    %c0_i32 = arith.constant 0 : i32
    %c0_i32_0 = arith.constant 0 : i32
    %c0_i32_1 = arith.constant 0 : i32
    %c0_i32_2 = arith.constant 0 : i32
    return %c0_i32, %c0_i32_0, %c0_i32_1 : i32, i32, i32
  }
  func.func @transform_11(%arg0: i32, %arg1: memref<2x8xi32, #tpu.memory_space<smem>>, %arg2: memref<2x8xi32, #tpu.memory_space<smem>>) -> (i32, i32, i32) {
    %c0_i32 = arith.constant 0 : i32
    %c0_i32_0 = arith.constant 0 : i32
    %c0_i32_1 = arith.constant 0 : i32
    %c0_i32_2 = arith.constant 0 : i32
    return %c0_i32, %c0_i32_0, %c0_i32_1 : i32, i32, i32
  }
  func.func @transform_12(%arg0: i32, %arg1: memref<2x8xi32, #tpu.memory_space<smem>>, %arg2: memref<2x8xi32, #tpu.memory_space<smem>>) -> (i32, i32, i32) {
    %c0_i32 = arith.constant 0 : i32
    %c0_i32_0 = arith.constant 0 : i32
    %c0_i32_1 = arith.constant 0 : i32
    %c0_i32_2 = arith.constant 0 : i32
    return %c0_i32, %c0_i32_0, %c0_i32_1 : i32, i32, i32
  }
  func.func @transform_13(%arg0: i32, %arg1: memref<2x8xi32, #tpu.memory_space<smem>>, %arg2: memref<2x8xi32, #tpu.memory_space<smem>>) -> (i32, i32, i32) {
    %c0_i32 = arith.constant 0 : i32
    %c0_i32_0 = arith.constant 0 : i32
    %c0_i32_1 = arith.constant 0 : i32
    %c0_i32_2 = arith.constant 0 : i32
    return %c0_i32, %c0_i32_0, %c0_i32_1 : i32, i32, i32
  }
  func.func @transform_14(%arg0: i32, %arg1: memref<2x8xi32, #tpu.memory_space<smem>>, %arg2: memref<2x8xi32, #tpu.memory_space<smem>>) -> (i32, i32, i32) {
    %c0_i32 = arith.constant 0 : i32
    %c0_i32_0 = arith.constant 0 : i32
    %c0_i32_1 = arith.constant 0 : i32
    %c0_i32_2 = arith.constant 0 : i32
    return %c0_i32, %c0_i32_0, %c0_i32_1 : i32, i32, i32
  }
  func.func @transform_15(%arg0: i32, %arg1: memref<2x8xi32, #tpu.memory_space<smem>>, %arg2: memref<2x8xi32, #tpu.memory_space<smem>>) -> (i32, i32, i32) {
    %c0_i32 = arith.constant 0 : i32
    %c0_i32_0 = arith.constant 0 : i32
    %c0_i32_1 = arith.constant 0 : i32
    %c0_i32_2 = arith.constant 0 : i32
    return %c0_i32, %c0_i32_0, %c0_i32_1 : i32, i32, i32
  }
  func.func @transform_16(%arg0: i32, %arg1: memref<2x8xi32, #tpu.memory_space<smem>>, %arg2: memref<2x8xi32, #tpu.memory_space<smem>>) -> (i32, i32, i32) {
    %c0_i32 = arith.constant 0 : i32
    %c0_i32_0 = arith.constant 0 : i32
    %c0_i32_1 = arith.constant 0 : i32
    %c0_i32_2 = arith.constant 0 : i32
    return %c0_i32, %c0_i32_0, %c0_i32_1 : i32, i32, i32
  }
  func.func @transform_17(%arg0: i32, %arg1: memref<2x8xi32, #tpu.memory_space<smem>>, %arg2: memref<2x8xi32, #tpu.memory_space<smem>>) -> (i32, i32, i32) {
    %c0_i32 = arith.constant 0 : i32
    %c0_i32_0 = arith.constant 0 : i32
    %c0_i32_1 = arith.constant 0 : i32
    %c0_i32_2 = arith.constant 0 : i32
    return %c0_i32, %c0_i32_0, %c0_i32_1 : i32, i32, i32
  }
  func.func @transform_18(%arg0: i32, %arg1: memref<2x8xi32, #tpu.memory_space<smem>>, %arg2: memref<2x8xi32, #tpu.memory_space<smem>>) -> (i32, i32) {
    %c0_i32 = arith.constant 0 : i32
    %c0_i32_0 = arith.constant 0 : i32
    %c0_i32_1 = arith.constant 0 : i32
    return %c0_i32, %c0_i32_0 : i32, i32
  }
  func.func @transform_19(%arg0: i32, %arg1: memref<2x8xi32, #tpu.memory_space<smem>>, %arg2: memref<2x8xi32, #tpu.memory_space<smem>>) -> (i32, i32) {
    %c0_i32 = arith.constant 0 : i32
    %c0_i32_0 = arith.constant 0 : i32
    %c0_i32_1 = arith.constant 0 : i32
    return %c0_i32, %c0_i32_0 : i32, i32
  }
  func.func @transform_20(%arg0: i32, %arg1: memref<2x8xi32, #tpu.memory_space<smem>>, %arg2: memref<2x8xi32, #tpu.memory_space<smem>>) -> (i32, i32) {
    %c0_i32 = arith.constant 0 : i32
    %c0_i32_0 = arith.constant 0 : i32
    %c0_i32_1 = arith.constant 0 : i32
    return %c0_i32, %c0_i32_0 : i32, i32
  }
  func.func @transform_21(%arg0: i32, %arg1: memref<2x8xi32, #tpu.memory_space<smem>>, %arg2: memref<2x8xi32, #tpu.memory_space<smem>>) -> (i32, i32) {
    %c0_i32 = arith.constant 0 : i32
    %c0_i32_0 = arith.constant 0 : i32
    %c0_i32_1 = arith.constant 0 : i32
    return %c0_i32, %c0_i32_0 : i32, i32
  }
  func.func @transform_22(%arg0: i32, %arg1: memref<2x8xi32, #tpu.memory_space<smem>>, %arg2: memref<2x8xi32, #tpu.memory_space<smem>>) -> (i32, i32) {
    %c0_i32 = arith.constant 0 : i32
    %c0_i32_0 = arith.constant 0 : i32
    %c0_i32_1 = arith.constant 0 : i32
    return %c0_i32, %c0_i32_0 : i32, i32
  }
}

</mosaic_0001>

<bundles_post_ra>
// kernel: gbv_classifier_forward.1
= control target key start
LH: loop header
LB: loop body
LE: loop exit
PB: predicated region body
PF: predicated region fallthrough
CT: control target
= control target key end

     0   :  { %s3712_s0 = inlined_call_operand.vmem [shape: s32[2,8], index: 0, kind: input, shape index: {}]   ;;  %s3713_s2 = inlined_call_operand.vmem [shape: s32[2,8], index: 2, kind: input, shape index: {}]   ;;  %s3714_s3 = inlined_call_operand.vmem [shape: f32[64,32], index: 3, kind: input, shape index: {}]   ;;  %s3715_s4 = inlined_call_operand.vmem [shape: f32[16,32], index: 4, kind: input, shape index: {}]   ;;  %s3716_s5 = inlined_call_operand.vmem [shape: f32[2,32], index: 5, kind: input, shape index: {}]   ;;  %s3717_s6 = inlined_call_operand.vmem [shape: f32[1,32], index: 6, kind: input, shape index: {}]   ;;  %s3718_s7 = inlined_call_operand.vmem [shape: f32[1,32], index: 7, kind: input, shape index: {}]   ;;  %s3719_s8 = inlined_call_operand.vmem [shape: bf16[2,32,96], index: 8, kind: input, shape index: {}]   ;;  %s3720_s9 = inlined_call_operand.vmem [shape: f32[2,1,96], index: 9, kind: input, shape index: {}]   ;;  %s3721_s10 = inlined_call_operand.vmem [shape: bf16[2,32,32], index: 10, kind: input, shape index: {}]   ;;  %s3722_s11 = inlined_call_operand.vmem [shape: f32[2,1,32], index: 11, kind: input, shape index: {}]   ;;  %s3723_s12 = inlined_call_operand.vmem [shape: f32[2,1,32], index: 12, kind: input, shape index: {}]   ;;  %s3724_s13 = inlined_call_operand.vmem [shape: f32[2,1,32], index: 13, kind: input, shape index: {}]   ;;  %s3725_s14 = inlined_call_operand.vmem [shape: bf16[2,32,128], index: 14, kind: input, shape index: {}]   ;;  %s3726_s15 = inlined_call_operand.vmem [shape: f32[2,1,128], index: 15, kind: input, shape index: {}]   ;;  %s3727_s16 = inlined_call_operand.vmem [shape: bf16[2,128,32], index: 16, kind: input, shape index: {}]   ;;  %s3728_s17 = inlined_call_operand.vmem [shape: f32[2,1,32], index: 17, kind: input, shape index: {}]   ;;  %s3729_s18 = inlined_call_operand.vmem [shape: f32[2,1,32], index: 18, kind: input, shape index: {}]   ;;  %s3730_s19 = inlined_call_operand.vmem [shape: f32[2,1,32], index: 19, kind: input, shape index: {}]   ;;  %s3731_s20 = inlined_call_operand.vmem [shape: bf16[32,32], index: 20, kind: input, shape index: {}]   ;;  %s3732_s21 = inlined_call_operand.vmem [shape: f32[1,32], index: 21, kind: input, shape index: {}]   ;;  %s3733_s22 = inlined_call_operand.vmem [shape: bf16[32,128], index: 22, kind: input, shape index: {}]   ;;  %s3734_s23 = inlined_call_operand.vmem [shape: f32[1,128], index: 23, kind: input, shape index: {}]   ;;  %s3735_s24 = inlined_call_operand.hbm [shape: f32[2,128], index: 24, kind: output, shape index: {}]   ;;  %s3736_s1 = inlined_call_operand.vmem [shape: s32[2,8], index: 1, kind: input, shape index: {}]  }
   0x1   :  { %3744 = sst [smem:[#allocation9_spill]] %s3712_s0 }
   0x2   :  { %3745 = sst [smem:[#allocation10_spill]] %s3713_s2 }
   0x3   :  { %3746 = sst [smem:[#allocation11_spill]] %s3714_s3  ;;  %s33_s3 = sshll.u32 %s3736_s1, 4  ;;  %s34_s3 = int_to_ptr.vmem [resolvable:$true] %s33_s3 }
   0x4   :  { %3747 = sst [smem:[#allocation12_spill]] %s3715_s4 }
   0x5   :  { %3748 = sst [smem:[#allocation13_spill]] %s3716_s5 }
   0x6   :  { %3749 = sst [smem:[#allocation14_spill]] %s3717_s6 }
   0x7   :  { %3750 = sst [smem:[#allocation15_spill]] %s3718_s7 }
   0x8   :  { %3751 = sst [smem:[#allocation16_spill]] %s3719_s8 }
   0x9   :  { %3752 = sst [smem:[#allocation17_spill]] %s3720_s9 }
   0xa   :  { %3753 = sst [smem:[#allocation18_spill]] %s3730_s19 }
   0xb   :  { %3754 = sst [smem:[#allocation19_spill]] %s3732_s21 }
   0xc   :  { %3755 = sst [smem:[#allocation20_spill]] %s3733_s22 }
   0xd   :  { %3756 = sst [smem:[#allocation21_spill]] %s3734_s23 }
   0xe   :  { %3757 = sst [smem:[#allocation22_spill]] %s3735_s24 }
   0xf   :  { %s3758_s27 = sld [smem:[#allocation9_spill]] }
  0x15   :  { %s29_s19 = sshll.u32 %s3758_s27, 4  ;;  %s30_s19 = int_to_ptr.vmem [resolvable:$true] %s29_s19 }
  0x16   :  { %s2848_s29 = scalar_lea.vmem %s30_s19, 32  ;;  %p2853_p1 = scmp.lt.s32.totalorder %s30_s19, %s30_s19 }
  0x17   :  { %p2849_p0 = scmp.ne.s32.totalorder %s30_s19, %s2848_s29  ;;  %p2854_p2 = scmp.lt.s32.totalorder %s2848_s29, %s2848_s29 }
  0x19   :  { %p2855_p3 = por %p2854_p2, %p2853_p1 }
  0x1b   :  { %p2856_p4 = pnand %p2855_p3, %p2849_p0 }
  0x1d   :  { %2859 = shalt.err (!%p2856_p4)  }
  0x1e   :  { %s2896_s0 = smov [#allocation3]   ;;  %s2860_s8 = scalar_lea.vmem %s34_s3, 32 }
  0x1f   :  { %32 = dma.vmem_to_smem %s30_s19, 32, %s2896_s0, [#allocation2] }
  0x20   :  { %p2861_p5 = scmp.ne.s32.totalorder %s34_s3, %s2860_s8  ;;  %p2865_p6 = scmp.lt.s32.totalorder %s34_s3, %s34_s3 }
  0x21   :  { %p2866_p7 = scmp.lt.s32.totalorder %s2860_s8, %s2860_s8 }
  0x23   :  { %p2867_p8 = por %p2866_p7, %p2865_p6 }
  0x25   :  { %p2868_p9 = pnand %p2867_p8, %p2861_p5 }
  0x27   :  { %2871 = shalt.err (!%p2868_p9)  }
  0x28   :  { %s2897_s30 = smov [#allocation4]  }
  0x29   :  { %36 = dma.vmem_to_smem %s34_s3, 32, %s2897_s30, [#allocation2] }
  0x2a   :  { %2892 = dma.done.wait [#allocation2], 64 }
  0x2b   :  { %2893 = vsyncadd [#allocation2], 4294967232 }
  0x2c   :  { %38 = sfence }
  0x2d   :  { %s85_s1 = sld [smem:[#allocation3]]  ;;  %vm263_vm0 = vcmask 1040384   ;;  %vm265_vm1 = vcmask 1041408   ;;  %vm267_vm2 = vcmask 1042432   ;;  %vm269_vm3 = vcmask 1043456  }
  0x2e   :  { %s88_s4 = sld [smem:[#allocation4]]  ;;  %vm271_vm4 = vcmask 1044480   ;;  %vm273_vm5 = vcmask 1045504   ;;  %vm275_vm6 = vcmask 1046528   ;;  %vm290_vm7 = vcmask 261120  }
  0x2f   :  { %s2317_s25 = sld [smem:[#allocation3 + $0x1]] }
  0x30   :  { %s2318_s9 = sld [smem:[#allocation4 + $0x1]] }
  0x31   :  { %s2319_s5 = sld [smem:[#allocation3 + $0x2]] }
  0x32   :  { %s2320_s2 = sld [smem:[#allocation4 + $0x2]] }
  0x33   :  { %s3759_s26 = sld [smem:[#allocation11_spill]] }
  0x34   :  { %s3041_s28 = sld [smem:[#allocation3 + $0x3]] }
  0x35   :  { %s3760_s3 = sld [smem:[#allocation13_spill]] }
  0x36   :  { %s3046_s8 = sld [smem:[#allocation4 + $0x3]] }
  0x37   :  { %s3761_s23 = sld [smem:[#allocation12_spill]] }
  0x38   :  { %s3066_s29 = sld [smem:[#allocation4 + $0x4]] }
  0x39   :  { %s86_s27 = scalar_lea.vmem %s3759_s26, %s85_s1  ;;  %s95_s1 = scalar_lea.vmem %s3759_s26, %s2317_s25 }
  0x3a   :  { %v87_v0 = vld [vmem:[%s86_s27] sm:$0x1]  ;;  %s3061_s27 = sld [smem:[#allocation3 + $0x4]]  ;;  %s104_s25 = scalar_lea.vmem %s3759_s26, %s2319_s5 }
  0x3b   :  { %s89_s0 = scalar_lea.vmem %s3760_s3, %s88_s4  ;;  %v96_v5 = vld [vmem:[%s95_s1] sm:$0x1]  ;;  %s98_s24 = scalar_lea.vmem %s3760_s3, %s2318_s9 }
  0x3c   :  { %v90_v1 = vld [vmem:[%s89_s0] sm:$0x1]  ;;  %s3076_s6 = sld [smem:[#allocation3 + $0x5]]  ;;  %s107_s19 = scalar_lea.vmem %s3760_s3, %s2320_s2 }
  0x3d   :  { %v3051_v2 = vld [vmem:[%s3761_s23] sm:$0x1]  ;;  %v3059_v3 = vld [vmem:[%s3761_s23 + $0x1] sm:$0x1]  ;;  %v91_v4 = vadd.f32 %v90_v1, %v87_v0  ;;  %v3074_v7 = vld [vmem:[%s3761_s23 + $0x2] sm:$0x1] }
  0x3e   :  { %v99_v6 = vld [vmem:[%s98_s24] sm:$0x1]  ;;  %s3081_s4 = sld [smem:[#allocation4 + $0x5]]  ;;  %s113_s24 = scalar_lea.vmem %s3759_s26, %s3041_s28  ;;  %v3090_v11 = vld [vmem:[%s3761_s23 + $0x3] sm:$0x1] }
  0x3f   :  { %v100_v8 = vadd.f32 %v99_v6, %v96_v5  ;;  %v105_v9 = vld [vmem:[%s104_s25] sm:$0x1]  ;;  %s3092_s0 = sld [smem:[#allocation3 + $0x6]]  ;;  %v93_v12 = vadd.f32 %v3051_v2, %v91_v4  ;;  %s116_s28 = scalar_lea.vmem %s3760_s3, %s3046_s8  ;;  %v3109_v17 = vld [vmem:[%s3761_s23 + $0x4] sm:$0x1] }
  0x40   :  { %v108_v10 = vld [vmem:[%s107_s19] sm:$0x1]  ;;  %s3100_s30 = sld [smem:[#allocation4 + $0x6]]  ;;  %s122_s19 = scalar_lea.vmem %s3759_s26, %s3061_s27  ;;  %v3127_v23 = vld [vmem:[%s3761_s23 + $0x5] sm:$0x1] }
  0x41   :  { %v102_v13 = vadd.f32 %v3059_v3, %v100_v8  ;;  %v109_v14 = vadd.f32 %v108_v10, %v105_v9  ;;  %v114_v15 = vld [vmem:[%s113_s24] sm:$0x1]  ;;  %s3111_s21 = sld [smem:[#allocation3 + $0x7]]  ;;  %s125_s22 = scalar_lea.vmem %s3760_s3, %s3066_s29  ;;  %v3146_v30 = vld [vmem:[%s3761_s23 + $0x6] sm:$0x1] }
  0x42   :  { %v117_v16 = vld [vmem:[%s116_s28] sm:$0x1]  ;;  %s3118_s2 = sld [smem:[#allocation4 + $0x7]]  ;;  %s131_s28 = scalar_lea.vmem %s3759_s26, %s3076_s6  ;;  %v3165_v37 = vld [vmem:[%s3761_s23 + $0x7] sm:$0x1] }
  0x43   :  { %v111_v18 = vadd.f32 %v3074_v7, %v109_v14  ;;  %v118_v19 = vadd.f32 %v117_v16, %v114_v15  ;;  %v123_v20 = vld [vmem:[%s122_s19] sm:$0x1]  ;;  %v222_v21 = vrot.slane %v102_v13, 7  ;;  %s3129_s19 = sld [smem:[#allocation3 + $0x80]] }
  0x44   :  { %v126_v22 = vld [vmem:[%s125_s22] sm:$0x1]  ;;  %s134_s7 = scalar_lea.vmem %s3760_s3, %s3081_s4  ;;  %s3137_s6 = sld [smem:[#allocation4 + $0x80]] }
  0x45   :  { %v120_v24 = vadd.f32 %v3090_v11, %v118_v19  ;;  %v127_v25 = vadd.f32 %v126_v22, %v123_v20  ;;  %v132_v26 = vld [vmem:[%s131_s28] sm:$0x1]  ;;  %v225_v27 = vrot.slane %v111_v18, 6  ;;  %v264_v28 = vsel %vm263_vm0, %v93_v12, %v222_v21  ;;  %s140_s22 = scalar_lea.vmem %s3759_s26, %s3092_s0  ;;  %s3148_s28 = sld [smem:[#allocation3 + $0x81]] }
  0x46   :  { %v135_v29 = vld [vmem:[%s134_s7] sm:$0x1]  ;;  %s143_s1 = scalar_lea.vmem %s3760_s3, %s3100_s30  ;;  %s3156_s0 = sld [smem:[#allocation4 + $0x81]] }
  0x47   :  { %v129_v31 = vadd.f32 %v3109_v17, %v127_v25  ;;  %v136_v32 = vadd.f32 %v135_v29, %v132_v26  ;;  %v141_v33 = vld [vmem:[%s140_s22] sm:$0x1]  ;;  %v228_v34 = vrot.slane %v120_v24, 5  ;;  %v266_v35 = vsel %vm265_vm1, %v264_v28, %v225_v27  ;;  %s149_s7 = scalar_lea.vmem %s3759_s26, %s3111_s21  ;;  %s3167_s22 = sld [smem:[#allocation3 + $0x82]] }
  0x48   :  { %v144_v36 = vld [vmem:[%s143_s1] sm:$0x1]  ;;  %s152_s25 = scalar_lea.vmem %s3760_s3, %s3118_s2  ;;  %s3175_s21 = sld [smem:[#allocation4 + $0x82]] }
  0x49   :  { %v138_v38 = vadd.f32 %v3127_v23, %v136_v32  ;;  %v145_v39 = vadd.f32 %v144_v36, %v141_v33  ;;  %v150_v40 = vld [vmem:[%s149_s7] sm:$0x1]  ;;  %v231_v41 = vrot.slane %v129_v31, 4  ;;  %v268_v42 = vsel %vm267_vm2, %v266_v35, %v228_v34  ;;  %s158_s9 = scalar_lea.vmem %s3759_s26, %s3129_s19  ;;  %s3181_s1 = sld [smem:[#allocation3 + $0x83]] }
  0x4a   :  { %v153_v43 = vld [vmem:[%s152_s25] sm:$0x1]  ;;  %s161_s5 = scalar_lea.vmem %s3760_s3, %s3137_s6  ;;  %s3189_s7 = sld [smem:[#allocation4 + $0x83]] }
  0x4b   :  { %v147_v44 = vadd.f32 %v3146_v30, %v145_v39  ;;  %v154_v45 = vadd.f32 %v153_v43, %v150_v40  ;;  %v234_v46 = vrot.slane %v138_v38, 3  ;;  %v270_v47 = vsel %vm269_vm3, %v268_v42, %v231_v41  ;;  %v159_v48 = vld [vmem:[%s158_s9] sm:$0x1]  ;;  %s166_s24 = scalar_lea.vmem %s3759_s26, %s3148_s28  ;;  %s3195_s30 = sld [smem:[#allocation3 + $0x84]] }
  0x4c   :  { %v162_v49 = vld [vmem:[%s161_s5] sm:$0x1]  ;;  %s169_s25 = scalar_lea.vmem %s3760_s3, %s3156_s0  ;;  %s3203_s23 = sld [smem:[#allocation4 + $0x84]] }
  0x4d   :  { %v156_v50 = vadd.f32 %v3165_v37, %v154_v45  ;;  %v237_v51 = vrot.slane %v147_v44, 2  ;;  %v272_v52 = vsel %vm271_vm4, %v270_v47, %v234_v46  ;;  %v163_v53 = vadd.f32 %v162_v49, %v159_v48  ;;  %v167_v54 = vld [vmem:[%s166_s24] sm:$0x1]  ;;  %s174_s9 = scalar_lea.vmem %s3759_s26, %s3167_s22  ;;  %s3209_s2 = sld [smem:[#allocation3 + $0x85]] }
  0x4e   :  { %v170_v55 = vld [vmem:[%s169_s25] sm:$0x1]  ;;  %s177_s0 = scalar_lea.vmem %s3760_s3, %s3175_s21  ;;  %s3216_s8 = sld [smem:[#allocation4 + $0x85]] }
  0x4f   :  { %v240_v56 = vrot.slane %v156_v50, 1  ;;  %v274_v57 = vsel %vm273_vm5, %v272_v52, %v237_v51  ;;  %v171_v58 = vadd.f32 %v170_v55, %v167_v54  ;;  %v175_v59 = vld [vmem:[%s174_s9] sm:$0x1]  ;;  %s182_s22 = scalar_lea.vmem %s3759_s26, %s3181_s1  ;;  %s3222_s27 = sld [smem:[#allocation3 + $0x86]]  ;;  %v164_v62 = vadd.f32 %v163_v53, %v3051_v2 }
  0x50   :  { %v178_v60 = vld [vmem:[%s177_s0] sm:$0x1]  ;;  %s185_s25 = scalar_lea.vmem %s3760_s3, %s3189_s7  ;;  %s2344_s4 = sld [smem:[#allocation4 + $0x86]] }
  0x51   :  { %v276_v61 = vsel %vm275_vm6, %v274_v57, %v240_v56  ;;  %v172_v63 = vadd.f32 %v171_v58, %v3059_v3  ;;  %v179_v0 = vadd.f32 %v178_v60, %v175_v59  ;;  %v183_v1 = vld [vmem:[%s182_s22] sm:$0x1]  ;;  %s190_s9 = scalar_lea.vmem %s3759_s26, %s3195_s30  ;;  %s2345_s29 = sld [smem:[#allocation3 + $0x87]] }
  0x52   :  { %v291_v4 = vsel %vm290_vm7, %v276_v61, 0.0  ;;  %v186_v5 = vld [vmem:[%s185_s25] sm:$0x1]  ;;  %s193_s7 = scalar_lea.vmem %s3760_s3, %s3203_s23  ;;  %s2346_s19 = sld [smem:[#allocation4 + $0x87]] }
  0x53   :  { %292 = vadd.xlane.f32.xlu0 %v291_v4  ;;  %v180_v2 = vadd.f32 %v179_v0, %v3074_v7  ;;  %v187_v3 = vadd.f32 %v186_v5, %v183_v1  ;;  %v191_v6 = vld [vmem:[%s190_s9] sm:$0x1]  ;;  %v243_v8 = vrot.slane %v172_v63, 7  ;;  %s198_s21 = scalar_lea.vmem %s3759_s26, %s3209_s2 }
  0x54   :  { %v194_v9 = vld [vmem:[%s193_s7] sm:$0x1]  ;;  %s201_s25 = scalar_lea.vmem %s3760_s3, %s3216_s8 }
  0x55   :  { %v188_v10 = vadd.f32 %v187_v3, %v3090_v11  ;;  %v195_v12 = vadd.f32 %v194_v9, %v191_v6  ;;  %v199_v13 = vld [vmem:[%s198_s21] sm:$0x1]  ;;  %v246_v7 = vrot.slane %v180_v2, 6  ;;  %v277_v14 = vsel %vm263_vm0, %v164_v62, %v243_v8  ;;  %s206_s28 = scalar_lea.vmem %s3759_s26, %s3222_s27 }
  0x56   :  { %v202_v15 = vld [vmem:[%s201_s25] sm:$0x1]  ;;  %s209_s5 = scalar_lea.vmem %s3760_s3, %s2344_s4 }
  0x57   :  { %v196_v16 = vadd.f32 %v195_v12, %v3109_v17  ;;  %v203_v18 = vadd.f32 %v202_v15, %v199_v13  ;;  %v207_v19 = vld [vmem:[%s206_s28] sm:$0x1]  ;;  %v249_v11 = vrot.slane %v188_v10, 5  ;;  %v278_v20 = vsel %vm265_vm1, %v277_v14, %v246_v7  ;;  %s214_s7 = scalar_lea.vmem %s3759_s26, %s2345_s29 }
  0x58   :  { %v210_v21 = vld [vmem:[%s209_s5] sm:$0x1]  ;;  %s217_s22 = scalar_lea.vmem %s3760_s3, %s2346_s19 }
  0x59   :  { %v204_v22 = vadd.f32 %v203_v18, %v3127_v23  ;;  %v211_v24 = vadd.f32 %v210_v21, %v207_v19  ;;  %v215_v25 = vld [vmem:[%s214_s7] sm:$0x1]  ;;  %v252_v17 = vrot.slane %v196_v16, 4  ;;  %v279_v26 = vsel %vm267_vm2, %v278_v20, %v249_v11 }
  0x5a   :  { %v218_v27 = vld [vmem:[%s217_s22] sm:$0x1] }
  0x5b   :  { %v212_v28 = vadd.f32 %v211_v24, %v3146_v30  ;;  %v219_v29 = vadd.f32 %v218_v27, %v215_v25  ;;  %v255_v31 = vrot.slane %v204_v22, 3  ;;  %v280_v32 = vsel %vm269_vm3, %v279_v26, %v252_v17 }
  0x5d   :  { %v220_v33 = vadd.f32 %v219_v29, %v3165_v37  ;;  %v258_v34 = vrot.slane %v212_v28, 2  ;;  %v281_v23 = vsel %vm271_vm4, %v280_v32, %v255_v31 }
  0x5f   :  { %v261_v35 = vrot.slane %v220_v33, 1  ;;  %v282_v36 = vsel %vm273_vm5, %v281_v23, %v258_v34 }
  0x61   :  { %v283_v38 = vsel %vm275_vm6, %v282_v36, %v261_v35 }
  0x62   :  { %v294_v39 = vsel %vm290_vm7, %v283_v38, 0.0 }
  0x63   :  { %295 = vadd.xlane.f32.xlu0 %v294_v39 }
  0x64   :  { %39 = vsyncpa [#allocation6], 0  ;;  %s3762_s4 = sld [smem:[#allocation16_spill]]  ;;  %v2898_v49 = vmov 0.0   ;;  %vm2899_vm8 = vmmov 0   ;;  %s2900_s5 = smov 64   ;;  %v454_v26 = vlaneseq }
  0x65   :  { %2533 = vmatprep.subr.bf16.mxu1 %v2898_v49  ;;  %2537 = vmatprep.mubr.msk.bf16.mxu1 %vm2899_vm8, %v2898_v49  ;;  %s3763_s6 = sld [smem:[#allocation14_spill]]  ;;  %s2901_s8 = smov 112   ;;  %vm406_vm9 = vcmask 130048   ;;  %vm459_vm10 = vcmask 64512   ;;  %vm2144_vm11 = vcmask 1041409  }
  0x66   :  { %2547 = vmatprep.subr.bf16.mxu0 %v2898_v49  ;;  %2549 = vmatprep.mubr.msk.bf16.mxu0 %vm2899_vm8, %v2898_v49  ;;  %s3764_s1 = sld [smem:[#allocation15_spill]]  ;;  %s2902_s0 = smov 80   ;;  %v455_v28 = vshrl.u32 %v454_v26, 7 }
  0x67   :  { %s3765_s9 = sld [smem:[#allocation17_spill]]  ;;  %s2903_s22 = smov 48  }
  0x68   :  { %s3766_s24 = sld [smem:[#allocation10_spill]]  ;;  %v456_v31 = vsub.s32 0, %v455_v28  ;;  %s2904_s26 = smov 96  }
  0x69   :  { %s2905_s30 = smov 16   ;;  %s3767_s19 = sld [smem:[#allocation18_spill]] }
  0x6a   :  { %v2754_v48 = vld [vmem:[%s3762_s4 + $0x8] sm:$0xff]   ;;  %v2755_v50 = vld [vmem:[%s3762_s4] sm:$0xff]   ;;  %s3769_s27 = sld [smem:[#allocation19_spill]]  ;;  %s2906_s29 = smov [#allocation5]  }
  0x6b   :  { %2534 = vmatpush3.bf16.msra.mxu1 %v2754_v48  ;;  %v2347_v59 = vld [vmem:[%s3763_s6] ss:$0 sm:$0xff]  ;;  %s2277_s21 = sshll.u32 %s2906_s29, 4  ;;  %s2278_s21 = int_to_ptr.vmem [resolvable:$true] %s2277_s21 }
  0x6c   :  { %2535 = vmatprep.subr.bf16.mxu1 %v2898_v49  ;;  %v2348_v63 = vld [vmem:[%s3764_s1] ss:$0 sm:$0xff]  ;;  %s2872_s6 = scalar_lea.vmem %s2278_s21, 32  ;;  %p2877_p11 = scmp.lt.s32.totalorder %s2278_s21, %s2278_s21 }
  0x6d   :  { %v2349_v2 = vld [vmem:[%s3765_s9] ss:$0 sm:$0xff]  ;;  %p2873_p10 = scmp.ne.s32.totalorder %s2278_s21, %s2872_s6  ;;  %p2878_p12 = scmp.lt.s32.totalorder %s2872_s6, %s2872_s6 }
  0x6e   :  { %v284_v25 = vld [vmem:[%s3766_s24] sm:$0x3] }
  0x6f   :  { %2536 = vmatpush3.bf16.msra.mxu1 %v2755_v50  ;;  %v285_v17 = vcvt.s32.f32 %v284_v25  ;;  %p2879_p13 = por %p2878_p12, %p2877_p11 }
  0x70   :  { %2541 = vmatprep.subr.bf16.mxu1 %v2898_v49 }
  0x71   :  { %v286_v27 = vsub.f32 1.0, %v285_v17  ;;  %p2880_p0 = pnand %p2879_p13, %p2873_p10 }
  0x73   :  { %v287_v29 = vmul.f32 -10000.0, %v286_v27 }
  0x75   :  { %v3350_v32 = vrot.slane %v287_v29, %v456_v31 }
  0xdc   :  { %v293_v40 = vpop.xlane.xlu0 %292 }
  0xdd   :  { %v298_v30 = vmul.f32 0.03125, %v293_v40 }
  0xdf   :  { %v300_v41 = vsub.f32 %v276_v61, %v298_v30 }
  0xe1   :  { %v302_v42 = vmul.f32 %v300_v41, %v300_v41 }
  0xe3   :  { %v304_v43 = vsel %vm290_vm7, %v302_v42, 0.0 }
  0xe4   :  { %305 = vadd.xlane.f32.xlu1 %v304_v43  ;;  %v690_v43 = vsub.s32 1, %v455_v28 }
  0xec   :  { %v296_v37 = vpop.xlane.xlu0 %295 }
  0xed   :  { %v299_v44 = vmul.f32 0.03125, %v296_v37 }
  0xef   :  { %v301_v45 = vsub.f32 %v283_v38, %v299_v44 }
  0xf1   :  { %v303_v46 = vmul.f32 %v301_v45, %v301_v45 }
  0xf3   :  { %v307_v47 = vsel %vm290_vm7, %v303_v46, 0.0  ;;  %v3356_v46 = vrot.slane %v287_v29, %v690_v43 }
  0xf4   :  { %308 = vadd.xlane.f32.xlu1 %v307_v47 }
 0x16d   :  { %v306_v51 = vpop.xlane.xlu1 %305 }
 0x16e   :  { %v310_v52 = vmul.f32 0.03125, %v306_v51 }
 0x170   :  { %v312_v53 = vadd.f32 1e-12, %v310_v52 }
 0x172   :  { %2786 = vrsqrt.f32 %v312_v53 }
 0x17d   :  { %v309_v54 = vpop.xlane.xlu1 %308 }
 0x17e   :  { %v311_v55 = vmul.f32 0.03125, %v309_v54 }
 0x17f   :  { %v2787_v57 = vpop.eup %2786 }
 0x180   :  { %v313_v56 = vadd.f32 1e-12, %v311_v55  ;;  %v316_v58 = vmul.f32 %v2787_v57, %v300_v41 }
 0x182   :  { %2788 = vrsqrt.f32 %v313_v56  ;;  %v324_v62 = vmul.f32 %v2347_v59, %v316_v58 }
 0x184   :  { %v3297_v1 = vadd.f32 %v2348_v63, %v324_v62 }
 0x18f   :  { %v2789_v60 = vpop.eup %2788 }
 0x190   :  { %v317_v61 = vmul.f32 %v2789_v60, %v301_v45 }
 0x192   :  { %v325_v0 = vmul.f32 %v2347_v59, %v317_v61 }
 0x194   :  { %v3299_v4 = vadd.f32 %v2348_v63, %v325_v0 }
 0x196   :  { %v338_v5 = vpack.c.bf16 %v3299_v4, %v3297_v1 }
 0x198   :  { %2538 = vmatmul.mubr.msk.bf16.vlgmr.msra.gmra.mxu1 %vm290_vm7, %v338_v5 }
 0x199   :  { %2543 = vmatprep.mubr.msk.bf16.mxu1 %vm2899_vm8, %v2898_v49 }
 0x258   :  { %v395_v3 = vpop.f32.mrf.mxu1 }
 0x259   :  { %v396_v6 = vadd.f32 %v2349_v2, %v395_v3 }
 0x25a   :  { %v2539_v8 = vpop.f32.mrf.mxu1 }
 0x25b   :  { %v3309_v9 = vpack.c.bf16 %v396_v6, %v396_v6 }
 0x25c   :  { %v398_v10 = vpop.f32.mrf.mxu1 }
 0x25d   :  { %v399_v12 = vadd.f32 %v2349_v2, %v398_v10  ;;  %522 = vrot.lane.b32.xlu1 %v3309_v9, %s2900_s5  ;;  %404 = vrot.lane.b32.xlu0 %v3309_v9, %s2901_s8 }
 0x25e   :  { %v2540_v13 = vpop.f32.mrf.mxu1 }
 0x25f   :  { %v3315_v7 = vpack.c.bf16 %v399_v12, %v399_v12 }
 0x261   :  { %520 = vrot.lane.b32.xlu1 %v3309_v9, %s2902_s0  ;;  %755 = vrot.lane.b32.xlu0 %v3315_v7, %s2900_s5 }
 0x265   :  { %639 = vrot.lane.b32.xlu1 %v3315_v7, %s2901_s8 }
 0x269   :  { %753 = vrot.lane.b32.xlu1 %v3315_v7, %s2902_s0 }
 0x2cf   :  { %v405_v14 = vpop.permute.xlu0 %404  ;;  %v523_v16 = vpop.permute.xlu1 %522 }
 0x2d0   :  { %v411_v15 = vsel %vm406_vm9, %v405_v14, 0  ;;  %v528_v19 = vsel %vm406_vm9, %v523_v16, 0 }
 0x2d1   :  { %2542 = vmatpush3.bf16.xpose.msra.mxu1 %v411_v15 }
 0x2d2   :  { %2553 = vmatprep.subr.bf16.mxu1 %v2898_v49 }
 0x2d3   :  { %v521_v18 = vpop.permute.xlu1 %520  ;;  %v756_v21 = vpop.permute.xlu0 %755 }
 0x2d4   :  { %v761_v22 = vsel %vm406_vm9, %v756_v21, 0 }
 0x2d7   :  { %v640_v11 = vpop.permute.xlu1 %639 }
 0x2d8   :  { %2544 = vmatmul.mubr.msk.bf16.vlgmr.msra.gmra.mxu1 %vm406_vm9, %v3309_v9  ;;  %v645_v20 = vsel %vm406_vm9, %v640_v11, 0 }
 0x2d9   :  { %2554 = vmatpush3.bf16.xpose.msra.mxu1 %v528_v19  ;;  %2555 = vmatprep.mubr.msk.bf16.mxu1 %vm2899_vm8, %v2898_v49 }
 0x2da   :  { %2565 = vmatprep.subr.bf16.mxu1 %v2898_v49 }
 0x2db   :  { %v754_v24 = vpop.permute.xlu1 %753 }
 0x2e0   :  { %2556 = vmatmul.mubr.msk.bf16.vlgmr.msra.gmra.mxu1 %vm406_vm9, %v521_v18 }
 0x2e1   :  { %2566 = vmatpush3.bf16.xpose.msra.mxu1 %v645_v20  ;;  %2567 = vmatprep.mubr.msk.bf16.mxu1 %vm2899_vm8, %v2898_v49 }
 0x2e2   :  { %2577 = vmatprep.subr.bf16.mxu1 %v2898_v49 }
 0x2e8   :  { %2568 = vmatmul.mubr.msk.bf16.vlgmr.msra.gmra.mxu1 %vm406_vm9, %v3315_v7 }
 0x2e9   :  { %2578 = vmatpush3.bf16.xpose.msra.mxu1 %v761_v22  ;;  %2579 = vmatprep.mubr.msk.bf16.mxu1 %vm2899_vm8, %v2898_v49 }
 0x2ea   :  { %2589 = vmatprep.subr.bf16.mxu1 %v2898_v49 }
 0x2f0   :  { %2580 = vmatmul.mubr.msk.bf16.vlgmr.msra.gmra.mxu1 %vm406_vm9, %v754_v24 }
 0x2f1   :  { %2593 = vmatprep.mubr.msk.bf16.mxu1 %vm2899_vm8, %v2898_v49 }
 0x398   :  { %v447_v33 = vpop.f32.mrf.mxu1 }
 0x399   :  { %v453_v34 = vmul.f32 0.25, %v447_v33 }
 0x39a   :  { %v2545_v23 = vpop.f32.mrf.mxu1 }
 0x39b   :  { %v458_v35 = vadd.f32 %v3350_v32, %v453_v34 }
 0x39c   :  { %v450_v36 = vpop.f32.mrf.mxu1 }
 0x39d   :  { %v460_v38 = vsel %vm459_vm10, %v458_v35, -inf }
 0x39e   :  { %461 = vmax.xlane.f32.xlu0 %v460_v38  ;;  %v2546_v39 = vpop.f32.mrf.mxu1 }
 0x3a0   :  { %v564_v40 = vpop.f32.mrf.mxu1 }
 0x3a1   :  { %v570_v30 = vmul.f32 0.25, %v564_v40 }
 0x3a2   :  { %v2557_v41 = vpop.f32.mrf.mxu1 }
 0x3a3   :  { %v571_v42 = vadd.f32 %v570_v30, %v3350_v32 }
 0x3a4   :  { %v567_v37 = vpop.f32.mrf.mxu1 }
 0x3a5   :  { %v572_v44 = vsel %vm459_vm10, %v571_v42, -inf }
 0x3a6   :  { %573 = vmax.xlane.f32.xlu1 %v572_v44  ;;  %v2558_v45 = vpop.f32.mrf.mxu1 }
 0x3a7   :  { %v2756_v45 = vld [vmem:[%s3721_s10 + $0x8] sm:$0xff]  }
 0x3a8   :  { %v681_v47 = vpop.f32.mrf.mxu1  ;;  %2590 = vmatpush3.bf16.msra.mxu1 %v2756_v45 }
 0x3a9   :  { %v687_v48 = vmul.f32 0.25, %v681_v47  ;;  %2591 = vmatprep.subr.bf16.mxu1 %v2898_v49 }
 0x3aa   :  { %v2569_v50 = vpop.f32.mrf.mxu1 }
 0x3ab   :  { %v692_v51 = vadd.f32 %v3356_v46, %v687_v48 }
 0x3ac   :  { %v684_v52 = vpop.f32.mrf.mxu1 }
 0x3ad   :  { %v693_v53 = vsel %vm459_vm10, %v692_v51, -inf }
 0x3ae   :  { %694 = vmax.xlane.f32.xlu0 %v693_v53  ;;  %v2570_v54 = vpop.f32.mrf.mxu1 }
 0x3b0   :  { %v797_v55 = vpop.f32.mrf.mxu1 }
 0x3b1   :  { %v803_v56 = vmul.f32 0.25, %v797_v55 }
 0x3b2   :  { %v2581_v57 = vpop.f32.mrf.mxu1 }
 0x3b3   :  { %v804_v58 = vadd.f32 %v803_v56, %v3356_v46 }
 0x3b4   :  { %v800_v59 = vpop.f32.mrf.mxu1 }
 0x3b5   :  { %v805_v60 = vsel %vm459_vm10, %v804_v58, -inf }
 0x3b6   :  { %806 = vmax.xlane.f32.xlu0 %v805_v60  ;;  %v2582_v61 = vpop.f32.mrf.mxu1  ;;  %v2757_v60 = vld [vmem:[%s3721_s10] sm:$0xff]  }
 0x3b7   :  { %2592 = vmatpush3.bf16.msra.mxu1 %v2757_v60 }
 0x3b8   :  { %2605 = vmatprep.subr.bf16.mxu1 %v2898_v49 }
 0x427   :  { %v462_v62 = vpop.xlane.xlu0 %461 }
 0x428   :  { %v463_v63 = vsub.f32 %v458_v35, %v462_v62 }
 0x42a   :  { %v464_v0 = vmul.f32 1.442695, %v463_v63 }
 0x42c   :  { %2790 = vpow2.f32 %v464_v0 }
 0x42f   :  { %v574_v5 = vpop.xlane.xlu1 %573 }
 0x430   :  { %v575_v2 = vsub.f32 %v571_v42, %v574_v5 }
 0x432   :  { %v576_v3 = vmul.f32 1.442695, %v575_v2 }
 0x434   :  { %2792 = vpow2.f32 %v576_v3 }
 0x437   :  { %v695_v6 = vpop.xlane.xlu0 %694 }
 0x438   :  { %v696_v8 = vsub.f32 %v692_v51, %v695_v6 }
 0x439   :  { %v2791_v10 = vpop.eup %2790 }
 0x43a   :  { %v697_v12 = vmul.f32 1.442695, %v696_v8  ;;  %v466_v13 = vsel %vm459_vm10, %v2791_v10, 0.0 }
 0x43b   :  { %467 = vadd.xlane.f32.xlu0 %v466_v13  ;;  %v2361_v13 = vld [vmem:[%s3722_s11] ss:$0 sm:$0xff] }
 0x43c   :  { %2794 = vpow2.f32 %v697_v12 }
 0x43f   :  { %v807_v19 = vpop.xlane.xlu0 %806 }
 0x440   :  { %v808_v11 = vsub.f32 %v804_v58, %v807_v19 }
 0x441   :  { %v2793_v14 = vpop.eup %2792 }
 0x442   :  { %v578_v15 = vsel %vm459_vm10, %v2793_v14, 0.0  ;;  %v809_v20 = vmul.f32 1.442695, %v808_v11 }
 0x443   :  { %579 = vadd.xlane.f32.xlu1 %v578_v15 }
 0x444   :  { %2796 = vpow2.f32 %v809_v20 }
 0x449   :  { %v2795_v16 = vpop.eup %2794 }
 0x44a   :  { %v699_v18 = vsel %vm459_vm10, %v2795_v16, 0.0 }
 0x44b   :  { %700 = vadd.xlane.f32.xlu0 %v699_v18 }
 0x451   :  { %v2797_v21 = vpop.eup %2796 }
 0x452   :  { %v811_v22 = vsel %vm459_vm10, %v2797_v21, 0.0 }
 0x454   :  { %584 = vrot.lane.b32.xlu1 %v3309_v9, %s2903_s22 }
 0x458   :  { %705 = vrot.lane.b32.xlu1 %v3315_v7, %s2904_s26 }
 0x461   :  { %472 = vrot.lane.b32.xlu0 %v3309_v9, %s2904_s26 }
 0x47c   :  { %812 = vadd.xlane.f32.xlu1 %v811_v22 }
 0x48d   :  { %817 = vrot.lane.b32.xlu1 %v3315_v7, %s2903_s22 }
 0x4c4   :  { %v468_v24 = vpop.xlane.xlu0 %467 }
 0x4c5   :  { %2798 = vrcp.f32 %v468_v24 }
 0x4cc   :  { %v580_v25 = vpop.xlane.xlu1 %579 }
 0x4cd   :  { %2800 = vrcp.f32 %v580_v25 }
 0x4d0   :  { %v585_v29 = vpop.permute.xlu1 %584 }
 0x4d1   :  { %v590_v34 = vsel %vm269_vm3, %v585_v29, 0 }
 0x4d2   :  { %v2799_v17 = vpop.eup %2798 }
 0x4d3   :  { %v470_v27 = vmul.f32 %v2799_v17, %v2791_v10 }
 0x4d4   :  { %v701_v26 = vpop.xlane.xlu0 %700  ;;  %v706_v23 = vpop.permute.xlu1 %705 }
 0x4d5   :  { %2802 = vrcp.f32 %v701_v26  ;;  %v471_v31 = vpack.c.bf16 %v470_v27, %v470_v27  ;;  %v711_v38 = vsel %vm269_vm3, %v706_v23, 0 }
 0x4d8   :  { %v473_v28 = vpop.permute.xlu0 %472 }
 0x4d9   :  { %v478_v9 = vsel %vm269_vm3, %v473_v28, 0 }
 0x4da   :  { %2548 = vmatpush3.bf16.msra.mxu0 %v478_v9  ;;  %v2801_v33 = vpop.eup %2800 }
 0x4db   :  { %2559 = vmatprep.subr.bf16.mxu0 %v2898_v49  ;;  %v582_v7 = vmul.f32 %v2801_v33, %v2793_v14 }
 0x4dd   :  { %2550 = vmatmul.mubr.msk.bf16.vlgmr.msra.gmra.mxu0 %vm459_vm10, %v471_v31  ;;  %v583_v35 = vpack.c.bf16 %v582_v7, %v582_v7 }
 0x4de   :  { %2560 = vmatpush3.bf16.msra.mxu0 %v590_v34  ;;  %2561 = vmatprep.mubr.msk.bf16.mxu0 %vm2899_vm8, %v2898_v49  ;;  %v2759_v34 = vld [vmem:[%s3725_s14] sm:$0xff]  }
 0x4df   :  { %2571 = vmatprep.subr.bf16.mxu0 %v2898_v49 }
 0x4e2   :  { %v2803_v36 = vpop.eup %2802 }
 0x4e3   :  { %v703_v39 = vmul.f32 %v2803_v36, %v2795_v16 }
 0x4e5   :  { %2562 = vmatmul.mubr.msk.bf16.vlgmr.msra.gmra.mxu0 %vm459_vm10, %v583_v35  ;;  %v704_v40 = vpack.c.bf16 %v703_v39, %v703_v39 }
 0x4e6   :  { %2572 = vmatpush3.bf16.msra.mxu0 %v711_v38  ;;  %2573 = vmatprep.mubr.msk.bf16.mxu0 %vm2899_vm8, %v2898_v49 }
 0x4e7   :  { %2583 = vmatprep.subr.bf16.mxu0 %v2898_v49 }
 0x4ed   :  { %2574 = vmatmul.mubr.msk.bf16.vlgmr.msra.gmra.mxu0 %vm459_vm10, %v704_v40 }
 0x4ee   :  { %2585 = vmatprep.mubr.msk.bf16.mxu0 %vm2899_vm8, %v2898_v49 }
 0x505   :  { %v813_v30 = vpop.xlane.xlu1 %812 }
 0x506   :  { %2804 = vrcp.f32 %v813_v30 }
 0x509   :  { %v818_v41 = vpop.permute.xlu1 %817 }
 0x50a   :  { %v823_v42 = vsel %vm269_vm3, %v818_v41, 0  ;;  %v2365_v41 = vld [vmem:[%s3723_s12] ss:$0 sm:$0xff] }
 0x50b   :  { %2584 = vmatpush3.bf16.msra.mxu0 %v823_v42 }
 0x50c   :  { %2597 = vmatprep.subr.bf16.mxu0 %v2898_v49 }
 0x513   :  { %v2805_v43 = vpop.eup %2804 }
 0x514   :  { %v815_v37 = vmul.f32 %v2805_v43, %v2797_v21 }
 0x516   :  { %v816_v44 = vpack.c.bf16 %v815_v37, %v815_v37 }
 0x518   :  { %2586 = vmatmul.mubr.msk.bf16.vlgmr.msra.gmra.mxu0 %vm459_vm10, %v816_v44  ;;  %v2366_v44 = vld [vmem:[%s3724_s13] ss:$0 sm:$0xff] }
 0x519   :  { %2601 = vmatprep.mubr.msk.bf16.mxu0 %vm2899_vm8, %v2898_v49 }
 0x59d   :  { %v514_v47 = vpop.f32.mrf.mxu0 }
 0x59f   :  { %v2551_v48 = vpop.f32.mrf.mxu0 }
 0x5a1   :  { %v517_v50 = vpop.f32.mrf.mxu0 }
 0x5a3   :  { %v2552_v51 = vpop.f32.mrf.mxu0 }
 0x5a4   :  { %v2760_v51 = vld [vmem:[%s3727_s16 + $0x38] sm:$0xff]  }
 0x5a5   :  { %v626_v52 = vpop.f32.mrf.mxu0 }
 0x5a7   :  { %v2563_v53 = vpop.f32.mrf.mxu0 }
 0x5a8   :  { %v2762_v53 = vld [vmem:[%s3727_s16 + $0x28] sm:$0xff]  }
 0x5a9   :  { %v629_v54 = vpop.f32.mrf.mxu0 }
 0x5aa   :  { %v2763_v54 = vld [vmem:[%s3727_s16 + $0x20] sm:$0xff]  }
 0x5ab   :  { %v2564_v55 = vpop.f32.mrf.mxu0 }
 0x5ac   :  { %v2764_v55 = vld [vmem:[%s3727_s16 + $0x18] sm:$0xff]  }
 0x5ad   :  { %v747_v56 = vpop.f32.mrf.mxu0 }
 0x5af   :  { %v2575_v57 = vpop.f32.mrf.mxu0 }
 0x5b0   :  { %v2766_v57 = vld [vmem:[%s3727_s16 + $0x8] sm:$0xff]  }
 0x5b1   :  { %v750_v58 = vpop.f32.mrf.mxu0 }
 0x5b2   :  { %v2767_v58 = vld [vmem:[%s3727_s16] sm:$0xff]  }
 0x5b3   :  { %v2576_v59 = vpop.f32.mrf.mxu0 }
 0x5b4   :  { %v2367_v59 = vld [vmem:[%s3726_s15] ss:$0 sm:$0xff] }
 0x5d8   :  { %v859_v61 = vpop.f32.mrf.mxu0 }
 0x5d9   :  { %v2744_v62 = vpack.i.bf16 %v859_v61, %v626_v52  ;;  %v2761_v52 = vld [vmem:[%s3727_s16 + $0x30] sm:$0xff]  }
 0x5da   :  { %v2587_v63 = vpop.f32.mrf.mxu0 }
 0x5db   :  { %2745 = vrot.lane.b32.xlu0 %v2744_v62, %s2905_s30 }
 0x5dc   :  { %v862_v0 = vpop.f32.mrf.mxu0 }
 0x5de   :  { %v2588_v5 = vpop.f32.mrf.mxu0 }
 0x64d   :  { %v2746_v2 = vpop.permute.xlu0 %2745 }
 0x64e   :  { %v2748_v3 = vunpack.i.h.bf16 %v2746_v2  ;;  %v2747_v6 = vunpack.i.l.bf16 %v2746_v2 }
 0x650   :  { %v869_v8 = vsel %vm406_vm9, %v747_v56, %v2748_v3  ;;  %v636_v10 = vsel %vm406_vm9, %v514_v47, %v2747_v6  ;;  %v2765_v56 = vld [vmem:[%s3727_s16 + $0x10] sm:$0xff]  }
 0x651   :  { %v874_v12 = vpack.c.bf16 %v869_v8, %v636_v10 }
 0x653   :  { %2594 = vmatmul.mubr.msk.bf16.vlgmr.msra.gmra.mxu1 %vm290_vm7, %v874_v12 }
 0x654   :  { %2621 = vmatprep.mubr.msk.bf16.mxu1 %vm2899_vm8, %v2898_v49  ;;  %2606 = vmatpush3.bf16.msra.mxu1 %v2760_v51 }
 0x655   :  { %2607 = vmatprep.subr.bf16.mxu1 %v2898_v49 }
 0x658   :  { %2608 = vmatpush3.bf16.msra.mxu1 %v2761_v52 }
 0x659   :  { %2609 = vmatprep.subr.bf16.mxu1 %v2898_v49 }
 0x65c   :  { %2610 = vmatpush3.bf16.msra.mxu1 %v2762_v53 }
 0x65d   :  { %2611 = vmatprep.subr.bf16.mxu1 %v2898_v49 }
 0x660   :  { %2612 = vmatpush3.bf16.msra.mxu1 %v2763_v54 }
 0x661   :  { %2613 = vmatprep.subr.bf16.mxu1 %v2898_v49 }
 0x664   :  { %2614 = vmatpush3.bf16.msra.mxu1 %v2764_v55  ;;  %v2380_v55 = vld [vmem:[%s3729_s18] ss:$0 sm:$0xff] }
 0x665   :  { %2615 = vmatprep.subr.bf16.mxu1 %v2898_v49 }
 0x668   :  { %2616 = vmatpush3.bf16.msra.mxu1 %v2765_v56 }
 0x669   :  { %2617 = vmatprep.subr.bf16.mxu1 %v2898_v49 }
 0x66c   :  { %2618 = vmatpush3.bf16.msra.mxu1 %v2766_v57 }
 0x66d   :  { %2619 = vmatprep.subr.bf16.mxu1 %v2898_v49 }
 0x670   :  { %2620 = vmatpush3.bf16.msra.mxu1 %v2767_v58 }
 0x671   :  { %2651 = vmatprep.subr.bf16.mxu1 %v2898_v49 }
 0x713   :  { %v931_v14 = vpop.f32.mrf.mxu1 }
 0x714   :  { %v932_v15 = vadd.f32 %v2361_v13, %v931_v14 }
 0x715   :  { %v2595_v16 = vpop.f32.mrf.mxu1 }
 0x716   :  { %v938_v18 = vadd.f32 %v932_v15, %v3297_v1 }
 0x717   :  { %v934_v19 = vpop.f32.mrf.mxu1 }
 0x718   :  { %v935_v11 = vadd.f32 %v2361_v13, %v934_v19  ;;  %v942_v20 = vsel %vm290_vm7, %v938_v18, 0.0 }
 0x719   :  { %943 = vadd.xlane.f32.xlu1 %v942_v20  ;;  %v2596_v21 = vpop.f32.mrf.mxu1 }
 0x71a   :  { %v939_v22 = vadd.f32 %v935_v11, %v3299_v4  ;;  %v2758_v4 = vld [vmem:[%s3725_s14 + $0x8] sm:$0xff]  }
 0x71b   :  { %2598 = vmatpush3.bf16.msra.mxu0 %v2758_v4 }
 0x71c   :  { %v945_v24 = vsel %vm290_vm7, %v939_v22, 0.0  ;;  %2599 = vmatprep.subr.bf16.mxu0 %v2898_v49 }
 0x71d   :  { %946 = vadd.xlane.f32.xlu0 %v945_v24 }
 0x71f   :  { %2600 = vmatpush3.bf16.msra.mxu0 %v2759_v34 }
 0x720   :  { %2625 = vmatprep.subr.bf16.mxu0 %v2898_v49 }
 0x7a2   :  { %v944_v25 = vpop.xlane.xlu1 %943 }
 0x7a3   :  { %v948_v17 = vmul.f32 0.03125, %v944_v25 }
 0x7a5   :  { %v950_v26 = vsub.f32 %v938_v18, %v948_v17 }
 0x7a6   :  { %v947_v27 = vpop.xlane.xlu0 %946 }
 0x7a7   :  { %v949_v28 = vmul.f32 0.03125, %v947_v27  ;;  %v952_v9 = vmul.f32 %v950_v26, %v950_v26 }
 0x7a9   :  { %v951_v29 = vsub.f32 %v939_v22, %v949_v28  ;;  %v954_v1 = vsel %vm290_vm7, %v952_v9, 0.0 }
 0x7aa   :  { %955 = vadd.xlane.f32.xlu0 %v954_v1 }
 0x7ab   :  { %v953_v31 = vmul.f32 %v951_v29, %v951_v29 }
 0x7ad   :  { %v957_v33 = vsel %vm290_vm7, %v953_v31, 0.0 }
 0x7ae   :  { %958 = vadd.xlane.f32.xlu0 %v957_v33 }
 0x833   :  { %v956_v7 = vpop.xlane.xlu0 %955 }
 0x834   :  { %v960_v23 = vmul.f32 0.03125, %v956_v7 }
 0x836   :  { %v962_v35 = vadd.f32 1e-12, %v960_v23 }
 0x837   :  { %v959_v36 = vpop.xlane.xlu0 %958 }
 0x838   :  { %2806 = vrsqrt.f32 %v962_v35  ;;  %v961_v38 = vmul.f32 0.03125, %v959_v36 }
 0x83a   :  { %v963_v39 = vadd.f32 1e-12, %v961_v38 }
 0x83c   :  { %2808 = vrsqrt.f32 %v963_v39 }
 0x845   :  { %v2807_v40 = vpop.eup %2806 }
 0x846   :  { %v966_v30 = vmul.f32 %v2807_v40, %v950_v26  ;;  %v2371_v26 = vld [vmem:[%s3728_s17] ss:$0 sm:$0xff] }
 0x848   :  { %v974_v37 = vmul.f32 %v2365_v41, %v966_v30 }
 0x849   :  { %v2809_v42 = vpop.eup %2808 }
 0x84a   :  { %v967_v43 = vmul.f32 %v2809_v42, %v951_v29  ;;  %v3431_v47 = vadd.f32 %v2366_v44, %v974_v37  ;;  %v2768_v37 = vld [vmem:[%s3762_s4 + $0x18] sm:$0xff]  }
 0x84c   :  { %v975_v45 = vmul.f32 %v2365_v41, %v967_v43 }
 0x84e   :  { %v3433_v48 = vadd.f32 %v2366_v44, %v975_v45  ;;  %v2769_v44 = vld [vmem:[%s3762_s4 + $0x10] sm:$0xff]   ;;  %s3770_s4 = sld [smem:[#allocation21_spill]] }
 0x850   :  { %v988_v50 = vpack.c.bf16 %v3433_v48, %v3431_v47 }
 0x852   :  { %2602 = vmatmul.mubr.msk.bf16.vlgmr.msra.gmra.mxu0 %vm290_vm7, %v988_v50 }
 0x853   :  { %2629 = vmatprep.mubr.msk.bf16.mxu0 %vm2899_vm8, %v2898_v49  ;;  %2626 = vmatpush3.bf16.msra.mxu0 %v2768_v37 }
 0x854   :  { %2627 = vmatprep.subr.bf16.mxu0 %v2898_v49 }
 0x857   :  { %2628 = vmatpush3.bf16.msra.mxu0 %v2769_v44 }
 0x858   :  { %2633 = vmatprep.subr.bf16.mxu0 %v2898_v49 }
 0x912   :  { %v1045_v60 = vpop.f32.mrf.mxu0 }
 0x913   :  { %v1046_v61 = vadd.f32 %v2367_v59, %v1045_v60 }
 0x914   :  { %v2603_v62 = vpop.f32.mrf.mxu0 }
 0x915   :  { %v1054_v63 = vmul.f32 0.044715, %v1046_v61  ;;  %v1052_v20 = vmul.f32 0.5, %v1046_v61 }
 0x916   :  { %v1048_v0 = vpop.f32.mrf.mxu0 }
 0x917   :  { %v1056_v5 = vmul.f32 %v1054_v63, %v1046_v61  ;;  %v1049_v2 = vadd.f32 %v2367_v59, %v1048_v0  ;;  %v2381_v59 = vld [vmem:[%s3767_s19] ss:$0 sm:$0xff]  ;;  %v2387_v0 = vld [vmem:[%s3765_s9 + $0x1] ss:$0 sm:$0xff] }
 0x918   :  { %v2604_v3 = vpop.f32.mrf.mxu0 }
 0x919   :  { %v1058_v6 = vmul.f32 %v1056_v5, %v1046_v61  ;;  %v1055_v8 = vmul.f32 0.044715, %v1049_v2  ;;  %v1053_v21 = vmul.f32 0.5, %v1049_v2 }
 0x91b   :  { %v1060_v10 = vadd.f32 %v1058_v6, %v1046_v61  ;;  %v1057_v12 = vmul.f32 %v1055_v8, %v1049_v2 }
 0x91d   :  { %v1062_v13 = vmul.f32 0.7978846, %v1060_v10  ;;  %v1059_v14 = vmul.f32 %v1057_v12, %v1049_v2 }
 0x91f   :  { %2810 = vtanh.f32 %v1062_v13  ;;  %v1061_v15 = vadd.f32 %v1059_v14, %v1049_v2 }
 0x921   :  { %v1063_v16 = vmul.f32 0.7978846, %v1061_v15 }
 0x923   :  { %2812 = vtanh.f32 %v1063_v16 }
 0x92c   :  { %v2811_v18 = vpop.eup %2810 }
 0x92d   :  { %v1066_v19 = vadd.f32 1.0, %v2811_v18 }
 0x92f   :  { %v1068_v24 = vmul.f32 %v1066_v19, %v1052_v20 }
 0x930   :  { %v2813_v11 = vpop.eup %2812 }
 0x931   :  { %v1067_v22 = vadd.f32 1.0, %v2813_v11 }
 0x933   :  { %v1069_v25 = vmul.f32 %v1067_v22, %v1053_v21 }
 0x935   :  { %v1086_v17 = vpack.c.bf16 %v1069_v25, %v1068_v24 }
 0x937   :  { %2622 = vmatmul.mubr.bf16.vlgmr.msra.gmra.mxu1 %v1086_v17 }
 0x938   :  { %2653 = vmatprep.mubr.msk.bf16.mxu1 %vm2899_vm8, %v2898_v49 }
 0x9f7   :  { %v1176_v27 = vpop.f32.mrf.mxu1 }
 0x9f8   :  { %v1177_v28 = vadd.f32 %v2371_v26, %v1176_v27 }
 0x9f9   :  { %v2623_v9 = vpop.f32.mrf.mxu1 }
 0x9fa   :  { %v1183_v29 = vadd.f32 %v1177_v28, %v3431_v47 }
 0x9fb   :  { %v1179_v1 = vpop.f32.mrf.mxu1 }
 0x9fc   :  { %v1180_v31 = vadd.f32 %v2371_v26, %v1179_v1  ;;  %v1187_v33 = vsel %vm290_vm7, %v1183_v29, 0.0 }
 0x9fd   :  { %1188 = vadd.xlane.f32.xlu1 %v1187_v33  ;;  %v2624_v4 = vpop.f32.mrf.mxu1 }
 0x9fe   :  { %v1184_v34 = vadd.f32 %v1180_v31, %v3433_v48 }
 0xa00   :  { %v1190_v7 = vsel %vm290_vm7, %v1184_v34, 0.0 }
 0xa01   :  { %1191 = vadd.xlane.f32.xlu0 %v1190_v7 }
 0xa86   :  { %v1189_v23 = vpop.xlane.xlu1 %1188 }
 0xa87   :  { %v1193_v35 = vmul.f32 0.03125, %v1189_v23 }
 0xa89   :  { %v1195_v36 = vsub.f32 %v1183_v29, %v1193_v35 }
 0xa8a   :  { %v1192_v38 = vpop.xlane.xlu0 %1191 }
 0xa8b   :  { %v1194_v39 = vmul.f32 0.03125, %v1192_v38  ;;  %v1197_v40 = vmul.f32 %v1195_v36, %v1195_v36 }
 0xa8d   :  { %v1196_v30 = vsub.f32 %v1184_v34, %v1194_v39  ;;  %v1199_v41 = vsel %vm290_vm7, %v1197_v40, 0.0 }
 0xa8e   :  { %1200 = vadd.xlane.f32.xlu1 %v1199_v41 }
 0xa8f   :  { %v1198_v42 = vmul.f32 %v1196_v30, %v1196_v30 }
 0xa91   :  { %v1202_v43 = vsel %vm290_vm7, %v1198_v42, 0.0 }
 0xa92   :  { %1203 = vadd.xlane.f32.xlu0 %v1202_v43 }
 0xb17   :  { %v1201_v45 = vpop.xlane.xlu1 %1200 }
 0xb18   :  { %v1205_v47 = vmul.f32 0.03125, %v1201_v45 }
 0xb1a   :  { %v1207_v48 = vadd.f32 1e-12, %v1205_v47 }
 0xb1b   :  { %v1204_v50 = vpop.xlane.xlu0 %1203 }
 0xb1c   :  { %2814 = vrsqrt.f32 %v1207_v48  ;;  %v1206_v51 = vmul.f32 0.03125, %v1204_v50 }
 0xb1e   :  { %v1208_v52 = vadd.f32 1e-12, %v1206_v51 }
 0xb20   :  { %2816 = vrsqrt.f32 %v1208_v52 }
 0xb29   :  { %v2815_v53 = vpop.eup %2814 }
 0xb2a   :  { %v1211_v54 = vmul.f32 %v2815_v53, %v1195_v36 }
 0xb2c   :  { %v1219_v58 = vmul.f32 %v2380_v55, %v1211_v54 }
 0xb2d   :  { %v2817_v56 = vpop.eup %2816 }
 0xb2e   :  { %v1212_v57 = vmul.f32 %v2817_v56, %v1196_v30  ;;  %v3500_v61 = vadd.f32 %v2381_v59, %v1219_v58 }
 0xb30   :  { %v1220_v60 = vmul.f32 %v2380_v55, %v1212_v57 }
 0xb32   :  { %v3502_v62 = vadd.f32 %v2381_v59, %v1220_v60 }
 0xb34   :  { %v1234_v63 = vpack.c.bf16 %v3502_v62, %v3500_v61 }
 0xb36   :  { %2630 = vmatmul.mubr.msk.bf16.vlgmr.msra.gmra.mxu0 %vm290_vm7, %v1234_v63 }
 0xb37   :  { %2635 = vmatprep.mubr.msk.bf16.mxu0 %vm2899_vm8, %v2898_v49 }
 0xbf6   :  { %v1292_v5 = vpop.f32.mrf.mxu0 }
 0xbf7   :  { %v1293_v2 = vadd.f32 %v2387_v0, %v1292_v5 }
 0xbf8   :  { %v2631_v3 = vpop.f32.mrf.mxu0 }
 0xbf9   :  { %v3512_v6 = vpack.c.bf16 %v1293_v2, %v1293_v2 }
 0xbfa   :  { %v1295_v8 = vpop.f32.mrf.mxu0 }
 0xbfb   :  { %1301 = vrot.lane.b32.xlu1 %v3512_v6, %s2901_s8  ;;  %v1296_v12 = vadd.f32 %v2387_v0, %v1295_v8 }
 0xbfc   :  { %v2632_v10 = vpop.f32.mrf.mxu0 }
 0xbfd   :  { %v3520_v13 = vpack.c.bf16 %v1296_v12, %v1296_v12 }
 0xbff   :  { %1413 = vrot.lane.b32.xlu1 %v3512_v6, %s2900_s5 }
 0xc03   :  { %1411 = vrot.lane.b32.xlu1 %v3512_v6, %s2902_s0 }
 0xc07   :  { %1530 = vrot.lane.b32.xlu1 %v3520_v13, %s2901_s8 }
 0xc0b   :  { %1642 = vrot.lane.b32.xlu1 %v3520_v13, %s2900_s5 }
 0xc0f   :  { %1640 = vrot.lane.b32.xlu1 %v3520_v13, %s2902_s0 }
 0xc6d   :  { %v1302_v14 = vpop.permute.xlu1 %1301 }
 0xc6e   :  { %v1307_v15 = vsel %vm406_vm9, %v1302_v14, 0 }
 0xc6f   :  { %2634 = vmatpush3.bf16.xpose.msra.mxu0 %v1307_v15 }
 0xc70   :  { %2639 = vmatprep.subr.bf16.mxu0 %v2898_v49 }
 0xc71   :  { %v1414_v1 = vpop.permute.xlu1 %1413 }
 0xc72   :  { %v1419_v7 = vsel %vm406_vm9, %v1414_v1, 0 }
 0xc75   :  { %v1412_v34 = vpop.permute.xlu1 %1411 }
 0xc76   :  { %2636 = vmatmul.mubr.msk.bf16.vlgmr.msra.gmra.mxu0 %vm406_vm9, %v3512_v6 }
 0xc77   :  { %2641 = vmatprep.mubr.msk.bf16.mxu0 %vm2899_vm8, %v2898_v49 }
 0xc79   :  { %v1531_v23 = vpop.permute.xlu1 %1530 }
 0xc7a   :  { %v1536_v35 = vsel %vm406_vm9, %v1531_v23, 0 }
 0xc7d   :  { %v1643_v36 = vpop.permute.xlu1 %1642 }
 0xc7e   :  { %v1648_v38 = vsel %vm406_vm9, %v1643_v36, 0  ;;  %v2770_v36 = vld [vmem:[%s3721_s10 + $0x18] sm:$0xff]  }
 0xc81   :  { %v1641_v39 = vpop.permute.xlu1 %1640 }
 0xd36   :  { %v1343_v16 = vpop.f32.mrf.mxu0 }
 0xd37   :  { %v1349_v18 = vmul.f32 0.25, %v1343_v16 }
 0xd38   :  { %v2637_v19 = vpop.f32.mrf.mxu0 }
 0xd39   :  { %v1350_v11 = vadd.f32 %v1349_v18, %v3350_v32 }
 0xd3a   :  { %v1346_v20 = vpop.f32.mrf.mxu0 }
 0xd3b   :  { %v1351_v21 = vsel %vm459_vm10, %v1350_v11, -inf }
 0xd3c   :  { %1352 = vmax.xlane.f32.xlu0 %v1351_v21  ;;  %v2638_v22 = vpop.f32.mrf.mxu0 }
 0xdc5   :  { %v1353_v24 = vpop.xlane.xlu0 %1352 }
 0xdc6   :  { %v1354_v25 = vsub.f32 %v1350_v11, %v1353_v24 }
 0xdc8   :  { %v1355_v17 = vmul.f32 1.442695, %v1354_v25 }
 0xdca   :  { %2818 = vpow2.f32 %v1355_v17 }
 0xdd7   :  { %v2819_v26 = vpop.eup %2818 }
 0xdd8   :  { %v1357_v27 = vsel %vm459_vm10, %v2819_v26, 0.0 }
 0xdd9   :  { %1358 = vadd.xlane.f32.xlu0 %v1357_v27 }
 0xdef   :  { %1363 = vrot.lane.b32.xlu0 %v3512_v6, %s2904_s26 }
 0xe62   :  { %v1359_v28 = vpop.xlane.xlu0 %1358 }
 0xe63   :  { %2820 = vrcp.f32 %v1359_v28 }
 0xe66   :  { %v1364_v9 = vpop.permute.xlu0 %1363 }
 0xe67   :  { %v1369_v29 = vsel %vm269_vm3, %v1364_v9, 0 }
 0xe68   :  { %2640 = vmatpush3.bf16.msra.mxu0 %v1369_v29 }
 0xe69   :  { %2645 = vmatprep.subr.bf16.mxu0 %v2898_v49 }
 0xe70   :  { %v2821_v31 = vpop.eup %2820 }
 0xe71   :  { %v1361_v33 = vmul.f32 %v2821_v31, %v2819_v26 }
 0xe73   :  { %v1362_v4 = vpack.c.bf16 %v1361_v33, %v1361_v33 }
 0xe75   :  { %2642 = vmatmul.mubr.msk.bf16.vlgmr.msra.gmra.mxu0 %vm459_vm10, %v1362_v4 }
 0xe76   :  { %2646 = vmatpush3.bf16.xpose.msra.mxu0 %v1419_v7  ;;  %2647 = vmatprep.mubr.msk.bf16.mxu0 %vm2899_vm8, %v2898_v49 }
 0xe77   :  { %2657 = vmatprep.subr.bf16.mxu0 %v2898_v49 }
 0xe7d   :  { %2648 = vmatmul.mubr.msk.bf16.vlgmr.msra.gmra.mxu0 %vm406_vm9, %v1412_v34 }
 0xe7e   :  { %2658 = vmatpush3.bf16.xpose.msra.mxu0 %v1536_v35  ;;  %2659 = vmatprep.mubr.msk.bf16.mxu0 %vm2899_vm8, %v2898_v49 }
 0xe7f   :  { %2669 = vmatprep.subr.bf16.mxu0 %v2898_v49 }
 0xe85   :  { %2660 = vmatmul.mubr.msk.bf16.vlgmr.msra.gmra.mxu0 %vm406_vm9, %v3520_v13 }
 0xe86   :  { %2670 = vmatpush3.bf16.xpose.msra.mxu0 %v1648_v38  ;;  %2671 = vmatprep.mubr.msk.bf16.mxu0 %vm2899_vm8, %v2898_v49 }
 0xe87   :  { %2681 = vmatprep.subr.bf16.mxu0 %v2898_v49 }
 0xe8d   :  { %2672 = vmatmul.mubr.msk.bf16.vlgmr.msra.gmra.mxu0 %vm406_vm9, %v1641_v39 }
 0xe8e   :  { %2685 = vmatprep.mubr.msk.bf16.mxu0 %vm2899_vm8, %v2898_v49  ;;  %2682 = vmatpush3.bf16.msra.mxu0 %v2770_v36  ;;  %v2776_v36 = vld [vmem:[%s3727_s16 + $0x68] sm:$0xff]  }
 0xe8f   :  { %2683 = vmatprep.subr.bf16.mxu0 %v2898_v49 }
 0xf35   :  { %v3560_v40 = vpop.f32.mrf.mxu0 }
 0xf37   :  { %v2643_v30 = vpop.f32.mrf.mxu0 }
 0xf39   :  { %v1408_v41 = vpop.f32.mrf.mxu0 }
 0xf3b   :  { %v2644_v42 = vpop.f32.mrf.mxu0 }
 0xf3c   :  { %v2771_v42 = vld [vmem:[%s3721_s10 + $0x10] sm:$0xff]  }
 0xf3d   :  { %v1455_v43 = vpop.f32.mrf.mxu0  ;;  %2684 = vmatpush3.bf16.msra.mxu0 %v2771_v42  ;;  %v2781_v42 = vld [vmem:[%s3727_s16 + $0x40] sm:$0xff]  }
 0xf3e   :  { %v1461_v37 = vmul.f32 0.25, %v1455_v43  ;;  %2697 = vmatprep.subr.bf16.mxu0 %v2898_v49 }
 0xf3f   :  { %v2649_v44 = vpop.f32.mrf.mxu0 }
 0xf40   :  { %v1462_v45 = vadd.f32 %v1461_v37, %v3350_v32 }
 0xf41   :  { %v1458_v47 = vpop.f32.mrf.mxu0 }
 0xf42   :  { %v1463_v48 = vsel %vm459_vm10, %v1462_v45, -inf }
 0xf43   :  { %1464 = vmax.xlane.f32.xlu0 %v1463_v48  ;;  %v2650_v50 = vpop.f32.mrf.mxu0 }
 0xf45   :  { %v1572_v51 = vpop.f32.mrf.mxu0 }
 0xf46   :  { %v1578_v52 = vmul.f32 0.25, %v1572_v51 }
 0xf47   :  { %v2661_v53 = vpop.f32.mrf.mxu0 }
 0xf48   :  { %v1579_v54 = vadd.f32 %v1578_v52, %v3356_v46 }
 0xf49   :  { %v1575_v55 = vpop.f32.mrf.mxu0 }
 0xf4a   :  { %v1580_v56 = vsel %vm459_vm10, %v1579_v54, -inf }
 0xf4b   :  { %1581 = vmax.xlane.f32.xlu1 %v1580_v56  ;;  %v2662_v57 = vpop.f32.mrf.mxu0 }
 0xf4d   :  { %v1684_v58 = vpop.f32.mrf.mxu0 }
 0xf4e   :  { %v1690_v59 = vmul.f32 0.25, %v1684_v58 }
 0xf4f   :  { %v2673_v60 = vpop.f32.mrf.mxu0 }
 0xf50   :  { %v1691_v32 = vadd.f32 %v1690_v59, %v3356_v46  ;;  %v2404_v59 = vld [vmem:[%s3722_s11 + $0x1] ss:$0 sm:$0xff] }
 0xf51   :  { %v1687_v63 = vpop.f32.mrf.mxu0 }
 0xf52   :  { %v1692_v0 = vsel %vm459_vm10, %v1691_v32, -inf }
 0xf53   :  { %1693 = vmax.xlane.f32.xlu0 %v1692_v0  ;;  %v2674_v5 = vpop.f32.mrf.mxu0 }
 0xf5c   :  { %1592 = vrot.lane.b32.xlu1 %v3520_v13, %s2904_s26 }
 0xfcc   :  { %v1465_v2 = vpop.xlane.xlu0 %1464 }
 0xfcd   :  { %v1466_v3 = vsub.f32 %v1462_v45, %v1465_v2 }
 0xfcf   :  { %v1467_v8 = vmul.f32 1.442695, %v1466_v3 }
 0xfd1   :  { %2822 = vpow2.f32 %v1467_v8 }
 0xfd4   :  { %v1582_v10 = vpop.xlane.xlu1 %1581 }
 0xfd5   :  { %v1583_v12 = vsub.f32 %v1579_v54, %v1582_v10 }
 0xfd7   :  { %v1584_v14 = vmul.f32 1.442695, %v1583_v12 }
 0xfd8   :  { %v1593_v17 = vpop.permute.xlu1 %1592 }
 0xfd9   :  { %2824 = vpow2.f32 %v1584_v14 }
 0xfdc   :  { %v1694_v15 = vpop.xlane.xlu0 %1693 }
 0xfdd   :  { %v1695_v16 = vsub.f32 %v1691_v32, %v1694_v15 }
 0xfde   :  { %v2823_v18 = vpop.eup %2822 }
 0xfdf   :  { %v1696_v46 = vmul.f32 1.442695, %v1695_v16  ;;  %v1469_v19 = vsel %vm459_vm10, %v2823_v18, 0.0 }
 0xfe0   :  { %1470 = vadd.xlane.f32.xlu0 %v1469_v19 }
 0xfe1   :  { %2826 = vpow2.f32 %v1696_v46 }
 0xfe6   :  { %v2825_v11 = vpop.eup %2824 }
 0xfe7   :  { %v1586_v20 = vsel %vm459_vm10, %v2825_v11, 0.0 }
 0xfe8   :  { %1587 = vadd.xlane.f32.xlu0 %v1586_v20 }
 0xfee   :  { %v2827_v21 = vpop.eup %2826 }
 0xfef   :  { %v1698_v22 = vsel %vm459_vm10, %v2827_v21, 0.0 }
 0xff0   :  { %1699 = vadd.xlane.f32.xlu1 %v1698_v22 }
 0xffe   :  { %1475 = vrot.lane.b32.xlu0 %v3512_v6, %s2903_s22  ;;  %v1598_v6 = vsel %vm269_vm3, %v1593_v17, 0 }
0x1001   :  { %1704 = vrot.lane.b32.xlu1 %v3520_v13, %s2903_s22 }
0x1069   :  { %v1471_v24 = vpop.xlane.xlu0 %1470 }
0x106a   :  { %2828 = vrcp.f32 %v1471_v24 }
0x1071   :  { %v1588_v25 = vpop.xlane.xlu0 %1587 }
0x1072   :  { %2830 = vrcp.f32 %v1588_v25 }
0x1075   :  { %v1476_v26 = vpop.permute.xlu0 %1475 }
0x1076   :  { %v1481_v27 = vsel %vm269_vm3, %v1476_v26, 0 }
0x1077   :  { %v2829_v28 = vpop.eup %2828  ;;  %2652 = vmatpush3.bf16.msra.mxu1 %v1481_v27 }
0x1078   :  { %2663 = vmatprep.subr.bf16.mxu1 %v2898_v49  ;;  %v1473_v9 = vmul.f32 %v2829_v28, %v2823_v18 }
0x1079   :  { %v1700_v29 = vpop.xlane.xlu1 %1699 }
0x107a   :  { %2832 = vrcp.f32 %v1700_v29  ;;  %v1474_v1 = vpack.c.bf16 %v1473_v9, %v1473_v9  ;;  %v2410_v29 = vld [vmem:[%s3723_s12 + $0x1] ss:$0 sm:$0xff] }
0x107c   :  { %2654 = vmatmul.mubr.msk.bf16.vlgmr.msra.gmra.mxu1 %vm459_vm10, %v1474_v1 }
0x107d   :  { %2664 = vmatpush3.bf16.msra.mxu1 %v1598_v6  ;;  %2665 = vmatprep.mubr.msk.bf16.mxu1 %vm2899_vm8, %v2898_v49  ;;  %v1705_v33 = vpop.permute.xlu1 %1704 }
0x107e   :  { %2675 = vmatprep.subr.bf16.mxu1 %v2898_v49  ;;  %v1710_v34 = vsel %vm269_vm3, %v1705_v33, 0 }
0x107f   :  { %v2831_v13 = vpop.eup %2830 }
0x1080   :  { %v1590_v31 = vmul.f32 %v2831_v13, %v2825_v11 }
0x1082   :  { %v1591_v4 = vpack.c.bf16 %v1590_v31, %v1590_v31  ;;  %v2411_v31 = vld [vmem:[%s3724_s13 + $0x1] ss:$0 sm:$0xff] }
0x1084   :  { %2666 = vmatmul.mubr.msk.bf16.vlgmr.msra.gmra.mxu1 %vm459_vm10, %v1591_v4 }
0x1085   :  { %2676 = vmatpush3.bf16.msra.mxu1 %v1710_v34  ;;  %2677 = vmatprep.mubr.msk.bf16.mxu1 %vm2899_vm8, %v2898_v49 }
0x1086   :  { %2689 = vmatprep.subr.bf16.mxu1 %v2898_v49 }
0x1087   :  { %v2833_v7 = vpop.eup %2832 }
0x1088   :  { %v1702_v23 = vmul.f32 %v2833_v7, %v2827_v21  ;;  %v2773_v21 = vld [vmem:[%s3725_s14 + $0x10] sm:$0xff]  }
0x108a   :  { %v1703_v35 = vpack.c.bf16 %v1702_v23, %v1702_v23  ;;  %v2774_v23 = vld [vmem:[%s3727_s16 + $0x78] sm:$0xff]  }
0x108c   :  { %2678 = vmatmul.mubr.msk.bf16.vlgmr.msra.gmra.mxu1 %vm459_vm10, %v1703_v35  ;;  %v2775_v35 = vld [vmem:[%s3727_s16 + $0x70] sm:$0xff]  }
0x108d   :  { %2693 = vmatprep.mubr.msk.bf16.mxu1 %vm2899_vm8, %v2898_v49 }
0x113c   :  { %v1517_v38 = vpop.f32.mrf.mxu1 }
0x113e   :  { %v2655_v39 = vpop.f32.mrf.mxu1 }
0x113f   :  { %v2778_v39 = vld [vmem:[%s3727_s16 + $0x58] sm:$0xff]  }
0x1140   :  { %v1520_v30 = vpop.f32.mrf.mxu1 }
0x1141   :  { %v2779_v30 = vld [vmem:[%s3727_s16 + $0x50] sm:$0xff]  }
0x1142   :  { %v2656_v41 = vpop.f32.mrf.mxu1 }
0x1143   :  { %v2780_v41 = vld [vmem:[%s3727_s16 + $0x48] sm:$0xff]  }
0x1144   :  { %v1634_v43 = vpop.f32.mrf.mxu1 }
0x1146   :  { %v2667_v37 = vpop.f32.mrf.mxu1 }
0x1148   :  { %v1637_v44 = vpop.f32.mrf.mxu1 }
0x114a   :  { %v2668_v45 = vpop.f32.mrf.mxu1 }
0x114c   :  { %v1746_v47 = vpop.f32.mrf.mxu1 }
0x114d   :  { %v2749_v48 = vpack.i.bf16 %v1746_v47, %v1517_v38  ;;  %v2777_v38 = vld [vmem:[%s3727_s16 + $0x60] sm:$0xff]  }
0x114e   :  { %v2679_v50 = vpop.f32.mrf.mxu1 }
0x114f   :  { %2750 = vrot.lane.b32.xlu1 %v2749_v48, %s2905_s30 }
0x1150   :  { %v1749_v51 = vpop.f32.mrf.mxu1 }
0x1152   :  { %v2680_v52 = vpop.f32.mrf.mxu1 }
0x11c1   :  { %v2751_v53 = vpop.permute.xlu1 %2750 }
0x11c2   :  { %v2753_v54 = vunpack.i.h.bf16 %v2751_v53  ;;  %v2752_v55 = vunpack.i.l.bf16 %v2751_v53 }
0x11c4   :  { %v1756_v56 = vsel %vm406_vm9, %v1634_v43, %v2753_v54  ;;  %v1527_v57 = vsel %vm406_vm9, %v3560_v40, %v2752_v55  ;;  %v2417_v43 = vld [vmem:[%s3726_s15 + $0x1] ss:$0 sm:$0xff] }
0x11c5   :  { %v1762_v58 = vpack.c.bf16 %v1756_v56, %v1527_v57 }
0x11c7   :  { %2686 = vmatmul.mubr.msk.bf16.vlgmr.msra.gmra.mxu0 %vm290_vm7, %v1762_v58 }
0x11c8   :  { %2713 = vmatprep.mubr.msk.bf16.mxu0 %vm2899_vm8, %v2898_v49  ;;  %2698 = vmatpush3.bf16.msra.mxu0 %v2774_v23 }
0x11c9   :  { %2699 = vmatprep.subr.bf16.mxu0 %v2898_v49 }
0x11cc   :  { %2700 = vmatpush3.bf16.msra.mxu0 %v2775_v35  ;;  %v2449_v35 = vld [vmem:[%s3729_s18 + $0x1] ss:$0 sm:$0xff] }
0x11cd   :  { %2701 = vmatprep.subr.bf16.mxu0 %v2898_v49 }
0x11d0   :  { %2702 = vmatpush3.bf16.msra.mxu0 %v2776_v36 }
0x11d1   :  { %2703 = vmatprep.subr.bf16.mxu0 %v2898_v49 }
0x11d4   :  { %2704 = vmatpush3.bf16.msra.mxu0 %v2777_v38 }
0x11d5   :  { %2705 = vmatprep.subr.bf16.mxu0 %v2898_v49 }
0x11d8   :  { %2706 = vmatpush3.bf16.msra.mxu0 %v2778_v39 }
0x11d9   :  { %2707 = vmatprep.subr.bf16.mxu0 %v2898_v49 }
0x11dc   :  { %2708 = vmatpush3.bf16.msra.mxu0 %v2779_v30  ;;  %v2450_v30 = vld [vmem:[%s3767_s19 + $0x1] ss:$0 sm:$0xff]  ;;  %s3768_s19 = sld [smem:[#allocation20_spill]] }
0x11dd   :  { %2709 = vmatprep.subr.bf16.mxu0 %v2898_v49 }
0x11e0   :  { %2710 = vmatpush3.bf16.msra.mxu0 %v2780_v41 }
0x11e1   :  { %2711 = vmatprep.subr.bf16.mxu0 %v2898_v49 }
0x11e4   :  { %2712 = vmatpush3.bf16.msra.mxu0 %v2781_v42 }
0x1287   :  { %v1820_v60 = vpop.f32.mrf.mxu0 }
0x1288   :  { %v1821_v32 = vadd.f32 %v2404_v59, %v1820_v60 }
0x1289   :  { %v2687_v63 = vpop.f32.mrf.mxu0 }
0x128a   :  { %v1827_v0 = vadd.f32 %v1821_v32, %v3500_v61 }
0x128b   :  { %v1823_v5 = vpop.f32.mrf.mxu0 }
0x128c   :  { %v1824_v2 = vadd.f32 %v2404_v59, %v1823_v5  ;;  %v1833_v3 = vsel %vm290_vm7, %v1827_v0, 0.0 }
0x128d   :  { %1834 = vadd.xlane.f32.xlu0 %v1833_v3  ;;  %v2688_v40 = vpop.f32.mrf.mxu0 }
0x128e   :  { %v1828_v8 = vadd.f32 %v1824_v2, %v3502_v62  ;;  %v2772_v62 = vld [vmem:[%s3725_s14 + $0x18] sm:$0xff]  }
0x128f   :  { %2690 = vmatpush3.bf16.msra.mxu1 %v2772_v62 }
0x1290   :  { %v1836_v10 = vsel %vm290_vm7, %v1828_v8, 0.0  ;;  %2691 = vmatprep.subr.bf16.mxu1 %v2898_v49 }
0x1291   :  { %1837 = vadd.xlane.f32.xlu1 %v1836_v10 }
0x1293   :  { %2692 = vmatpush3.bf16.msra.mxu1 %v2773_v21 }
0x1294   :  { %2717 = vmatprep.subr.bf16.mxu1 %v2898_v49 }
0x1316   :  { %v1835_v12 = vpop.xlane.xlu0 %1834 }
0x1317   :  { %v1839_v14 = vmul.f32 0.03125, %v1835_v12  ;;  %v2438_v12 = vld [vmem:[%s3728_s17 + $0x1] ss:$0 sm:$0xff] }
0x1319   :  { %v1841_v15 = vsub.f32 %v1827_v0, %v1839_v14 }
0x131a   :  { %v1838_v16 = vpop.xlane.xlu1 %1837 }
0x131b   :  { %v1840_v18 = vmul.f32 0.03125, %v1838_v16  ;;  %v1843_v46 = vmul.f32 %v1841_v15, %v1841_v15 }
0x131d   :  { %v1842_v19 = vsub.f32 %v1828_v8, %v1840_v18  ;;  %v1845_v61 = vsel %vm290_vm7, %v1843_v46, 0.0 }
0x131e   :  { %1846 = vadd.xlane.f32.xlu0 %v1845_v61 }
0x131f   :  { %v1844_v11 = vmul.f32 %v1842_v19, %v1842_v19 }
0x1321   :  { %v1848_v20 = vsel %vm290_vm7, %v1844_v11, 0.0 }
0x1322   :  { %1849 = vadd.xlane.f32.xlu0 %v1848_v20 }
0x13a7   :  { %v1847_v22 = vpop.xlane.xlu0 %1846 }
0x13a8   :  { %v1851_v24 = vmul.f32 0.03125, %v1847_v22 }
0x13aa   :  { %v1853_v25 = vadd.f32 1e-12, %v1851_v24 }
0x13ab   :  { %v1850_v17 = vpop.xlane.xlu0 %1849 }
0x13ac   :  { %2834 = vrsqrt.f32 %v1853_v25  ;;  %v1852_v26 = vmul.f32 0.03125, %v1850_v17 }
0x13ae   :  { %v1854_v27 = vadd.f32 1e-12, %v1852_v26 }
0x13b0   :  { %2836 = vrsqrt.f32 %v1854_v27 }
0x13b9   :  { %v2835_v28 = vpop.eup %2834 }
0x13ba   :  { %v1857_v9 = vmul.f32 %v2835_v28, %v1841_v15 }
0x13bc   :  { %v1865_v13 = vmul.f32 %v2410_v29, %v1857_v9 }
0x13bd   :  { %v2837_v1 = vpop.eup %2836 }
0x13be   :  { %v1858_v6 = vmul.f32 %v2837_v1, %v1842_v19  ;;  %v1873_v4 = vadd.f32 %v2411_v31, %v1865_v13  ;;  %v2782_v1 = vld [vmem:[%s3731_s20 + $0x8] sm:$0xff]  }
0x13c0   :  { %v1866_v33 = vmul.f32 %v2410_v29, %v1858_v6  ;;  %v2783_v6 = vld [vmem:[%s3731_s20] sm:$0xff]  }
0x13c2   :  { %v3630_v34 = vadd.f32 %v2411_v31, %v1866_v33 }
0x13c4   :  { %v1880_v7 = vpack.c.bf16 %v3630_v34, %v1873_v4 }
0x13c6   :  { %2694 = vmatmul.mubr.msk.bf16.vlgmr.msra.gmra.mxu1 %vm290_vm7, %v1880_v7 }
0x13c7   :  { %2721 = vmatprep.mubr.msk.bf16.mxu1 %vm2899_vm8, %v2898_v49  ;;  %2718 = vmatpush3.bf16.msra.mxu1 %v2782_v1 }
0x13c8   :  { %2719 = vmatprep.subr.bf16.mxu1 %v2898_v49 }
0x13cb   :  { %2720 = vmatpush3.bf16.msra.mxu1 %v2783_v6 }
0x13cc   :  { %2725 = vmatprep.subr.bf16.mxu1 %v2898_v49 }
0x1486   :  { %v1938_v37 = vpop.f32.mrf.mxu1 }
0x1487   :  { %v1939_v44 = vadd.f32 %v2417_v43, %v1938_v37 }
0x1488   :  { %v2695_v45 = vpop.f32.mrf.mxu1 }
0x1489   :  { %v1947_v47 = vmul.f32 0.044715, %v1939_v44  ;;  %v1945_v5 = vmul.f32 0.5, %v1939_v44 }
0x148a   :  { %v1941_v48 = vpop.f32.mrf.mxu1 }
0x148b   :  { %v1949_v50 = vmul.f32 %v1947_v47, %v1939_v44  ;;  %v1942_v51 = vadd.f32 %v2417_v43, %v1941_v48 }
0x148c   :  { %v2696_v52 = vpop.f32.mrf.mxu1 }
0x148d   :  { %v1951_v53 = vmul.f32 %v1949_v50, %v1939_v44  ;;  %v1948_v54 = vmul.f32 0.044715, %v1942_v51  ;;  %v1946_v2 = vmul.f32 0.5, %v1942_v51 }
0x148f   :  { %v1953_v55 = vadd.f32 %v1951_v53, %v1939_v44  ;;  %v1950_v56 = vmul.f32 %v1948_v54, %v1942_v51  ;;  %v2784_v53 = vld [vmem:[%s3768_s19 + $0x8] sm:$0xff]   ;;  %v2785_v54 = vld [vmem:[%s3768_s19] sm:$0xff]  }
0x1491   :  { %v1955_v57 = vmul.f32 0.7978846, %v1953_v55  ;;  %v1952_v58 = vmul.f32 %v1950_v56, %v1942_v51  ;;  %v2451_v55 = vld [vmem:[%s3769_s27] ss:$0 sm:$0xff] }
0x1493   :  { %2838 = vtanh.f32 %v1955_v57  ;;  %v1954_v59 = vadd.f32 %v1952_v58, %v1942_v51 }
0x1495   :  { %v1956_v60 = vmul.f32 0.7978846, %v1954_v59 }
0x1497   :  { %2840 = vtanh.f32 %v1956_v60 }
0x14a0   :  { %v2839_v32 = vpop.eup %2838 }
0x14a1   :  { %v1959_v63 = vadd.f32 1.0, %v2839_v32 }
0x14a3   :  { %v1961_v40 = vmul.f32 %v1959_v63, %v1945_v5 }
0x14a4   :  { %v2841_v0 = vpop.eup %2840 }
0x14a5   :  { %v1960_v3 = vadd.f32 1.0, %v2841_v0 }
0x14a7   :  { %v1962_v8 = vmul.f32 %v1960_v3, %v1946_v2 }
0x14a9   :  { %v1980_v10 = vpack.c.bf16 %v1962_v8, %v1961_v40 }
0x14ab   :  { %2714 = vmatmul.mubr.bf16.vlgmr.msra.gmra.mxu0 %v1980_v10 }
0x156b   :  { %v2071_v14 = vpop.f32.mrf.mxu0 }
0x156c   :  { %v2072_v15 = vadd.f32 %v2438_v12, %v2071_v14 }
0x156d   :  { %v2715_v16 = vpop.f32.mrf.mxu0 }
0x156e   :  { %v2078_v18 = vadd.f32 %v2072_v15, %v1873_v4 }
0x156f   :  { %v2074_v46 = vpop.f32.mrf.mxu0 }
0x1570   :  { %v2075_v19 = vadd.f32 %v2438_v12, %v2074_v46  ;;  %v2084_v61 = vsel %vm290_vm7, %v2078_v18, 0.0 }
0x1571   :  { %2085 = vadd.xlane.f32.xlu1 %v2084_v61  ;;  %v2716_v11 = vpop.f32.mrf.mxu0 }
0x1572   :  { %v2079_v20 = vadd.f32 %v2075_v19, %v3630_v34 }
0x1574   :  { %v2087_v62 = vsel %vm290_vm7, %v2079_v20, 0.0 }
0x1575   :  { %2088 = vadd.xlane.f32.xlu0 %v2087_v62 }
0x15fa   :  { %v2086_v21 = vpop.xlane.xlu1 %2085 }
0x15fb   :  { %v2090_v22 = vmul.f32 0.03125, %v2086_v21 }
0x15fd   :  { %v2092_v24 = vsub.f32 %v2078_v18, %v2090_v22 }
0x15fe   :  { %v2089_v25 = vpop.xlane.xlu0 %2088 }
0x15ff   :  { %v2091_v17 = vmul.f32 0.03125, %v2089_v25  ;;  %v2094_v26 = vmul.f32 %v2092_v24, %v2092_v24 }
0x1601   :  { %v2093_v27 = vsub.f32 %v2079_v20, %v2091_v17  ;;  %v2096_v28 = vsel %vm290_vm7, %v2094_v26, 0.0 }
0x1602   :  { %2097 = vadd.xlane.f32.xlu1 %v2096_v28 }
0x1603   :  { %v2095_v9 = vmul.f32 %v2093_v27, %v2093_v27 }
0x1605   :  { %v2099_v29 = vsel %vm290_vm7, %v2095_v9, 0.0 }
0x1606   :  { %2100 = vadd.xlane.f32.xlu0 %v2099_v29 }
0x168b   :  { %v2098_v13 = vpop.xlane.xlu1 %2097 }
0x168c   :  { %v2102_v31 = vmul.f32 0.03125, %v2098_v13 }
0x168e   :  { %v2104_v33 = vadd.f32 1e-12, %v2102_v31 }
0x168f   :  { %v2101_v4 = vpop.xlane.xlu0 %2100 }
0x1690   :  { %2842 = vrsqrt.f32 %v2104_v33  ;;  %v2103_v34 = vmul.f32 0.03125, %v2101_v4 }
0x1692   :  { %v2105_v7 = vadd.f32 1e-12, %v2103_v34 }
0x1694   :  { %2844 = vrsqrt.f32 %v2105_v7 }
0x169d   :  { %v2843_v23 = vpop.eup %2842 }
0x169e   :  { %v2108_v36 = vmul.f32 %v2843_v23, %v2092_v24 }
0x16a0   :  { %v2116_v38 = vmul.f32 %v2449_v35, %v2108_v36 }
0x16a1   :  { %v2845_v39 = vpop.eup %2844 }
0x16a2   :  { %v2109_v41 = vmul.f32 %v2845_v39, %v2093_v27  ;;  %v2124_v43 = vadd.f32 %v2450_v30, %v2116_v38 }
0x16a4   :  { %v2117_v42 = vmul.f32 %v2449_v35, %v2109_v41  ;;  %v2130_v44 = vpack.c.bf16 %v2124_v43, %v2124_v43 }
0x16a6   :  { %v2125_v37 = vadd.f32 %v2450_v30, %v2117_v42  ;;  %v2141_v48 = vunpack.c.l.b16 %v2130_v44 }
0x16a8   :  { %v2131_v45 = vpack.c.bf16 %v2125_v37, %v2125_v37 }
0x16aa   :  { %v2142_v47 = vunpack.c.l.b16 %v2131_v45 }
0x16ac   :  { %v2143_v50 = vrot.slane %v2142_v47, 7 }
0x16ae   :  { %v2145_v51 = vsel %vm2144_vm11, %v2143_v50, %v2141_v48 }
0x16af   :  { %v2146_v52 = vpack.c.b16 %v2145_v51, %v2145_v51 }
0x16b1   :  { %2722 = vmatmul.mubr.msk.bf16.vlgmr.msra.gmra.mxu1 %vm290_vm7, %v2146_v52 }
0x16b2   :  { %2729 = vmatprep.mubr.msk.bf16.mxu1 %vm2899_vm8, %v2898_v49  ;;  %2726 = vmatpush3.bf16.msra.mxu1 %v2784_v53 }
0x16b3   :  { %2727 = vmatprep.subr.bf16.mxu1 %v2898_v49  ;;  %v2455_v49 = vld [vmem:[%s3770_s4] ss:$0 sm:$0xff] }
0x16b6   :  { %2728 = vmatpush3.bf16.msra.mxu1 %v2785_v54 }
0x1771   :  { %v2196_v56 = vpop.f32.mrf.mxu1 }
0x1772   :  { %v2197_v57 = vadd.f32 %v2451_v55, %v2196_v56 }
0x1773   :  { %v2723_v58 = vpop.f32.mrf.mxu1 }
0x1774   :  { %2846 = vtanh.f32 %v2197_v57 }
0x1775   :  { %v2199_v59 = vpop.f32.mrf.mxu1 }
0x1777   :  { %v2724_v60 = vpop.f32.mrf.mxu1 }
0x1781   :  { %v2847_v32 = vpop.eup %2846 }
0x1782   :  { %v2207_v63 = vpack.c.bf16 %v2847_v32, %v2847_v32 }
0x1784   :  { %2730 = vmatmul.mubr.msk.bf16.vlgmr.msra.gmra.mxu1 %vm290_vm7, %v2207_v63 }
0x1844   :  { %v2264_v0 = vpop.f32.mrf.mxu1 }
0x1845   :  { %v2265_v5 = vadd.f32 %v2455_v49, %v2264_v0 }
0x1846   :  { %v2731_v2 = vpop.f32.mrf.mxu1 }
0x1847   :  { %2270 = vst [vmem:[#allocation5] sm:$0x3] %v2265_v5 }
0x1848   :  { %v2267_v3 = vpop.f32.mrf.mxu1 }
0x1849   :  { %2883 = shalt.err (!%p2880_p0)
}
0x184a   :  { %s3771_s8 = sld [smem:[#allocation22_spill]]  ;;  %v2732_v40 = vpop.f32.mrf.mxu1 }
0x1850   :  { %2280 = dma.vmem_to_hbm [thread:$0]  %s2278_s21, 32, %s3771_s8, [#allocation6]  }
0x1851   :  { %2894 = dma.done.wait [#allocation6], 32  }
0x1852   :  { %2895 = vsyncadd [#allocation6], 4294967264 }
0x1853   :  { %2284 = vsyncpa [#allocation6], 1 }

</bundles_post_ra>
